<compile_context>
chip_gen: v7x
topology: tpu7x:2x2x1
jax: 0.10.0
libtpu: 0.0.40
codegen_flags: <defaults>
</compile_context>

<pallas_src>
import functools

import jax
import jax.numpy as jnp
from jax.experimental import pallas as pl
from jax.experimental.pallas import tpu as pltpu

# Full-precision f32 matmuls everywhere (kernel *and* reference) so the
# correctness check below is meaningful.
jax.config.update("jax_default_matmul_precision", "highest")

_LN_EPS = 1e-5


# ---------------------------------------------------------------------------
# helpers
# ---------------------------------------------------------------------------
def _row_tile(n, target):
    """Largest tile <= target dividing n that satisfies the (8, 128) rule."""
    t = min(n, target)
    while t > 1 and n % t != 0:
        t //= 2
    if t != n and t % 8 != 0:
        t = n                       # fall back to the full dimension
    return t


def _vmem_limit(*byte_counts):
    """Explicit scoped-VMEM budget: ~2x working set (double buffering) plus
    headroom, clamped to the smallest per-core VMEM of the targets (v7x 64MiB)."""
    need = int(sum(byte_counts))
    return int(min(max(2 * need + (2 << 20), 8 << 20), 64 << 20))


def _layernorm_f32(x_f32, g_ref, b_ref, eps):
    """LayerNorm statistics in f32 (v5e has no bf16 VPU)."""
    mu = jnp.mean(x_f32, axis=-1, keepdims=True)
    xc = x_f32 - mu
    var = jnp.mean(xc * xc, axis=-1, keepdims=True)
    ln = xc * jax.lax.rsqrt(var + eps)
    return ln * g_ref[...].astype(jnp.float32) + b_ref[...].astype(jnp.float32)


# ---------------------------------------------------------------------------
# kernel 1: LayerNorm + (scale-folded) QKV projection      out = LN(x) @ Wqkv
#   operates on the flattened (B*N, D) row axis
# ---------------------------------------------------------------------------
def _ln_matmul_kernel(x_ref, g_ref, b_ref, w_ref, o_ref, *, eps):
    x = x_ref[...].astype(jnp.float32)                        # (TR, D)
    ln = _layernorm_f32(x, g_ref, b_ref, eps)
    ln = ln.astype(w_ref.dtype)                               # native MXU dtype
    o_ref[...] = jnp.dot(ln, w_ref[...],
                         preferred_element_type=jnp.float32).astype(o_ref.dtype)


def _ln_matmul(x2, gamma, beta, w, *, row_tile=256):
    M, D = x2.shape
    Dout = w.shape[1]
    TR = _row_tile(M, row_tile)
    gamma2, beta2 = gamma.reshape(1, D), beta.reshape(1, D)
    itm = x2.dtype.itemsize
    limit = _vmem_limit(w.nbytes, gamma2.nbytes + beta2.nbytes,
                        2 * TR * D * itm, 2 * TR * Dout * itm)
    kernel = functools.partial(_ln_matmul_kernel, eps=_LN_EPS)
    return pl.pallas_call(
        kernel,
        out_shape=jax.ShapeDtypeStruct((M, Dout), x2.dtype),
        grid=(M // TR,),
        in_specs=[
            pl.BlockSpec((TR, D), lambda r: (r, 0)),
            pl.BlockSpec((1, D), lambda r: (0, 0)),
            pl.BlockSpec((1, D), lambda r: (0, 0)),
            # Resident weight: constant index_map -> fetched once, no re-DMA.
            pl.BlockSpec((D, Dout), lambda r: (0, 0)),
        ],
        out_specs=pl.BlockSpec((TR, Dout), lambda r: (r, 0)),
        compiler_params=pltpu.CompilerParams(
            dimension_semantics=("parallel",),
            vmem_limit_bytes=limit),
    )(x2, gamma2, beta2, w)


# ---------------------------------------------------------------------------
# kernel 2a: single-KV-block attention (softmax in one pass, no scratch)
#   q : (B, H, N, dh), k/v : (B, H, N, dh); scale already folded into q.
# ---------------------------------------------------------------------------
def _attn_single_kernel(q_ref, k_ref, v_ref, o_ref):
    q = q_ref[0]                                  # (H, TQ, dh), native dtype
    k = k_ref[0]                                  # (H, N,  dh)
    v = v_ref[0]                                  # (H, N,  dh)

    s = jnp.einsum("hqd,hkd->hqk", q, k,
                   preferred_element_type=jnp.float32)        # (H, TQ, N)
    m = s.max(axis=-1, keepdims=True)
    p = jnp.exp(s - m)
    l = p.sum(axis=-1, keepdims=True)
    o = jnp.einsum("hqk,hkd->hqd", p.astype(v.dtype), v,
                   preferred_element_type=jnp.float32)
    o_ref[0] = (o * pl.reciprocal(l, approx=True)).astype(o_ref.dtype)


# ---------------------------------------------------------------------------
# kernel 2b: flash attention (online softmax), all heads batched per block
# ---------------------------------------------------------------------------
def _flash_attn_kernel(q_ref, k_ref, v_ref, o_ref, m_sc, l_sc, acc_sc):
    kv = pl.program_id(2)

    @pl.when(kv == 0)
    def _():
        m_sc[...] = jnp.full(m_sc.shape, -jnp.inf, dtype=m_sc.dtype)
        l_sc[...] = jnp.zeros(l_sc.shape, dtype=l_sc.dtype)
        acc_sc[...] = jnp.zeros(acc_sc.shape, dtype=acc_sc.dtype)

    q = q_ref[0]                                  # (H, TQ, dh), native dtype
    k = k_ref[0]                                  # (H, TK, dh)
    v = v_ref[0]                                  # (H, TK, dh)

    # Batched over heads: no per-head Python loop, no explicit k.T; f32 accum.
    s = jnp.einsum("hqd,hkd->hqk", q, k,
                   preferred_element_type=jnp.float32)        # (H, TQ, TK)

    m_prev = m_sc[...]
    m_new = jnp.maximum(m_prev, s.max(axis=-1, keepdims=True))
    alpha = jnp.exp(m_prev - m_new)
    p = jnp.exp(s - m_new)

    l_sc[...] = alpha * l_sc[...] + p.sum(axis=-1, keepdims=True)
    acc_sc[...] = alpha * acc_sc[...] + jnp.einsum(
        "hqk,hkd->hqd", p.astype(v.dtype), v,
        preferred_element_type=jnp.float32)
    m_sc[...] = m_new

    @pl.when(kv == pl.num_programs(2) - 1)
    def _():
        inv_l = pl.reciprocal(l_sc[...], approx=True)         # EUP slot
        o_ref[0] = (acc_sc[...] * inv_l).astype(o_ref.dtype)


def _attention(q, k, v, *, tq=None, tk=None):
    B, H, N, dh = q.shape
    TQ = tq if tq is not None else _row_tile(N, 128)
    TK = tk if tk is not None else _row_tile(N, 128)
    itm = q.dtype.itemsize

    if TK >= N:
        # Whole KV fits in one block: skip online-softmax bookkeeping entirely.
        limit = _vmem_limit(2 * H * TQ * dh * itm,            # q block + out block
                            2 * 2 * H * N * dh * itm,         # k, v (double-buffered)
                            4 * H * TQ * N,                   # f32 score tile
                            4 * H * TQ * dh)                  # f32 output accum
        return pl.pallas_call(
            _attn_single_kernel,
            out_shape=jax.ShapeDtypeStruct((B, H, N, dh), q.dtype),
            grid=(B, N // TQ),
            in_specs=[
                pl.BlockSpec((1, H, TQ, dh), lambda b, qi: (b, 0, qi, 0)),
                pl.BlockSpec((1, H, N, dh), lambda b, qi: (b, 0, 0, 0)),
                pl.BlockSpec((1, H, N, dh), lambda b, qi: (b, 0, 0, 0)),
            ],
            out_specs=pl.BlockSpec((1, H, TQ, dh), lambda b, qi: (b, 0, qi, 0)),
            compiler_params=pltpu.CompilerParams(
                dimension_semantics=("parallel", "parallel"),
                vmem_limit_bytes=limit),
        )(q, k, v)

    limit = _vmem_limit(2 * H * TQ * dh * itm,        # q block + out block
                        2 * 2 * H * TK * dh * itm,    # k, v (double-buffered)
                        4 * H * TQ * (dh + 2),        # f32 m / l / acc scratch
                        4 * H * TQ * TK)              # f32 score tile
    return pl.pallas_call(
        _flash_attn_kernel,
        out_shape=jax.ShapeDtypeStruct((B, H, N, dh), q.dtype),
        grid=(B, N // TQ, N // TK),
        in_specs=[
            pl.BlockSpec((1, H, TQ, dh), lambda b, qi, ki: (b, 0, qi, 0)),
            pl.BlockSpec((1, H, TK, dh), lambda b, qi, ki: (b, 0, ki, 0)),
            pl.BlockSpec((1, H, TK, dh), lambda b, qi, ki: (b, 0, ki, 0)),
        ],
        out_specs=pl.BlockSpec((1, H, TQ, dh), lambda b, qi, ki: (b, 0, qi, 0)),
        scratch_shapes=[
            pltpu.VMEM((H, TQ, 1), jnp.float32),     # running max
            pltpu.VMEM((H, TQ, 1), jnp.float32),     # running denominator
            pltpu.VMEM((H, TQ, dh), jnp.float32),    # running numerator
        ],
        compiler_params=pltpu.CompilerParams(
            dimension_semantics=("parallel", "parallel", "arbitrary"),
            vmem_limit_bytes=limit),
    )(q, k, v)


# ---------------------------------------------------------------------------
# kernel 3: output projection + bias + residual       out = x + a @ Wout + b
#   operates on the flattened (B*N, D) row axis
# ---------------------------------------------------------------------------
def _proj_residual_kernel(a_ref, x_ref, w_ref, b_ref, o_ref):
    y = jnp.dot(a_ref[...], w_ref[...], preferred_element_type=jnp.float32)
    y = y + b_ref[...].astype(jnp.float32) + x_ref[...].astype(jnp.float32)
    o_ref[...] = y.astype(o_ref.dtype)


def _proj_bias_residual(x2, a2, w, b, *, row_tile=256):
    M, D = x2.shape
    TR = _row_tile(M, row_tile)
    b2 = b.reshape(1, D)
    itm = x2.dtype.itemsize
    limit = _vmem_limit(w.nbytes, b2.nbytes, 3 * 2 * TR * D * itm)
    return pl.pallas_call(
        _proj_residual_kernel,
        out_shape=jax.ShapeDtypeStruct((M, D), x2.dtype),
        grid=(M // TR,),
        in_specs=[
            pl.BlockSpec((TR, D), lambda r: (r, 0)),   # attention out
            pl.BlockSpec((TR, D), lambda r: (r, 0)),   # residual x
            pl.BlockSpec((D, D), lambda r: (0, 0)),    # resident weight
            pl.BlockSpec((1, D), lambda r: (0, 0)),
        ],
        out_specs=pl.BlockSpec((TR, D), lambda r: (r, 0)),
        compiler_params=pltpu.CompilerParams(
            dimension_semantics=("parallel",),
            vmem_limit_bytes=limit),
    )(a2, x2, w, b2)


# ---------------------------------------------------------------------------
# kernel 4: LayerNorm + MLP + residual   out = x + gelu(LN(x)@W1+b1)@W2 + b2
#   operates on the flattened (B*N, D) row axis
# ---------------------------------------------------------------------------
def _ln_mlp_residual_kernel(x_ref, g_ref, bln_ref, w1_ref, b1_ref,
                            w2_ref, b2_ref, o_ref, *, eps):
    xf = x_ref[...].astype(jnp.float32)                       # (TR, D)
    ln = _layernorm_f32(xf, g_ref, bln_ref, eps)
    ln = ln.astype(w1_ref.dtype)                              # native MXU dtype

    h = jnp.dot(ln, w1_ref[...], preferred_element_type=jnp.float32)
    h = h + b1_ref[...].astype(jnp.float32)                   # (TR, F) f32
    # TODO(synk): PyTorch nn.GELU() is the exact erf form; tanh approximation
    # is used here for portable EUP lowering (max abs deviation ~5e-4).
    c = 0.7978845608028654                                    # sqrt(2/pi)
    g = 0.5 * h * (1.0 + jnp.tanh(c * (h + 0.044715 * h * h * h)))
    g = g.astype(w2_ref.dtype)

    y = jnp.dot(g, w2_ref[...], preferred_element_type=jnp.float32)
    y = y + b2_ref[...].astype(jnp.float32) + xf              # residual
    o_ref[...] = y.astype(o_ref.dtype)


def _ln_mlp_residual(x2, gamma, beta, w1, b1, w2, b2, *, row_tile=256):
    M, D = x2.shape
    F = w1.shape[1]
    TR = _row_tile(M, row_tile)
    gamma2, beta2 = gamma.reshape(1, D), beta.reshape(1, D)
    b1_2, b2_2 = b1.reshape(1, F), b2.reshape(1, D)
    itm = x2.dtype.itemsize
    limit = _vmem_limit(w1.nbytes, w2.nbytes,
                        gamma2.nbytes + beta2.nbytes + b1_2.nbytes + b2_2.nbytes,
                        2 * 2 * TR * D * itm, 4 * TR * F)
    kernel = functools.partial(_ln_mlp_residual_kernel, eps=_LN_EPS)
    return pl.pallas_call(
        kernel,
        out_shape=jax.ShapeDtypeStruct((M, D), x2.dtype),
        grid=(M // TR,),
        in_specs=[
            pl.BlockSpec((TR, D), lambda r: (r, 0)),
            pl.BlockSpec((1, D), lambda r: (0, 0)),
            pl.BlockSpec((1, D), lambda r: (0, 0)),
            pl.BlockSpec((D, F), lambda r: (0, 0)),    # resident weight
            pl.BlockSpec((1, F), lambda r: (0, 0)),
            pl.BlockSpec((F, D), lambda r: (0, 0)),    # resident weight
            pl.BlockSpec((1, D), lambda r: (0, 0)),
        ],
        out_specs=pl.BlockSpec((TR, D), lambda r: (r, 0)),
        compiler_params=pltpu.CompilerParams(
            dimension_semantics=("parallel",),
            vmem_limit_bytes=limit),
    )(x2, gamma2, beta2, w1, b1_2, w2, b2_2)


# ---------------------------------------------------------------------------
# full transformer forward (Pallas)
# ---------------------------------------------------------------------------
def _attention_block(x, layer, *, heads):
    B, N, D = x.shape
    dh = D // heads
    scale = float(D) ** (-0.5)       # module uses dim**-0.5 (NOT head_dim**-0.5)

    # Fold the softmax scale into the q-projection columns: one (D, D) scale
    # outside the kernels instead of an (N, N) scale per score tile.
    w_qkv = layer["w_qkv"]
    w_qkv = jnp.concatenate([w_qkv[:, :D] * scale, w_qkv[:, D:]], axis=1)

    x2 = x.reshape(B * N, D)
    qkv = _ln_matmul(x2, layer["ln1_g"], layer["ln1_b"], w_qkv)      # (B*N, 3D)
    # 'b n (qkv h d) -> qkv b h n d'  (XLA layout plumbing, outside kernels)
    qkv = qkv.reshape(B, N, 3, heads, dh).transpose(2, 0, 3, 1, 4)
    q, k, v = qkv[0], qkv[1], qkv[2]

    attn = _attention(q, k, v)                                       # (B,H,N,dh)
    attn2 = attn.transpose(0, 2, 1, 3).reshape(B * N, D)             # 'b h n d -> b n (h d)'
    out2 = _proj_bias_residual(x2, attn2, layer["w_out"], layer["b_out"])
    return out2.reshape(B, N, D)


def transformer_pallas(x, params, *, heads):
    B, N, D = x.shape
    for layer in params:
        x = _attention_block(x, layer, heads=heads)
        x2 = _ln_mlp_residual(x.reshape(B * N, D),
                              layer["ln2_g"], layer["ln2_b"],
                              layer["w1"], layer["b1"],
                              layer["w2"], layer["b2"])
        x = x2.reshape(B, N, D)
    return x


# ---------------------------------------------------------------------------
# pure-JAX reference mirroring the PyTorch module
# ---------------------------------------------------------------------------
def _layer_norm_ref(x, g, b, eps=_LN_EPS):
    mu = jnp.mean(x, axis=-1, keepdims=True)
    var = jnp.mean((x - mu) ** 2, axis=-1, keepdims=True)
    return (x - mu) * jax.lax.rsqrt(var + eps) * g + b


def _attention_ref(h, w_qkv, w_out, b_out, heads, scale):
    B, N, D = h.shape
    dh = D // heads
    qkv = h @ w_qkv
    qkv = qkv.reshape(B, N, 3, heads, dh).transpose(2, 0, 3, 1, 4)
    q, k, v = qkv[0], qkv[1], qkv[2]
    dots = jnp.einsum("bhid,bhjd->bhij", q, k) * scale
    attn = jax.nn.softmax(dots, axis=-1)
    out = jnp.einsum("bhij,bhjd->bhid", attn, v)
    out = out.transpose(0, 2, 1, 3).reshape(B, N, D)
    return out @ w_out + b_out


def transformer_reference(x, params, *, heads):
    D = x.shape[-1]
    scale = float(D) ** (-0.5)
    for p in params:
        h = _layer_norm_ref(x, p["ln1_g"], p["ln1_b"])
        x = x + _attention_ref(h, p["w_qkv"], p["w_out"], p["b_out"], heads, scale)
        h = _layer_norm_ref(x, p["ln2_g"], p["ln2_b"])
        x = x + (jax.nn.gelu(h @ p["w1"] + p["b1"], approximate=False)
                 @ p["w2"] + p["b2"])
    return x


def init_params(key, num_layers, dim, hidden):
    def rnd(k, shape, s=0.1):
        return s * jax.random.normal(k, shape, dtype=jnp.float32)

    params = []
    for _ in range(num_layers):
        key, *ks = jax.random.split(key, 12)
        params.append(dict(
            ln1_g=1.0 + rnd(ks[0], (dim,)), ln1_b=rnd(ks[1], (dim,)),
            w_qkv=rnd(ks[2], (dim, 3 * dim)),
            w_out=rnd(ks[3], (dim, dim)), b_out=rnd(ks[4], (dim,)),
            ln2_g=1.0 + rnd(ks[5], (dim,)), ln2_b=rnd(ks[6], (dim,)),
            w1=rnd(ks[7], (dim, hidden)), b1=rnd(ks[8], (hidden,)),
            w2=rnd(ks[9], (hidden, dim)), b2=rnd(ks[10], (dim,)),
        ))
    return params


if __name__ == "__main__":
    # Small shapes consistent with the module: batch=2, seq=8, hidden=32,
    # heads=8 (head_dim=4), intermediate=64, layers=2.
    B, N, D, HEADS, HIDDEN, LAYERS = 2, 8, 32, 8, 64, 2

    key = jax.random.PRNGKey(0)
    key, kx = jax.random.split(key)
    x = jax.random.normal(kx, (B, N, D), dtype=jnp.float32)
    params = init_params(key, LAYERS, D, HIDDEN)

    fwd = jax.jit(functools.partial(transformer_pallas, heads=HEADS))
    y = jax.block_until_ready(fwd(x, params))

    y_ref = transformer_reference(x, params, heads=HEADS)
    assert y.shape == (B, N, D)
    # Tolerance covers the approx-EUP reciprocal and the tanh-GELU approximation.
    assert jnp.allclose(y, y_ref, atol=5e-3, rtol=5e-3), (
        f"transformer mismatch vs reference: max abs err "
        f"{jnp.max(jnp.abs(y - y_ref))}")

    # Additionally exercise the multi-KV-block online-softmax (flash) path.
    kq2, kk2, kv2 = jax.random.split(jax.random.PRNGKey(1), 3)
    q2 = jax.random.normal(kq2, (2, 4, 32, 8), dtype=jnp.float32)
    k2 = jax.random.normal(kk2, (2, 4, 32, 8), dtype=jnp.float32)
    v2 = jax.random.normal(kv2, (2, 4, 32, 8), dtype=jnp.float32)
    o2 = jax.block_until_ready(_attention(q2, k2, v2, tq=8, tk=8))
    s2 = jnp.einsum("bhqd,bhkd->bhqk", q2, k2)     # scale is folded upstream
    ref2 = jnp.einsum("bhqk,bhkd->bhqd", jax.nn.softmax(s2, axis=-1), v2)
    assert jnp.allclose(o2, ref2, atol=5e-3, rtol=5e-3), (
        f"flash attention mismatch: max abs err {jnp.max(jnp.abs(o2 - ref2))}")

    print("KERNEL_OK")
</pallas_src>

<mosaic_0001>
module attributes {stable_mosaic.version = 11 : i64} {
  func.func @_ln_matmul_kernel(%arg0: i32, %arg1: memref<16x32xf32, #tpu.memory_space<vmem>>, %arg2: memref<1x32xf32, #tpu.memory_space<vmem>>, %arg3: memref<1x32xf32, #tpu.memory_space<vmem>>, %arg4: memref<32x96xf32, #tpu.memory_space<vmem>>, %arg5: memref<16x96xf32, #tpu.memory_space<vmem>>) attributes {dimension_semantics = [#tpu.dimension_semantics<parallel>], iteration_bounds = array<i64: 1>, scalar_prefetch = 0 : i64, scratch_operands = 0 : i64, tpu.core_type = #tpu.core_type<tc>, window_params = [{transform_indices = @transform_0, window_bounds = array<i64: 16, 32>}, {pipeline_mode = #tpu.pipeline_mode<synchronous>, transform_indices = @transform_1, window_bounds = array<i64: 1, 32>}, {pipeline_mode = #tpu.pipeline_mode<synchronous>, transform_indices = @transform_2, window_bounds = array<i64: 1, 32>}, {pipeline_mode = #tpu.pipeline_mode<synchronous>, transform_indices = @transform_3, window_bounds = array<i64: 32, 96>}, {transform_indices = @transform_4, window_bounds = array<i64: 16, 96>}]} {
    %c0 = arith.constant 0 : index
    %c0_0 = arith.constant 0 : index
    %0 = vector.load %arg1[%c0, %c0_0] : memref<16x32xf32, #tpu.memory_space<vmem>>, vector<16x32xf32>
    %cst = arith.constant dense<0.000000e+00> : vector<16xf32>
    %1 = vector.multi_reduction <add>, %0, %cst [1] : vector<16x32xf32> to vector<16xf32>
    %2 = vector.shape_cast %1 : vector<16xf32> to vector<16x1xf32>
    %cst_1 = arith.constant 3.200000e+01 : f32
    %3 = vector.broadcast %cst_1 : f32 to vector<16x1xf32>
    %4 = arith.divf %2, %3 : vector<16x1xf32>
    %5 = vector.broadcast %4 : vector<16x1xf32> to vector<16x32xf32>
    %6 = arith.subf %0, %5 : vector<16x32xf32>
    %7 = arith.mulf %6, %6 : vector<16x32xf32>
    %cst_2 = arith.constant dense<0.000000e+00> : vector<16xf32>
    %8 = vector.multi_reduction <add>, %7, %cst_2 [1] : vector<16x32xf32> to vector<16xf32>
    %9 = vector.shape_cast %8 : vector<16xf32> to vector<16x1xf32>
    %cst_3 = arith.constant 3.200000e+01 : f32
    %10 = vector.broadcast %cst_3 : f32 to vector<16x1xf32>
    %11 = arith.divf %9, %10 : vector<16x1xf32>
    %cst_4 = arith.constant 9.99999974E-6 : f32
    %12 = vector.broadcast %cst_4 : f32 to vector<16x1xf32>
    %13 = arith.addf %11, %12 : vector<16x1xf32>
    %14 = math.rsqrt %13 : vector<16x1xf32>
    %15 = vector.broadcast %14 : vector<16x1xf32> to vector<16x32xf32>
    %16 = arith.mulf %6, %15 : vector<16x32xf32>
    %c0_5 = arith.constant 0 : index
    %c0_6 = arith.constant 0 : index
    %17 = vector.load %arg2[%c0_5, %c0_6] : memref<1x32xf32, #tpu.memory_space<vmem>>, vector<1x32xf32>
    %18 = vector.broadcast %17 : vector<1x32xf32> to vector<16x32xf32>
    %19 = arith.mulf %16, %18 : vector<16x32xf32>
    %c0_7 = arith.constant 0 : index
    %c0_8 = arith.constant 0 : index
    %20 = vector.load %arg3[%c0_7, %c0_8] : memref<1x32xf32, #tpu.memory_space<vmem>>, vector<1x32xf32>
    %21 = vector.broadcast %20 : vector<1x32xf32> to vector<16x32xf32>
    %22 = arith.addf %19, %21 : vector<16x32xf32>
    %c0_9 = arith.constant 0 : index
    %c0_10 = arith.constant 0 : index
    %23 = vector.load %arg4[%c0_9, %c0_10] : memref<32x96xf32, #tpu.memory_space<vmem>>, vector<32x96xf32>
    %cst_11 = arith.constant dense<0.000000e+00> : vector<16x96xf32>
    %24 = tpu.matmul %22, %23, %cst_11 {dimension_numbers = #tpu.dot_dimension_numbers<[1], [0], [0], [1], [0, 0, 1, 1], [], []>, precision = #tpu.contract_precision<fp32>} : vector<16x32xf32>, vector<32x96xf32>, vector<16x96xf32> -> vector<16x96xf32>
    %c0_12 = arith.constant 0 : index
    %c0_13 = arith.constant 0 : index
    %25 = vector.load %arg5[%c0_12, %c0_13] : memref<16x96xf32, #tpu.memory_space<vmem>>, vector<16x96xf32>
    tpu.vector_store %arg5[%c0_12, %c0_13], %24 {strides = array<i32>} : memref<16x96xf32, #tpu.memory_space<vmem>>, vector<16x96xf32>,
    return
  }
  func.func @transform_0(%arg0: i32) -> (i32, i32) {
    %c0_i32 = arith.constant 0 : i32
    %c0_i32_0 = arith.constant 0 : i32
    return %arg0, %c0_i32 : i32, i32
  }
  func.func @transform_1(%arg0: i32) -> (i32, i32) {
    %c0_i32 = arith.constant 0 : i32
    %c0_i32_0 = arith.constant 0 : i32
    %c0_i32_1 = arith.constant 0 : i32
    return %c0_i32, %c0_i32_0 : i32, i32
  }
  func.func @transform_2(%arg0: i32) -> (i32, i32) {
    %c0_i32 = arith.constant 0 : i32
    %c0_i32_0 = arith.constant 0 : i32
    %c0_i32_1 = arith.constant 0 : i32
    return %c0_i32, %c0_i32_0 : i32, i32
  }
  func.func @transform_3(%arg0: i32) -> (i32, i32) {
    %c0_i32 = arith.constant 0 : i32
    %c0_i32_0 = arith.constant 0 : i32
    %c0_i32_1 = arith.constant 0 : i32
    return %c0_i32, %c0_i32_0 : i32, i32
  }
  func.func @transform_4(%arg0: i32) -> (i32, i32) {
    %c0_i32 = arith.constant 0 : i32
    %c0_i32_0 = arith.constant 0 : i32
    return %arg0, %c0_i32 : i32, i32
  }
}

module attributes {stable_mosaic.version = 11 : i64} {
  func.func @_attn_single_kernel(%arg0: i32, %arg1: i32, %arg2: memref<1x8x8x4xf32, #tpu.memory_space<vmem>>, %arg3: memref<1x8x8x4xf32, #tpu.memory_space<vmem>>, %arg4: memref<1x8x8x4xf32, #tpu.memory_space<vmem>>, %arg5: memref<1x8x8x4xf32, #tpu.memory_space<vmem>>) attributes {dimension_semantics = [#tpu.dimension_semantics<parallel>, #tpu.dimension_semantics<parallel>], iteration_bounds = array<i64: 2, 1>, scalar_prefetch = 0 : i64, scratch_operands = 0 : i64, tpu.core_type = #tpu.core_type<tc>, window_params = [{transform_indices = @transform_0, window_bounds = array<i64: 1, 8, 8, 4>}, {transform_indices = @transform_1, window_bounds = array<i64: 1, 8, 8, 4>}, {transform_indices = @transform_2, window_bounds = array<i64: 1, 8, 8, 4>}, {transform_indices = @transform_3, window_bounds = array<i64: 1, 8, 8, 4>}]} {
    %c0 = arith.constant 0 : index
    %c0_0 = arith.constant 0 : index
    %c0_1 = arith.constant 0 : index
    %c0_2 = arith.constant 0 : index
    %0 = vector.load %arg2[%c0, %c0_0, %c0_1, %c0_2] : memref<1x8x8x4xf32, #tpu.memory_space<vmem>>, vector<1x8x8x4xf32>
    %1 = vector.shape_cast %0 : vector<1x8x8x4xf32> to vector<8x8x4xf32>
    %c0_3 = arith.constant 0 : index
    %c0_4 = arith.constant 0 : index
    %c0_5 = arith.constant 0 : index
    %c0_6 = arith.constant 0 : index
    %2 = vector.load %arg3[%c0_3, %c0_4, %c0_5, %c0_6] : memref<1x8x8x4xf32, #tpu.memory_space<vmem>>, vector<1x8x8x4xf32>
    %3 = vector.shape_cast %2 : vector<1x8x8x4xf32> to vector<8x8x4xf32>
    %c0_7 = arith.constant 0 : index
    %c0_8 = arith.constant 0 : index
    %c0_9 = arith.constant 0 : index
    %c0_10 = arith.constant 0 : index
    %4 = vector.load %arg4[%c0_7, %c0_8, %c0_9, %c0_10] : memref<1x8x8x4xf32, #tpu.memory_space<vmem>>, vector<1x8x8x4xf32>
    %5 = vector.shape_cast %4 : vector<1x8x8x4xf32> to vector<8x8x4xf32>
    "tpu.trace_start"() <{level = 10 : i32, message = "hqd,hkd->hqk"}> : () -> ()
    %cst = arith.constant dense<0.000000e+00> : vector<8x8x8xf32>
    %6 = tpu.matmul %1, %3, %cst {dimension_numbers = #tpu.dot_dimension_numbers<[2], [2], [1], [1], [0, 0, 0, 1, 1, 1], [0], [0]>, precision = #tpu.contract_precision<fp32>} : vector<8x8x4xf32>, vector<8x8x4xf32>, vector<8x8x8xf32> -> vector<8x8x8xf32>
    "tpu.trace_stop"() : () -> ()
    %cst_11 = arith.constant dense<0xFF800000> : vector<8x8xf32>
    %7 = vector.multi_reduction <maximumf>, %6, %cst_11 [2] : vector<8x8x8xf32> to vector<8x8xf32>
    %8 = vector.shape_cast %7 : vector<8x8xf32> to vector<8x8x1xf32>
    %9 = vector.broadcast %8 : vector<8x8x1xf32> to vector<8x8x8xf32>
    %10 = arith.subf %6, %9 : vector<8x8x8xf32>
    %11 = math.exp %10 : vector<8x8x8xf32>
    %cst_12 = arith.constant dense<0.000000e+00> : vector<8x8xf32>
    %12 = vector.multi_reduction <add>, %11, %cst_12 [2] : vector<8x8x8xf32> to vector<8x8xf32>
    %13 = vector.shape_cast %12 : vector<8x8xf32> to vector<8x8x1xf32>
    "tpu.trace_start"() <{level = 10 : i32, message = "hqk,hkd->hqd"}> : () -> ()
    %cst_13 = arith.constant dense<0.000000e+00> : vector<8x8x4xf32>
    %14 = tpu.matmul %11, %5, %cst_13 {dimension_numbers = #tpu.dot_dimension_numbers<[2], [1], [1], [2], [0, 0, 0, 1, 1, 2], [0], [0]>, precision = #tpu.contract_precision<fp32>} : vector<8x8x8xf32>, vector<8x8x4xf32>, vector<8x8x4xf32> -> vector<8x8x4xf32>
    "tpu.trace_stop"() : () -> ()
    %15 = tpu.reciprocal %13 {approx = true} : vector<8x8x1xf32> -> vector<8x8x1xf32>
    %16 = vector.broadcast %15 : vector<8x8x1xf32> to vector<8x8x4xf32>
    %17 = arith.mulf %14, %16 : vector<8x8x4xf32>
    %c0_14 = arith.constant 0 : index
    %c0_15 = arith.constant 0 : index
    %c0_16 = arith.constant 0 : index
    %c0_17 = arith.constant 0 : index
    %18 = vector.load %arg5[%c0_14, %c0_15, %c0_16, %c0_17] : memref<1x8x8x4xf32, #tpu.memory_space<vmem>>, vector<1x8x8x4xf32>
    %19 = vector.shape_cast %18 : vector<1x8x8x4xf32> to vector<8x8x4xf32>
    %20 = vector.shape_cast %17 : vector<8x8x4xf32> to vector<1x8x8x4xf32>
    tpu.vector_store %arg5[%c0_14, %c0_15, %c0_16, %c0_17], %20 {strides = array<i32>} : memref<1x8x8x4xf32, #tpu.memory_space<vmem>>, vector<1x8x8x4xf32>,
    return
  }
  func.func @transform_0(%arg0: i32, %arg1: i32) -> (i32, i32, i32, i32) {
    %c0_i32 = arith.constant 0 : i32
    %c0_i32_0 = arith.constant 0 : i32
    %c0_i32_1 = arith.constant 0 : i32
    return %arg0, %c0_i32, %arg1, %c0_i32_0 : i32, i32, i32, i32
  }
  func.func @transform_1(%arg0: i32, %arg1: i32) -> (i32, i32, i32, i32) {
    %c0_i32 = arith.constant 0 : i32
    %c0_i32_0 = arith.constant 0 : i32
    %c0_i32_1 = arith.constant 0 : i32
    %c0_i32_2 = arith.constant 0 : i32
    return %arg0, %c0_i32, %c0_i32_0, %c0_i32_1 : i32, i32, i32, i32
  }
  func.func @transform_2(%arg0: i32, %arg1: i32) -> (i32, i32, i32, i32) {
    %c0_i32 = arith.constant 0 : i32
    %c0_i32_0 = arith.constant 0 : i32
    %c0_i32_1 = arith.constant 0 : i32
    %c0_i32_2 = arith.constant 0 : i32
    return %arg0, %c0_i32, %c0_i32_0, %c0_i32_1 : i32, i32, i32, i32
  }
  func.func @transform_3(%arg0: i32, %arg1: i32) -> (i32, i32, i32, i32) {
    %c0_i32 = arith.constant 0 : i32
    %c0_i32_0 = arith.constant 0 : i32
    %c0_i32_1 = arith.constant 0 : i32
    return %arg0, %c0_i32, %arg1, %c0_i32_0 : i32, i32, i32, i32
  }
}

module attributes {stable_mosaic.version = 11 : i64} {
  func.func @_ln_mlp_residual_kernel(%arg0: i32, %arg1: memref<16x32xf32, #tpu.memory_space<vmem>>, %arg2: memref<1x32xf32, #tpu.memory_space<vmem>>, %arg3: memref<1x32xf32, #tpu.memory_space<vmem>>, %arg4: memref<32x64xf32, #tpu.memory_space<vmem>>, %arg5: memref<1x64xf32, #tpu.memory_space<vmem>>, %arg6: memref<64x32xf32, #tpu.memory_space<vmem>>, %arg7: memref<1x32xf32, #tpu.memory_space<vmem>>, %arg8: memref<16x32xf32, #tpu.memory_space<vmem>>) attributes {dimension_semantics = [#tpu.dimension_semantics<parallel>], iteration_bounds = array<i64: 1>, scalar_prefetch = 0 : i64, scratch_operands = 0 : i64, tpu.core_type = #tpu.core_type<tc>, window_params = [{transform_indices = @transform_0, window_bounds = array<i64: 16, 32>}, {pipeline_mode = #tpu.pipeline_mode<synchronous>, transform_indices = @transform_1, window_bounds = array<i64: 1, 32>}, {pipeline_mode = #tpu.pipeline_mode<synchronous>, transform_indices = @transform_2, window_bounds = array<i64: 1, 32>}, {pipeline_mode = #tpu.pipeline_mode<synchronous>, transform_indices = @transform_3, window_bounds = array<i64: 32, 64>}, {pipeline_mode = #tpu.pipeline_mode<synchronous>, transform_indices = @transform_4, window_bounds = array<i64: 1, 64>}, {pipeline_mode = #tpu.pipeline_mode<synchronous>, transform_indices = @transform_5, window_bounds = array<i64: 64, 32>}, {pipeline_mode = #tpu.pipeline_mode<synchronous>, transform_indices = @transform_6, window_bounds = array<i64: 1, 32>}, {transform_indices = @transform_7, window_bounds = array<i64: 16, 32>}]} {
    %c0 = arith.constant 0 : index
    %c0_0 = arith.constant 0 : index
    %0 = vector.load %arg1[%c0, %c0_0] : memref<16x32xf32, #tpu.memory_space<vmem>>, vector<16x32xf32>
    %cst = arith.constant dense<0.000000e+00> : vector<16xf32>
    %1 = vector.multi_reduction <add>, %0, %cst [1] : vector<16x32xf32> to vector<16xf32>
    %2 = vector.shape_cast %1 : vector<16xf32> to vector<16x1xf32>
    %cst_1 = arith.constant 3.200000e+01 : f32
    %3 = vector.broadcast %cst_1 : f32 to vector<16x1xf32>
    %4 = arith.divf %2, %3 : vector<16x1xf32>
    %5 = vector.broadcast %4 : vector<16x1xf32> to vector<16x32xf32>
    %6 = arith.subf %0, %5 : vector<16x32xf32>
    %7 = arith.mulf %6, %6 : vector<16x32xf32>
    %cst_2 = arith.constant dense<0.000000e+00> : vector<16xf32>
    %8 = vector.multi_reduction <add>, %7, %cst_2 [1] : vector<16x32xf32> to vector<16xf32>
    %9 = vector.shape_cast %8 : vector<16xf32> to vector<16x1xf32>
    %cst_3 = arith.constant 3.200000e+01 : f32
    %10 = vector.broadcast %cst_3 : f32 to vector<16x1xf32>
    %11 = arith.divf %9, %10 : vector<16x1xf32>
    %cst_4 = arith.constant 9.99999974E-6 : f32
    %12 = vector.broadcast %cst_4 : f32 to vector<16x1xf32>
    %13 = arith.addf %11, %12 : vector<16x1xf32>
    %14 = math.rsqrt %13 : vector<16x1xf32>
    %15 = vector.broadcast %14 : vector<16x1xf32> to vector<16x32xf32>
    %16 = arith.mulf %6, %15 : vector<16x32xf32>
    %c0_5 = arith.constant 0 : index
    %c0_6 = arith.constant 0 : index
    %17 = vector.load %arg2[%c0_5, %c0_6] : memref<1x32xf32, #tpu.memory_space<vmem>>, vector<1x32xf32>
    %18 = vector.broadcast %17 : vector<1x32xf32> to vector<16x32xf32>
    %19 = arith.mulf %16, %18 : vector<16x32xf32>
    %c0_7 = arith.constant 0 : index
    %c0_8 = arith.constant 0 : index
    %20 = vector.load %arg3[%c0_7, %c0_8] : memref<1x32xf32, #tpu.memory_space<vmem>>, vector<1x32xf32>
    %21 = vector.broadcast %20 : vector<1x32xf32> to vector<16x32xf32>
    %22 = arith.addf %19, %21 : vector<16x32xf32>
    %c0_9 = arith.constant 0 : index
    %c0_10 = arith.constant 0 : index
    %23 = vector.load %arg4[%c0_9, %c0_10] : memref<32x64xf32, #tpu.memory_space<vmem>>, vector<32x64xf32>
    %cst_11 = arith.constant dense<0.000000e+00> : vector<16x64xf32>
    %24 = tpu.matmul %22, %23, %cst_11 {dimension_numbers = #tpu.dot_dimension_numbers<[1], [0], [0], [1], [0, 0, 1, 1], [], []>, precision = #tpu.contract_precision<fp32>} : vector<16x32xf32>, vector<32x64xf32>, vector<16x64xf32> -> vector<16x64xf32>
    %c0_12 = arith.constant 0 : index
    %c0_13 = arith.constant 0 : index
    %25 = vector.load %arg5[%c0_12, %c0_13] : memref<1x64xf32, #tpu.memory_space<vmem>>, vector<1x64xf32>
    %26 = vector.broadcast %25 : vector<1x64xf32> to vector<16x64xf32>
    %27 = arith.addf %24, %26 : vector<16x64xf32>
    %cst_14 = arith.constant 5.000000e-01 : f32
    %28 = vector.broadcast %cst_14 : f32 to vector<16x64xf32>
    %29 = arith.mulf %28, %27 : vector<16x64xf32>
    %cst_15 = arith.constant 4.471500e-02 : f32
    %30 = vector.broadcast %cst_15 : f32 to vector<16x64xf32>
    %31 = arith.mulf %30, %27 : vector<16x64xf32>
    %32 = arith.mulf %31, %27 : vector<16x64xf32>
    %33 = arith.mulf %32, %27 : vector<16x64xf32>
    %34 = arith.addf %27, %33 : vector<16x64xf32>
    %cst_16 = arith.constant 0.797884583 : f32
    %35 = vector.broadcast %cst_16 : f32 to vector<16x64xf32>
    %36 = arith.mulf %35, %34 : vector<16x64xf32>
    %37 = math.tanh %36 : vector<16x64xf32>
    %cst_17 = arith.constant 1.000000e+00 : f32
    %38 = vector.broadcast %cst_17 : f32 to vector<16x64xf32>
    %39 = arith.addf %38, %37 : vector<16x64xf32>
    %40 = arith.mulf %29, %39 : vector<16x64xf32>
    %c0_18 = arith.constant 0 : index
    %c0_19 = arith.constant 0 : index
    %41 = vector.load %arg6[%c0_18, %c0_19] : memref<64x32xf32, #tpu.memory_space<vmem>>, vector<64x32xf32>
    %cst_20 = arith.constant dense<0.000000e+00> : vector<16x32xf32>
    %42 = tpu.matmul %40, %41, %cst_20 {dimension_numbers = #tpu.dot_dimension_numbers<[1], [0], [0], [1], [0, 0, 1, 1], [], []>, precision = #tpu.contract_precision<fp32>} : vector<16x64xf32>, vector<64x32xf32>, vector<16x32xf32> -> vector<16x32xf32>
    %c0_21 = arith.constant 0 : index
    %c0_22 = arith.constant 0 : index
    %43 = vector.load %arg7[%c0_21, %c0_22] : memref<1x32xf32, #tpu.memory_space<vmem>>, vector<1x32xf32>
    %44 = vector.broadcast %43 : vector<1x32xf32> to vector<16x32xf32>
    %45 = arith.addf %42, %44 : vector<16x32xf32>
    %46 = arith.addf %45, %0 : vector<16x32xf32>
    %c0_23 = arith.constant 0 : index
    %c0_24 = arith.constant 0 : index
    %47 = vector.load %arg8[%c0_23, %c0_24] : memref<16x32xf32, #tpu.memory_space<vmem>>, vector<16x32xf32>
    tpu.vector_store %arg8[%c0_23, %c0_24], %46 {strides = array<i32>} : memref<16x32xf32, #tpu.memory_space<vmem>>, vector<16x32xf32>,
    return
  }
  func.func @transform_0(%arg0: i32) -> (i32, i32) {
    %c0_i32 = arith.constant 0 : i32
    %c0_i32_0 = arith.constant 0 : i32
    return %arg0, %c0_i32 : i32, i32
  }
  func.func @transform_1(%arg0: i32) -> (i32, i32) {
    %c0_i32 = arith.constant 0 : i32
    %c0_i32_0 = arith.constant 0 : i32
    %c0_i32_1 = arith.constant 0 : i32
    return %c0_i32, %c0_i32_0 : i32, i32
  }
  func.func @transform_2(%arg0: i32) -> (i32, i32) {
    %c0_i32 = arith.constant 0 : i32
    %c0_i32_0 = arith.constant 0 : i32
    %c0_i32_1 = arith.constant 0 : i32
    return %c0_i32, %c0_i32_0 : i32, i32
  }
  func.func @transform_3(%arg0: i32) -> (i32, i32) {
    %c0_i32 = arith.constant 0 : i32
    %c0_i32_0 = arith.constant 0 : i32
    %c0_i32_1 = arith.constant 0 : i32
    return %c0_i32, %c0_i32_0 : i32, i32
  }
  func.func @transform_4(%arg0: i32) -> (i32, i32) {
    %c0_i32 = arith.constant 0 : i32
    %c0_i32_0 = arith.constant 0 : i32
    %c0_i32_1 = arith.constant 0 : i32
    return %c0_i32, %c0_i32_0 : i32, i32
  }
  func.func @transform_5(%arg0: i32) -> (i32, i32) {
    %c0_i32 = arith.constant 0 : i32
    %c0_i32_0 = arith.constant 0 : i32
    %c0_i32_1 = arith.constant 0 : i32
    return %c0_i32, %c0_i32_0 : i32, i32
  }
  func.func @transform_6(%arg0: i32) -> (i32, i32) {
    %c0_i32 = arith.constant 0 : i32
    %c0_i32_0 = arith.constant 0 : i32
    %c0_i32_1 = arith.constant 0 : i32
    return %c0_i32, %c0_i32_0 : i32, i32
  }
  func.func @transform_7(%arg0: i32) -> (i32, i32) {
    %c0_i32 = arith.constant 0 : i32
    %c0_i32_0 = arith.constant 0 : i32
    return %arg0, %c0_i32 : i32, i32
  }
}

module attributes {stable_mosaic.version = 11 : i64} {
  func.func @_proj_residual_kernel(%arg0: i32, %arg1: memref<16x32xf32, #tpu.memory_space<vmem>>, %arg2: memref<16x32xf32, #tpu.memory_space<vmem>>, %arg3: memref<32x32xf32, #tpu.memory_space<vmem>>, %arg4: memref<1x32xf32, #tpu.memory_space<vmem>>, %arg5: memref<16x32xf32, #tpu.memory_space<vmem>>) attributes {dimension_semantics = [#tpu.dimension_semantics<parallel>], iteration_bounds = array<i64: 1>, scalar_prefetch = 0 : i64, scratch_operands = 0 : i64, tpu.core_type = #tpu.core_type<tc>, window_params = [{transform_indices = @transform_0, window_bounds = array<i64: 16, 32>}, {transform_indices = @transform_1, window_bounds = array<i64: 16, 32>}, {pipeline_mode = #tpu.pipeline_mode<synchronous>, transform_indices = @transform_2, window_bounds = array<i64: 32, 32>}, {pipeline_mode = #tpu.pipeline_mode<synchronous>, transform_indices = @transform_3, window_bounds = array<i64: 1, 32>}, {transform_indices = @transform_4, window_bounds = array<i64: 16, 32>}]} {
    %c0 = arith.constant 0 : index
    %c0_0 = arith.constant 0 : index
    %0 = vector.load %arg1[%c0, %c0_0] : memref<16x32xf32, #tpu.memory_space<vmem>>, vector<16x32xf32>
    %c0_1 = arith.constant 0 : index
    %c0_2 = arith.constant 0 : index
    %1 = vector.load %arg3[%c0_1, %c0_2] : memref<32x32xf32, #tpu.memory_space<vmem>>, vector<32x32xf32>
    %cst = arith.constant dense<0.000000e+00> : vector<16x32xf32>
    %2 = tpu.matmul %0, %1, %cst {dimension_numbers = #tpu.dot_dimension_numbers<[1], [0], [0], [1], [0, 0, 1, 1], [], []>, precision = #tpu.contract_precision<fp32>} : vector<16x32xf32>, vector<32x32xf32>, vector<16x32xf32> -> vector<16x32xf32>
    %c0_3 = arith.constant 0 : index
    %c0_4 = arith.constant 0 : index
    %3 = vector.load %arg4[%c0_3, %c0_4] : memref<1x32xf32, #tpu.memory_space<vmem>>, vector<1x32xf32>
    %4 = vector.broadcast %3 : vector<1x32xf32> to vector<16x32xf32>
    %5 = arith.addf %2, %4 : vector<16x32xf32>
    %c0_5 = arith.constant 0 : index
    %c0_6 = arith.constant 0 : index
    %6 = vector.load %arg2[%c0_5, %c0_6] : memref<16x32xf32, #tpu.memory_space<vmem>>, vector<16x32xf32>
    %7 = arith.addf %5, %6 : vector<16x32xf32>
    %c0_7 = arith.constant 0 : index
    %c0_8 = arith.constant 0 : index
    %8 = vector.load %arg5[%c0_7, %c0_8] : memref<16x32xf32, #tpu.memory_space<vmem>>, vector<16x32xf32>
    tpu.vector_store %arg5[%c0_7, %c0_8], %7 {strides = array<i32>} : memref<16x32xf32, #tpu.memory_space<vmem>>, vector<16x32xf32>,
    return
  }
  func.func @transform_0(%arg0: i32) -> (i32, i32) {
    %c0_i32 = arith.constant 0 : i32
    %c0_i32_0 = arith.constant 0 : i32
    return %arg0, %c0_i32 : i32, i32
  }
  func.func @transform_1(%arg0: i32) -> (i32, i32) {
    %c0_i32 = arith.constant 0 : i32
    %c0_i32_0 = arith.constant 0 : i32
    return %arg0, %c0_i32 : i32, i32
  }
  func.func @transform_2(%arg0: i32) -> (i32, i32) {
    %c0_i32 = arith.constant 0 : i32
    %c0_i32_0 = arith.constant 0 : i32
    %c0_i32_1 = arith.constant 0 : i32
    return %c0_i32, %c0_i32_0 : i32, i32
  }
  func.func @transform_3(%arg0: i32) -> (i32, i32) {
    %c0_i32 = arith.constant 0 : i32
    %c0_i32_0 = arith.constant 0 : i32
    %c0_i32_1 = arith.constant 0 : i32
    return %c0_i32, %c0_i32_0 : i32, i32
  }
  func.func @transform_4(%arg0: i32) -> (i32, i32) {
    %c0_i32 = arith.constant 0 : i32
    %c0_i32_0 = arith.constant 0 : i32
    return %arg0, %c0_i32 : i32, i32
  }
}

module attributes {stable_mosaic.version = 11 : i64} {
  func.func @_ln_mlp_residual_kernel(%arg0: i32, %arg1: memref<16x32xf32, #tpu.memory_space<vmem>>, %arg2: memref<1x32xf32, #tpu.memory_space<vmem>>, %arg3: memref<1x32xf32, #tpu.memory_space<vmem>>, %arg4: memref<32x64xf32, #tpu.memory_space<vmem>>, %arg5: memref<1x64xf32, #tpu.memory_space<vmem>>, %arg6: memref<64x32xf32, #tpu.memory_space<vmem>>, %arg7: memref<1x32xf32, #tpu.memory_space<vmem>>, %arg8: memref<16x32xf32, #tpu.memory_space<vmem>>) attributes {dimension_semantics = [#tpu.dimension_semantics<parallel>], iteration_bounds = array<i64: 1>, scalar_prefetch = 0 : i64, scratch_operands = 0 : i64, tpu.core_type = #tpu.core_type<tc>, window_params = [{transform_indices = @transform_0, window_bounds = array<i64: 16, 32>}, {pipeline_mode = #tpu.pipeline_mode<synchronous>, transform_indices = @transform_1, window_bounds = array<i64: 1, 32>}, {pipeline_mode = #tpu.pipeline_mode<synchronous>, transform_indices = @transform_2, window_bounds = array<i64: 1, 32>}, {pipeline_mode = #tpu.pipeline_mode<synchronous>, transform_indices = @transform_3, window_bounds = array<i64: 32, 64>}, {pipeline_mode = #tpu.pipeline_mode<synchronous>, transform_indices = @transform_4, window_bounds = array<i64: 1, 64>}, {pipeline_mode = #tpu.pipeline_mode<synchronous>, transform_indices = @transform_5, window_bounds = array<i64: 64, 32>}, {pipeline_mode = #tpu.pipeline_mode<synchronous>, transform_indices = @transform_6, window_bounds = array<i64: 1, 32>}, {transform_indices = @transform_7, window_bounds = array<i64: 16, 32>}]} {
    %c0 = arith.constant 0 : index
    %c0_0 = arith.constant 0 : index
    %0 = vector.load %arg1[%c0, %c0_0] : memref<16x32xf32, #tpu.memory_space<vmem>>, vector<16x32xf32>
    %cst = arith.constant dense<0.000000e+00> : vector<16xf32>
    %1 = vector.multi_reduction <add>, %0, %cst [1] : vector<16x32xf32> to vector<16xf32>
    %2 = vector.shape_cast %1 : vector<16xf32> to vector<16x1xf32>
    %cst_1 = arith.constant 3.200000e+01 : f32
    %3 = vector.broadcast %cst_1 : f32 to vector<16x1xf32>
    %4 = arith.divf %2, %3 : vector<16x1xf32>
    %5 = vector.broadcast %4 : vector<16x1xf32> to vector<16x32xf32>
    %6 = arith.subf %0, %5 : vector<16x32xf32>
    %7 = arith.mulf %6, %6 : vector<16x32xf32>
    %cst_2 = arith.constant dense<0.000000e+00> : vector<16xf32>
    %8 = vector.multi_reduction <add>, %7, %cst_2 [1] : vector<16x32xf32> to vector<16xf32>
    %9 = vector.shape_cast %8 : vector<16xf32> to vector<16x1xf32>
    %cst_3 = arith.constant 3.200000e+01 : f32
    %10 = vector.broadcast %cst_3 : f32 to vector<16x1xf32>
    %11 = arith.divf %9, %10 : vector<16x1xf32>
    %cst_4 = arith.constant 9.99999974E-6 : f32
    %12 = vector.broadcast %cst_4 : f32 to vector<16x1xf32>
    %13 = arith.addf %11, %12 : vector<16x1xf32>
    %14 = math.rsqrt %13 : vector<16x1xf32>
    %15 = vector.broadcast %14 : vector<16x1xf32> to vector<16x32xf32>
    %16 = arith.mulf %6, %15 : vector<16x32xf32>
    %c0_5 = arith.constant 0 : index
    %c0_6 = arith.constant 0 : index
    %17 = vector.load %arg2[%c0_5, %c0_6] : memref<1x32xf32, #tpu.memory_space<vmem>>, vector<1x32xf32>
    %18 = vector.broadcast %17 : vector<1x32xf32> to vector<16x32xf32>
    %19 = arith.mulf %16, %18 : vector<16x32xf32>
    %c0_7 = arith.constant 0 : index
    %c0_8 = arith.constant 0 : index
    %20 = vector.load %arg3[%c0_7, %c0_8] : memref<1x32xf32, #tpu.memory_space<vmem>>, vector<1x32xf32>
    %21 = vector.broadcast %20 : vector<1x32xf32> to vector<16x32xf32>
    %22 = arith.addf %19, %21 : vector<16x32xf32>
    %c0_9 = arith.constant 0 : index
    %c0_10 = arith.constant 0 : index
    %23 = vector.load %arg4[%c0_9, %c0_10] : memref<32x64xf32, #tpu.memory_space<vmem>>, vector<32x64xf32>
    %cst_11 = arith.constant dense<0.000000e+00> : vector<16x64xf32>
    %24 = tpu.matmul %22, %23, %cst_11 {dimension_numbers = #tpu.dot_dimension_numbers<[1], [0], [0], [1], [0, 0, 1, 1], [], []>, precision = #tpu.contract_precision<fp32>} : vector<16x32xf32>, vector<32x64xf32>, vector<16x64xf32> -> vector<16x64xf32>
    %c0_12 = arith.constant 0 : index
    %c0_13 = arith.constant 0 : index
    %25 = vector.load %arg5[%c0_12, %c0_13] : memref<1x64xf32, #tpu.memory_space<vmem>>, vector<1x64xf32>
    %26 = vector.broadcast %25 : vector<1x64xf32> to vector<16x64xf32>
    %27 = arith.addf %24, %26 : vector<16x64xf32>
    %cst_14 = arith.constant 5.000000e-01 : f32
    %28 = vector.broadcast %cst_14 : f32 to vector<16x64xf32>
    %29 = arith.mulf %28, %27 : vector<16x64xf32>
    %cst_15 = arith.constant 4.471500e-02 : f32
    %30 = vector.broadcast %cst_15 : f32 to vector<16x64xf32>
    %31 = arith.mulf %30, %27 : vector<16x64xf32>
    %32 = arith.mulf %31, %27 : vector<16x64xf32>
    %33 = arith.mulf %32, %27 : vector<16x64xf32>
    %34 = arith.addf %27, %33 : vector<16x64xf32>
    %cst_16 = arith.constant 0.797884583 : f32
    %35 = vector.broadcast %cst_16 : f32 to vector<16x64xf32>
    %36 = arith.mulf %35, %34 : vector<16x64xf32>
    %37 = math.tanh %36 : vector<16x64xf32>
    %cst_17 = arith.constant 1.000000e+00 : f32
    %38 = vector.broadcast %cst_17 : f32 to vector<16x64xf32>
    %39 = arith.addf %38, %37 : vector<16x64xf32>
    %40 = arith.mulf %29, %39 : vector<16x64xf32>
    %c0_18 = arith.constant 0 : index
    %c0_19 = arith.constant 0 : index
    %41 = vector.load %arg6[%c0_18, %c0_19] : memref<64x32xf32, #tpu.memory_space<vmem>>, vector<64x32xf32>
    %cst_20 = arith.constant dense<0.000000e+00> : vector<16x32xf32>
    %42 = tpu.matmul %40, %41, %cst_20 {dimension_numbers = #tpu.dot_dimension_numbers<[1], [0], [0], [1], [0, 0, 1, 1], [], []>, precision = #tpu.contract_precision<fp32>} : vector<16x64xf32>, vector<64x32xf32>, vector<16x32xf32> -> vector<16x32xf32>
    %c0_21 = arith.constant 0 : index
    %c0_22 = arith.constant 0 : index
    %43 = vector.load %arg7[%c0_21, %c0_22] : memref<1x32xf32, #tpu.memory_space<vmem>>, vector<1x32xf32>
    %44 = vector.broadcast %43 : vector<1x32xf32> to vector<16x32xf32>
    %45 = arith.addf %42, %44 : vector<16x32xf32>
    %46 = arith.addf %45, %0 : vector<16x32xf32>
    %c0_23 = arith.constant 0 : index
    %c0_24 = arith.constant 0 : index
    %47 = vector.load %arg8[%c0_23, %c0_24] : memref<16x32xf32, #tpu.memory_space<vmem>>, vector<16x32xf32>
    tpu.vector_store %arg8[%c0_23, %c0_24], %46 {strides = array<i32>} : memref<16x32xf32, #tpu.memory_space<vmem>>, vector<16x32xf32>,
    return
  }
  func.func @transform_0(%arg0: i32) -> (i32, i32) {
    %c0_i32 = arith.constant 0 : i32
    %c0_i32_0 = arith.constant 0 : i32
    return %arg0, %c0_i32 : i32, i32
  }
  func.func @transform_1(%arg0: i32) -> (i32, i32) {
    %c0_i32 = arith.constant 0 : i32
    %c0_i32_0 = arith.constant 0 : i32
    %c0_i32_1 = arith.constant 0 : i32
    return %c0_i32, %c0_i32_0 : i32, i32
  }
  func.func @transform_2(%arg0: i32) -> (i32, i32) {
    %c0_i32 = arith.constant 0 : i32
    %c0_i32_0 = arith.constant 0 : i32
    %c0_i32_1 = arith.constant 0 : i32
    return %c0_i32, %c0_i32_0 : i32, i32
  }
  func.func @transform_3(%arg0: i32) -> (i32, i32) {
    %c0_i32 = arith.constant 0 : i32
    %c0_i32_0 = arith.constant 0 : i32
    %c0_i32_1 = arith.constant 0 : i32
    return %c0_i32, %c0_i32_0 : i32, i32
  }
  func.func @transform_4(%arg0: i32) -> (i32, i32) {
    %c0_i32 = arith.constant 0 : i32
    %c0_i32_0 = arith.constant 0 : i32
    %c0_i32_1 = arith.constant 0 : i32
    return %c0_i32, %c0_i32_0 : i32, i32
  }
  func.func @transform_5(%arg0: i32) -> (i32, i32) {
    %c0_i32 = arith.constant 0 : i32
    %c0_i32_0 = arith.constant 0 : i32
    %c0_i32_1 = arith.constant 0 : i32
    return %c0_i32, %c0_i32_0 : i32, i32
  }
  func.func @transform_6(%arg0: i32) -> (i32, i32) {
    %c0_i32 = arith.constant 0 : i32
    %c0_i32_0 = arith.constant 0 : i32
    %c0_i32_1 = arith.constant 0 : i32
    return %c0_i32, %c0_i32_0 : i32, i32
  }
  func.func @transform_7(%arg0: i32) -> (i32, i32) {
    %c0_i32 = arith.constant 0 : i32
    %c0_i32_0 = arith.constant 0 : i32
    return %arg0, %c0_i32 : i32, i32
  }
}

</mosaic_0001>

<bundles_post_ra>
// kernel: transformer_pallas.8
= control target key start
LH: loop header
LB: loop body
LE: loop exit
PB: predicated region body
PF: predicated region fallthrough
CT: control target
= control target key end

     0   :  { %vm19_vm0 = vcmask 261120   ;;  %vm603_vm1 = vcmask 785408   ;;  %s863_s0 = inlined_call_operand.vmem [shape: f32[16,32], index: 0, kind: input, shape index: {}]   ;;  %s864_s3 = inlined_call_operand.vmem [shape: f32[32,96], index: 3, kind: input, shape index: {}]   ;;  %s865_s1 = inlined_call_operand.vmem [shape: f32[1,32], index: 1, kind: input, shape index: {}]   ;;  %s866_s2 = inlined_call_operand.vmem [shape: f32[1,32], index: 2, kind: input, shape index: {}]   ;;  %s867_s4 = inlined_call_operand.vmem [shape: f32[16,96], index: 4, kind: output, shape index: {}]  }
   0x1   :  { %v17_v0 = vld [vmem:[%s863_s0] sm:$0xff]  ;;  %v18_v1 = vld [vmem:[%s863_s0 + $0x8] sm:$0xff]  ;;  %v67_v16 = vld [vmem:[%s864_s3 + $0x10] sm:$0xff] }
   0x2   :  { %v20_v2 = vsel %vm19_vm0, %v17_v0, 0.0  ;;  %v23_v3 = vsel %vm19_vm0, %v18_v1, 0.0  ;;  %v65_v14 = vld [vmem:[%s864_s3] sm:$0xff]  ;;  %v66_v15 = vld [vmem:[%s864_s3 + $0x8] sm:$0xff]  ;;  %v68_v19 = vld [vmem:[%s864_s3 + $0x18] sm:$0xff]  ;;  %v82_v20 = vand.u32 4294901760, %v67_v16 }
   0x3   :  { %21 = vadd.xlane.f32.xlu0 %v20_v2  ;;  %v76_v17 = vand.u32 4294901760, %v65_v14  ;;  %v79_v18 = vand.u32 4294901760, %v66_v15  ;;  %v85_v21 = vand.u32 4294901760, %v68_v19  ;;  %v610_v53 = vld [vmem:[%s865_s1] ss:$0 sm:$0xff] }
   0x4   :  { %v180_v31 = vsub.f32 %v67_v16, %v82_v20  ;;  %v611_v55 = vld [vmem:[%s866_s2] ss:$0 sm:$0xff] }
   0x5   :  { %v831_v22 = vpack.c.bf16 %v79_v18, %v76_v17  ;;  %v833_v23 = vpack.c.bf16 %v85_v21, %v82_v20  ;;  %v166_v24 = vsub.f32 %v65_v14, %v76_v17  ;;  %v173_v25 = vsub.f32 %v66_v15, %v79_v18 }
   0x6   :  { %v187_v32 = vsub.f32 %v68_v19, %v85_v21  ;;  %v181_v35 = vand.u32 4294901760, %v180_v31 }
   0x7   :  { %24 = vadd.xlane.f32.xlu0 %v23_v3  ;;  %739 = vmatprep.subr.bf16.mxu0 %v831_v22  ;;  %v167_v26 = vand.u32 4294901760, %v166_v24  ;;  %v174_v27 = vand.u32 4294901760, %v173_v25  ;;  %v730_v44 = vpack.c.bf16 %v173_v25, %v166_v24 }
   0x8   :  { %715 = vmatprep.subr.bf16.mxu1 %v831_v22  ;;  %741 = vmatpush3.bf16.msra.mxu0 %v831_v22  ;;  %v188_v36 = vand.u32 4294901760, %v187_v32  ;;  %v182_v39 = vsub.f32 %v180_v31, %v181_v35  ;;  %v734_v45 = vpack.c.bf16 %v187_v32, %v180_v31 }
   0x9   :  { %717 = vmatpush3.bf16.msra.mxu1 %v831_v22  ;;  %743 = vmatprep.subr.bf16.mxu0 %v833_v23  ;;  %v746_v28 = vpack.c.bf16 %v174_v27, %v167_v26  ;;  %v168_v29 = vsub.f32 %v166_v24, %v167_v26  ;;  %v175_v30 = vsub.f32 %v173_v25, %v174_v27 }
   0xa   :  { %719 = vmatprep.subr.bf16.mxu1 %v833_v23  ;;  %v750_v38 = vpack.c.bf16 %v188_v36, %v181_v35  ;;  %v189_v40 = vsub.f32 %v187_v32, %v188_v36  ;;  %v183_v41 = vand.u32 4294901760, %v182_v39 }
   0xb   :  { %v169_v33 = vand.u32 4294901760, %v168_v29  ;;  %v176_v34 = vand.u32 4294901760, %v175_v30 }
   0xc   :  { %745 = vmatpush3.bf16.msra.mxu0 %v833_v23  ;;  %v190_v42 = vand.u32 4294901760, %v189_v40 }
   0xd   :  { %721 = vmatpush3.bf16.msra.mxu1 %v833_v23  ;;  %747 = vmatprep.subr.bf16.mxu0 %v746_v28  ;;  %v722_v37 = vpack.c.bf16 %v176_v34, %v169_v33 }
   0xe   :  { %v726_v43 = vpack.c.bf16 %v190_v42, %v183_v41 }
   0xf   :  { %723 = vmatprep.subr.bf16.mxu1 %v722_v37 }
  0x90   :  { %v22_v4 = vpop.xlane.xlu0 %21 }
  0x91   :  { %v27_v5 = vmul.f32 0.03125, %v22_v4 }
  0x93   :  { %v809_v6 = vsub.f32 %v17_v0, %v27_v5 }
  0x94   :  { %v25_v7 = vpop.xlane.xlu0 %24 }
  0x95   :  { %v28_v8 = vmul.f32 0.03125, %v25_v7  ;;  %v31_v9 = vmul.f32 %v809_v6, %v809_v6 }
  0x97   :  { %v813_v10 = vsub.f32 %v18_v1, %v28_v8  ;;  %v33_v11 = vsel %vm19_vm0, %v31_v9, 0.0 }
  0x98   :  { %34 = vadd.xlane.f32.xlu1 %v33_v11 }
  0x99   :  { %v32_v12 = vmul.f32 %v813_v10, %v813_v10 }
  0x9b   :  { %v36_v13 = vsel %vm19_vm0, %v32_v12, 0.0 }
  0x9c   :  { %37 = vadd.xlane.f32.xlu1 %v36_v13 }
 0x125   :  { %v35_v46 = vpop.xlane.xlu1 %34 }
 0x126   :  { %v39_v47 = vmul.f32 0.03125, %v35_v46 }
 0x128   :  { %v41_v48 = vadd.f32 1e-05, %v39_v47 }
 0x129   :  { %v38_v49 = vpop.xlane.xlu1 %37 }
 0x12a   :  { %772 = vrsqrt.f32 %v41_v48  ;;  %v40_v50 = vmul.f32 0.03125, %v38_v49 }
 0x12c   :  { %v42_v51 = vadd.f32 1e-05, %v40_v50 }
 0x12e   :  { %774 = vrsqrt.f32 %v42_v51 }
 0x134   :  { %v773_v52 = vpop.eup %772 }
 0x135   :  { %v45_v54 = vmul.f32 %v773_v52, %v809_v6 }
 0x137   :  { %v54_v56 = vmul.f32 %v610_v53, %v45_v54 }
 0x138   :  { %v775_v57 = vpop.eup %774 }
 0x139   :  { %v46_v58 = vmul.f32 %v775_v57, %v813_v10  ;;  %v63_v59 = vadd.f32 %v611_v55, %v54_v56 }
 0x13b   :  { %v55_v60 = vmul.f32 %v610_v53, %v46_v58  ;;  %v70_v61 = vsel %vm19_vm0, %v63_v59, 0 }
 0x13c   :  { %v144_v62 = vand.u32 4294901760, %v70_v61 }
 0x13d   :  { %v64_v63 = vadd.f32 %v611_v55, %v55_v60 }
 0x13e   :  { %v145_v0 = vsub.f32 %v70_v61, %v144_v62 }
 0x13f   :  { %v73_v1 = vsel %vm19_vm0, %v64_v63, 0 }
 0x140   :  { %v146_v2 = vand.u32 4294901760, %v145_v0  ;;  %v154_v3 = vand.u32 4294901760, %v73_v1 }
 0x142   :  { %689 = vmatprep.mubr.f32.mxu0 %v146_v2  ;;  %v147_v4 = vsub.f32 %v145_v0, %v146_v2  ;;  %v155_v5 = vsub.f32 %v73_v1, %v154_v3 }
 0x144   :  { %v148_v6 = vand.u32 4294901760, %v147_v4  ;;  %v156_v7 = vand.u32 4294901760, %v155_v5 }
 0x146   :  { %656 = vmatprep.mubr.f32.mxu1 %v148_v6  ;;  %690 = vmatmul.mubr.f32.vlgmr.msra.gmra.mrb[0].mxu0 %v156_v7  ;;  %v157_v8 = vsub.f32 %v155_v5, %v156_v7 }
 0x147   :  { %749 = vmatpush3.bf16.msra.mxu0 %v746_v28  ;;  %700 = vmatprep.mubr.f32.mxu0 %v144_v62 }
 0x148   :  { %v158_v9 = vand.u32 4294901760, %v157_v8  ;;  %751 = vmatprep.subr.bf16.mxu0 %v750_v38 }
 0x14a   :  { %657 = vmatmul.mubr.f32.vlgmr.msra.gmra.mrb[0].mxu1 %v158_v9 }
 0x14b   :  { %725 = vmatpush3.bf16.msra.mxu1 %v722_v37  ;;  %667 = vmatprep.mubr.f32.mxu1 %v144_v62 }
 0x14c   :  { %753 = vmatpush3.bf16.msra.mxu0 %v750_v38  ;;  %727 = vmatprep.subr.bf16.mxu1 %v726_v43 }
 0x14d   :  { %755 = vmatprep.subr.bf16.mxu0 %v831_v22 }
 0x14f   :  { %729 = vmatpush3.bf16.msra.mxu1 %v726_v43  ;;  %701 = vmatmul.mubr.f32.vlgmr.msra.gmra.mrb[0].mxu0 %v154_v3 }
 0x150   :  { %757 = vmatpush3.bf16.msra.mxu0 %v831_v22  ;;  %711 = vmatprep.mubr.f32.mxu0 %v144_v62 }
 0x151   :  { %731 = vmatprep.subr.bf16.mxu1 %v730_v44  ;;  %759 = vmatprep.subr.bf16.mxu0 %v833_v23 }
 0x152   :  { %668 = vmatmul.mubr.f32.vlgmr.msra.gmra.mrb[0].mxu1 %v154_v3 }
 0x153   :  { %733 = vmatpush3.bf16.msra.mxu1 %v730_v44  ;;  %678 = vmatprep.mubr.f32.mxu1 %v145_v0 }
 0x154   :  { %761 = vmatpush3.bf16.msra.mxu0 %v833_v23  ;;  %735 = vmatprep.subr.bf16.mxu1 %v734_v45 }
 0x157   :  { %737 = vmatpush3.bf16.msra.mxu1 %v734_v45  ;;  %712 = vmatmul.mubr.f32.vlgmr.msra.gmra.mrb[0].mxu0 %v154_v3 }
 0x15a   :  { %679 = vmatmul.mubr.f32.vlgmr.msra.gmra.mrb[0].mxu1 %v155_v5 }
 0x22a   :  { %v713_v10 = vpop.f32.mrb[0].mxu0 }
 0x22b   :  { %v593_v11 = vpop.f32.mrb[1].mxu0 }
 0x22d   :  { %v680_v12 = vpop.f32.mrb[0].mxu1 }
 0x22e   :  { %v762_v13 = vadd.f32 %v713_v10, %v680_v12  ;;  %v337_v14 = vpop.f32.mrb[1].mxu1 }
 0x22f   :  { %v763_v15 = vadd.f32 %v593_v11, %v337_v14 }
 0x230   :  { %605 = vst.msk [vmem:[%s867_s4 + $0x8] sm:$0xff] %vm603_vm1, %v762_v13 }
 0x231   :  { %604 = vst.msk [vmem:[%s867_s4] sm:$0xff] %vm603_vm1, %v763_v15 }

// kernel: transformer_pallas.15
= control target key start
LH: loop header
LB: loop body
LE: loop exit
PB: predicated region body
PF: predicated region fallthrough
CT: control target
= control target key end

     0   :  { %vm29_vm0 = vcmask 261120   ;;  %s1962_s0 = inlined_call_operand.vmem [shape: f32[16,32], index: 0, kind: input, shape index: {}]   ;;  %s1963_s1 = inlined_call_operand.vmem [shape: f32[1,32], index: 1, kind: input, shape index: {}]   ;;  %s1964_s2 = inlined_call_operand.vmem [shape: f32[1,32], index: 2, kind: input, shape index: {}]   ;;  %s1965_s3 = inlined_call_operand.vmem [shape: f32[32,64], index: 3, kind: input, shape index: {}]   ;;  %s1966_s4 = inlined_call_operand.vmem [shape: f32[1,64], index: 4, kind: input, shape index: {}]   ;;  %s1967_s5 = inlined_call_operand.vmem [shape: f32[64,32], index: 5, kind: input, shape index: {}]   ;;  %s1968_s6 = inlined_call_operand.vmem [shape: f32[1,32], index: 6, kind: input, shape index: {}]   ;;  %s1969_s7 = inlined_call_operand.hbm [shape: f32[16,32], index: 7, kind: output, shape index: {}]  }
   0x1   :  { %v1789_v0 = vld [vmem:[%s1962_s0] sm:$0xff]  ;;  %v1794_v1 = vld [vmem:[%s1962_s0 + $0x8] sm:$0xff] }
   0x2   :  { %12 = vsyncpa [#allocation3], 0  ;;  %v30_v2 = vsel %vm29_vm0, %v1789_v0, 0.0  ;;  %v33_v3 = vsel %vm29_vm0, %v1794_v1, 0.0  ;;  %v75_v14 = vld [vmem:[%s1965_s3] sm:$0xff]  ;;  %v76_v15 = vld [vmem:[%s1965_s3 + $0x8] sm:$0xff] }
   0x3   :  { %31 = vadd.xlane.f32.xlu0 %v30_v2  ;;  %v77_v16 = vld [vmem:[%s1965_s3 + $0x10] sm:$0xff]  ;;  %v93_v17 = vand.u32 4294901760, %v75_v14  ;;  %v96_v18 = vand.u32 4294901760, %v76_v15  ;;  %v78_v19 = vld [vmem:[%s1965_s3 + $0x18] sm:$0xff]  ;;  %v1260_v53 = vld [vmem:[%s1963_s1] ss:$0 sm:$0xff] }
   0x4   :  { %v99_v20 = vand.u32 4294901760, %v77_v16  ;;  %v102_v21 = vand.u32 4294901760, %v78_v19  ;;  %v1261_v55 = vld [vmem:[%s1964_s2] ss:$0 sm:$0xff]  ;;  %vm653_vm1 = vcmask 523264   ;;  %s1743_s30 = smov [#allocation2]  }
   0x5   :  { %v1816_v22 = vpack.c.bf16 %v96_v18, %v93_v17  ;;  %v183_v24 = vsub.f32 %v75_v14, %v93_v17  ;;  %v190_v25 = vsub.f32 %v76_v15, %v96_v18  ;;  %v640_v18 = vld [vmem:[%s1967_s5 + $0x10] sm:$0xff]  ;;  %s1249_s8 = sshll.u32 %s1743_s30, 4  ;;  %s1250_s8 = int_to_ptr.vmem [resolvable:$true] %s1249_s8 }
   0x6   :  { %v1818_v23 = vpack.c.bf16 %v102_v21, %v99_v20  ;;  %v197_v30 = vsub.f32 %v77_v16, %v99_v20  ;;  %v204_v31 = vsub.f32 %v78_v19, %v102_v21  ;;  %v641_v19 = vld [vmem:[%s1967_s5 + $0x18] sm:$0xff]  ;;  %s1719_s9 = scalar_lea.vmem %s1250_s8, 256  ;;  %p1724_p1 = scmp.lt.s32.totalorder %s1250_s8, %s1250_s8 }
   0x7   :  { %34 = vadd.xlane.f32.xlu0 %v33_v3  ;;  %1541 = vmatprep.subr.bf16.mxu0 %v1816_v22  ;;  %v184_v26 = vand.u32 4294901760, %v183_v24  ;;  %v191_v27 = vand.u32 4294901760, %v190_v25  ;;  %v1556_v42 = vpack.c.bf16 %v190_v25, %v183_v24  ;;  %p1720_p0 = scmp.ne.s32.totalorder %s1250_s8, %s1719_s9  ;;  %p1725_p2 = scmp.lt.s32.totalorder %s1719_s9, %s1719_s9 }
   0x8   :  { %1543 = vmatpush3.bf16.msra.mxu0 %v1816_v22  ;;  %v198_v34 = vand.u32 4294901760, %v197_v30  ;;  %v205_v35 = vand.u32 4294901760, %v204_v31  ;;  %v1560_v43 = vpack.c.bf16 %v204_v31, %v197_v30 }
   0x9   :  { %1545 = vmatprep.subr.bf16.mxu0 %v1818_v23  ;;  %v185_v28 = vsub.f32 %v183_v24, %v184_v26  ;;  %v192_v29 = vsub.f32 %v190_v25, %v191_v27  ;;  %v1572_v44 = vpack.c.bf16 %v191_v27, %v184_v26  ;;  %p1726_p3 = por %p1725_p2, %p1724_p1 }
   0xa   :  { %v199_v37 = vsub.f32 %v197_v30, %v198_v34  ;;  %v206_v38 = vsub.f32 %v204_v31, %v205_v35  ;;  %v1576_v45 = vpack.c.bf16 %v205_v35, %v198_v34 }
   0xb   :  { %v186_v32 = vand.u32 4294901760, %v185_v28  ;;  %v193_v33 = vand.u32 4294901760, %v192_v29  ;;  %v642_v28 = vld [vmem:[%s1967_s5 + $0x20] sm:$0xff]  ;;  %v643_v29 = vld [vmem:[%s1967_s5 + $0x28] sm:$0xff]  ;;  %p1727_p4 = pnand %p1726_p3, %p1720_p0 }
   0xc   :  { %1547 = vmatpush3.bf16.msra.mxu0 %v1818_v23  ;;  %v200_v39 = vand.u32 4294901760, %v199_v37  ;;  %v207_v40 = vand.u32 4294901760, %v206_v38  ;;  %v673_v34 = vand.u32 4294901760, %v642_v28  ;;  %v676_v35 = vand.u32 4294901760, %v643_v29 }
   0xd   :  { %v1548_v36 = vpack.c.bf16 %v193_v33, %v186_v32 }
   0xe   :  { %v1552_v41 = vpack.c.bf16 %v207_v40, %v200_v39  ;;  %v644_v40 = vld [vmem:[%s1967_s5 + $0x30] sm:$0xff] }
   0xf   :  { %1549 = vmatprep.subr.bf16.mxu0 %v1548_v36 }
  0x90   :  { %v32_v4 = vpop.xlane.xlu0 %31 }
  0x91   :  { %v37_v5 = vmul.f32 0.03125, %v32_v4 }
  0x93   :  { %v39_v6 = vsub.f32 %v1789_v0, %v37_v5 }
  0x94   :  { %v35_v7 = vpop.xlane.xlu0 %34 }
  0x95   :  { %v38_v8 = vmul.f32 0.03125, %v35_v7  ;;  %v41_v9 = vmul.f32 %v39_v6, %v39_v6 }
  0x97   :  { %v40_v10 = vsub.f32 %v1794_v1, %v38_v8  ;;  %v43_v11 = vsel %vm29_vm0, %v41_v9, 0.0 }
  0x98   :  { %44 = vadd.xlane.f32.xlu1 %v43_v11 }
  0x99   :  { %v42_v12 = vmul.f32 %v40_v10, %v40_v10 }
  0x9b   :  { %v46_v13 = vsel %vm29_vm0, %v42_v12, 0.0 }
  0x9c   :  { %47 = vadd.xlane.f32.xlu1 %v46_v13  ;;  %v639_v13 = vld [vmem:[%s1967_s5 + $0x8] sm:$0xff] }
  0x9d   :  { %v664_v15 = vand.u32 4294901760, %v639_v13 }
  0x9f   :  { %v1848_v17 = vsub.f32 %v639_v13, %v664_v15 }
  0xa1   :  { %v763_v21 = vand.u32 4294901760, %v1848_v17 }
  0xa3   :  { %v764_v25 = vsub.f32 %v1848_v17, %v763_v21 }
  0xa5   :  { %v765_v31 = vand.u32 4294901760, %v764_v25 }
 0x125   :  { %v45_v46 = vpop.xlane.xlu1 %44 }
 0x126   :  { %v49_v47 = vmul.f32 0.03125, %v45_v46  ;;  %v679_v46 = vand.u32 4294901760, %v644_v40 }
 0x128   :  { %v51_v48 = vadd.f32 1e-05, %v49_v47 }
 0x129   :  { %v48_v49 = vpop.xlane.xlu1 %47 }
 0x12a   :  { %1711 = vrsqrt.f32 %v51_v48  ;;  %v50_v50 = vmul.f32 0.03125, %v48_v49 }
 0x12c   :  { %v52_v51 = vadd.f32 1e-05, %v50_v50 }
 0x12e   :  { %1713 = vrsqrt.f32 %v52_v51  ;;  %v1890_v51 = vpack.c.bf16 %v676_v35, %v673_v34 }
 0x134   :  { %v1712_v52 = vpop.eup %1711 }
 0x135   :  { %v55_v54 = vmul.f32 %v1712_v52, %v39_v6  ;;  %v797_v52 = vsub.f32 %v644_v40, %v679_v46 }
 0x137   :  { %v64_v56 = vmul.f32 %v1260_v53, %v55_v54 }
 0x138   :  { %v1714_v57 = vpop.eup %1713 }
 0x139   :  { %v56_v58 = vmul.f32 %v1714_v57, %v40_v10  ;;  %v73_v59 = vadd.f32 %v1261_v55, %v64_v56  ;;  %v638_v10 = vld [vmem:[%s1967_s5] sm:$0xff]  ;;  %v798_v57 = vand.u32 4294901760, %v797_v52 }
 0x13a   :  { %v661_v14 = vand.u32 4294901760, %v638_v10 }
 0x13b   :  { %v65_v60 = vmul.f32 %v1260_v53, %v56_v58  ;;  %v87_v61 = vsel %vm29_vm0, %v73_v59, 0 }
 0x13c   :  { %v161_v62 = vand.u32 4294901760, %v87_v61  ;;  %v1846_v16 = vsub.f32 %v638_v10, %v661_v14 }
 0x13d   :  { %v74_v63 = vadd.f32 %v1261_v55, %v65_v60 }
 0x13e   :  { %v162_v2 = vsub.f32 %v87_v61, %v161_v62  ;;  %v756_v20 = vand.u32 4294901760, %v1846_v16 }
 0x13f   :  { %v90_v3 = vsel %vm29_vm0, %v74_v63, 0 }
 0x140   :  { %v163_v4 = vand.u32 4294901760, %v162_v2  ;;  %v171_v5 = vand.u32 4294901760, %v90_v3  ;;  %v757_v24 = vsub.f32 %v1846_v16, %v756_v20 }
 0x142   :  { %v164_v7 = vsub.f32 %v162_v2, %v163_v4  ;;  %v172_v6 = vsub.f32 %v90_v3, %v171_v5  ;;  %v758_v30 = vand.u32 4294901760, %v757_v24 }
 0x144   :  { %v165_v8 = vand.u32 4294901760, %v164_v7  ;;  %v173_v9 = vand.u32 4294901760, %v172_v6  ;;  %v1604_v37 = vpack.c.bf16 %v765_v31, %v758_v30  ;;  %v1620_v7 = vpack.c.bf16 %v1848_v17, %v1846_v16 }
 0x146   :  { %1368 = vmatprep.mubr.f32.mxu0 %v165_v8  ;;  %v174_v11 = vsub.f32 %v172_v6, %v173_v9  ;;  %1605 = vmatprep.subr.bf16.mxu1 %v1604_v37 }
 0x147   :  { %1607 = vmatpush3.bf16.msra.mxu1 %v1604_v37 }
 0x148   :  { %v175_v12 = vand.u32 4294901760, %v174_v11  ;;  %v1908_v11 = vpack.c.bf16 %v763_v21, %v756_v20 }
 0x14a   :  { %1369 = vmatmul.mubr.f32.vlgmr.msra.gmra.mrb[0].mxu0 %v175_v12 }
 0x14b   :  { %1551 = vmatpush3.bf16.msra.mxu0 %v1548_v36  ;;  %1379 = vmatprep.mubr.f32.mxu0 %v161_v62  ;;  %v1876_v36 = vpack.c.bf16 %v664_v15, %v661_v14  ;;  %v1262_v14 = vld [vmem:[%s1966_s4] ss:$0 sm:$0xff] }
 0x14c   :  { %1553 = vmatprep.subr.bf16.mxu0 %v1552_v41 }
 0x14f   :  { %1555 = vmatpush3.bf16.msra.mxu0 %v1552_v41  ;;  %v645_v41 = vld [vmem:[%s1967_s5 + $0x38] sm:$0xff] }
 0x150   :  { %1557 = vmatprep.subr.bf16.mxu0 %v1556_v42  ;;  %v682_v47 = vand.u32 4294901760, %v645_v41 }
 0x152   :  { %1380 = vmatmul.mubr.f32.vlgmr.msra.gmra.mrb[0].mxu0 %v171_v5  ;;  %v804_v53 = vsub.f32 %v645_v41, %v682_v47  ;;  %v1894_v61 = vpack.c.bf16 %v682_v47, %v679_v46 }
 0x153   :  { %1559 = vmatpush3.bf16.msra.mxu0 %v1556_v42  ;;  %1390 = vmatprep.mubr.f32.mxu0 %v162_v2 }
 0x154   :  { %1561 = vmatprep.subr.bf16.mxu0 %v1560_v43  ;;  %v805_v58 = vand.u32 4294901760, %v804_v53 }
 0x156   :  { %v806_v63 = vsub.f32 %v804_v53, %v805_v58  ;;  %v1914_v13 = vpack.c.bf16 %v805_v58, %v798_v57 }
 0x157   :  { %1563 = vmatpush3.bf16.msra.mxu0 %v1560_v43  ;;  %v783_v43 = vsub.f32 %v642_v28, %v673_v34 }
 0x158   :  { %1565 = vmatprep.subr.bf16.mxu0 %v1816_v22 }
 0x159   :  { %v784_v49 = vand.u32 4294901760, %v783_v43 }
 0x15a   :  { %1391 = vmatmul.mubr.f32.vlgmr.msra.gmra.mrb[0].mxu0 %v172_v6 }
 0x15b   :  { %1567 = vmatpush3.bf16.msra.mxu0 %v1816_v22  ;;  %1401 = vmatprep.mubr.f32.mxu0 %v163_v4  ;;  %v785_v55 = vsub.f32 %v783_v43, %v784_v49  ;;  %v807_v4 = vand.u32 4294901760, %v806_v63 }
 0x15c   :  { %1569 = vmatprep.subr.bf16.mxu0 %v1818_v23 }
 0x15d   :  { %v786_v59 = vand.u32 4294901760, %v785_v55 }
 0x15f   :  { %1571 = vmatpush3.bf16.msra.mxu0 %v1818_v23 }
 0x160   :  { %1573 = vmatprep.subr.bf16.mxu0 %v1572_v44 }
 0x162   :  { %1402 = vmatmul.mubr.f32.vlgmr.msra.gmra.mrb[0].mxu0 %v173_v9  ;;  %v1632_v9 = vpack.c.bf16 %v804_v53, %v797_v52 }
 0x163   :  { %1575 = vmatpush3.bf16.msra.mxu0 %v1572_v44  ;;  %1412 = vmatprep.mubr.f32.mxu0 %v161_v62  ;;  %v790_v44 = vsub.f32 %v643_v29, %v676_v35 }
 0x164   :  { %1577 = vmatprep.subr.bf16.mxu0 %v1576_v45 }
 0x165   :  { %v791_v50 = vand.u32 4294901760, %v790_v44  ;;  %v1628_v8 = vpack.c.bf16 %v790_v44, %v783_v43 }
 0x167   :  { %1579 = vmatpush3.bf16.msra.mxu0 %v1576_v45  ;;  %v792_v56 = vsub.f32 %v790_v44, %v791_v50  ;;  %v1912_v10 = vpack.c.bf16 %v791_v50, %v784_v49 }
 0x168   :  { %1581 = vmatprep.subr.bf16.mxu0 %v1816_v22 }
 0x169   :  { %v793_v60 = vand.u32 4294901760, %v792_v56 }
 0x16a   :  { %1413 = vmatmul.mubr.f32.vlgmr.msra.gmra.mrb[0].mxu0 %v171_v5 }
 0x16b   :  { %1583 = vmatpush3.bf16.msra.mxu0 %v1816_v22  ;;  %1423 = vmatprep.mubr.f32.mxu0 %v161_v62  ;;  %v667_v22 = vand.u32 4294901760, %v640_v18  ;;  %v799_v62 = vsub.f32 %v797_v52, %v798_v57  ;;  %v1612_v2 = vpack.c.bf16 %v793_v60, %v786_v59 }
 0x16c   :  { %1585 = vmatprep.subr.bf16.mxu0 %v1818_v23 }
 0x16d   :  { %v1864_v26 = vsub.f32 %v640_v18, %v667_v22  ;;  %v800_v3 = vand.u32 4294901760, %v799_v62 }
 0x16f   :  { %1587 = vmatpush3.bf16.msra.mxu0 %v1818_v23  ;;  %v670_v23 = vand.u32 4294901760, %v641_v19  ;;  %v770_v32 = vand.u32 4294901760, %v1864_v26 }
 0x170   :  { %1589 = vmatprep.subr.bf16.mxu0 %v1876_v36 }
 0x171   :  { %v1866_v27 = vsub.f32 %v641_v19, %v670_v23  ;;  %v1878_v38 = vpack.c.bf16 %v670_v23, %v667_v22  ;;  %v771_v39 = vsub.f32 %v1864_v26, %v770_v32 }
 0x172   :  { %1424 = vmatmul.mubr.f32.vlgmr.msra.gmra.mrb[0].mxu0 %v171_v5  ;;  %v1616_v5 = vpack.c.bf16 %v807_v4, %v800_v3 }
 0x173   :  { %v777_v33 = vand.u32 4294901760, %v1866_v27  ;;  %v772_v45 = vand.u32 4294901760, %v771_v39  ;;  %1591 = vmatpush3.bf16.msra.mxu0 %v1876_v36  ;;  %v1624_v6 = vpack.c.bf16 %v1866_v27, %v1864_v26 }
 0x174   :  { %1593 = vmatprep.subr.bf16.mxu0 %v1878_v38 }
 0x175   :  { %v778_v42 = vsub.f32 %v1866_v27, %v777_v33  ;;  %v1910_v12 = vpack.c.bf16 %v777_v33, %v770_v32 }
 0x177   :  { %v779_v48 = vand.u32 4294901760, %v778_v42  ;;  %1595 = vmatpush3.bf16.msra.mxu0 %v1878_v38 }
 0x178   :  { %1597 = vmatprep.subr.bf16.mxu0 %v1890_v51 }
 0x179   :  { %v1608_v54 = vpack.c.bf16 %v779_v48, %v772_v45 }
 0x17b   :  { %1609 = vmatprep.subr.bf16.mxu1 %v1608_v54  ;;  %1599 = vmatpush3.bf16.msra.mxu0 %v1890_v51 }
 0x17c   :  { %1611 = vmatpush3.bf16.msra.mxu1 %v1608_v54  ;;  %1601 = vmatprep.subr.bf16.mxu0 %v1894_v61 }
 0x17d   :  { %1613 = vmatprep.subr.bf16.mxu1 %v1612_v2 }
 0x17f   :  { %1603 = vmatpush3.bf16.msra.mxu0 %v1894_v61 }
 0x180   :  { %1615 = vmatpush3.bf16.msra.mxu1 %v1612_v2 }
 0x181   :  { %1617 = vmatprep.subr.bf16.mxu1 %v1616_v5 }
 0x184   :  { %1619 = vmatpush3.bf16.msra.mxu1 %v1616_v5 }
 0x185   :  { %1621 = vmatprep.subr.bf16.mxu1 %v1620_v7 }
 0x245   :  { %v1425_v15 = vpop.f32.mrb[0].mxu0 }
 0x246   :  { %v1684_v18 = vadd.f32 %v1425_v15, %v1262_v14  ;;  %v610_v19 = vpop.f32.mrb[1].mxu0 }
 0x247   :  { %v1685_v22 = vadd.f32 %v1262_v14, %v610_v19 }
 0x248   :  { %v623_v23 = vmul.f32 0.044715, %v1684_v18  ;;  %v621_v31 = vmul.f32 0.5, %v1684_v18 }
 0x249   :  { %v622_v16 = vmul.f32 0.044715, %v1685_v22  ;;  %v620_v33 = vmul.f32 0.5, %v1685_v22 }
 0x24a   :  { %v625_v24 = vmul.f32 %v1684_v18, %v623_v23 }
 0x24b   :  { %v624_v17 = vmul.f32 %v1685_v22, %v622_v16 }
 0x24c   :  { %v627_v20 = vmul.f32 %v1684_v18, %v625_v24 }
 0x24d   :  { %v626_v21 = vmul.f32 %v1685_v22, %v624_v17 }
 0x24e   :  { %v629_v25 = vadd.f32 %v1684_v18, %v627_v20 }
 0x24f   :  { %v628_v26 = vadd.f32 %v1685_v22, %v626_v21 }
 0x250   :  { %v631_v27 = vmul.f32 0.7978846, %v629_v25 }
 0x251   :  { %v630_v28 = vmul.f32 0.7978846, %v628_v26 }
 0x252   :  { %1715 = vtanh.f32 %v631_v27 }
 0x253   :  { %1717 = vtanh.f32 %v630_v28 }
 0x25c   :  { %v1716_v29 = vpop.eup %1715 }
 0x25d   :  { %v1718_v30 = vpop.eup %1717  ;;  %v635_v32 = vadd.f32 1.0, %v1716_v29 }
 0x25e   :  { %v634_v34 = vadd.f32 1.0, %v1718_v30 }
 0x25f   :  { %v637_v35 = vmul.f32 %v635_v32, %v621_v31 }
 0x260   :  { %v636_v37 = vmul.f32 %v634_v34, %v620_v33 }
 0x261   :  { %v658_v39 = vsel %vm653_vm1, %v637_v35, 0 }
 0x262   :  { %v655_v40 = vsel %vm653_vm1, %v636_v37, 0  ;;  %v743_v41 = vand.u32 4294901760, %v658_v39 }
 0x263   :  { %v733_v42 = vand.u32 4294901760, %v655_v40 }
 0x264   :  { %v744_v43 = vsub.f32 %v658_v39, %v743_v41 }
 0x265   :  { %1461 = vmatprep.mubr.f32.mxu1 %v733_v42  ;;  %v734_v44 = vsub.f32 %v655_v40, %v733_v42 }
 0x266   :  { %1462 = vmatmul.mubr.f32.vlgmr.msra.gmra.mrb[0].mxu1 %v743_v41  ;;  %v745_v45 = vand.u32 4294901760, %v744_v43 }
 0x267   :  { %1623 = vmatpush3.bf16.msra.mxu1 %v1620_v7  ;;  %1480 = vmatprep.mubr.f32.mxu1 %v734_v44  ;;  %v735_v46 = vand.u32 4294901760, %v734_v44 }
 0x268   :  { %1625 = vmatprep.subr.bf16.mxu1 %v1624_v6  ;;  %v746_v47 = vsub.f32 %v744_v43, %v745_v45 }
 0x269   :  { %v736_v48 = vsub.f32 %v734_v44, %v735_v46 }
 0x26a   :  { %v747_v50 = vand.u32 4294901760, %v746_v47 }
 0x26b   :  { %1627 = vmatpush3.bf16.msra.mxu1 %v1624_v6  ;;  %v737_v49 = vand.u32 4294901760, %v736_v48 }
 0x26c   :  { %1629 = vmatprep.subr.bf16.mxu1 %v1628_v8 }
 0x26d   :  { %1442 = vmatprep.mubr.f32.mxu0 %v737_v49 }
 0x26e   :  { %1443 = vmatmul.mubr.f32.vlgmr.msra.gmra.mrb[2].mxu0 %v747_v50 }
 0x26f   :  { %1631 = vmatpush3.bf16.msra.mxu1 %v1628_v8 }
 0x270   :  { %1633 = vmatprep.subr.bf16.mxu1 %v1632_v9 }
 0x273   :  { %1635 = vmatpush3.bf16.msra.mxu1 %v1632_v9 }
 0x274   :  { %1637 = vmatprep.subr.bf16.mxu1 %v1876_v36 }
 0x276   :  { %1481 = vmatmul.mubr.f32.vlgmr.msra.gmra.mrb[0].mxu1 %v744_v43 }
 0x277   :  { %1639 = vmatpush3.bf16.msra.mxu1 %v1876_v36  ;;  %1499 = vmatprep.mubr.f32.mxu1 %v735_v46 }
 0x278   :  { %1641 = vmatprep.subr.bf16.mxu1 %v1878_v38 }
 0x27b   :  { %1643 = vmatpush3.bf16.msra.mxu1 %v1878_v38 }
 0x27c   :  { %1645 = vmatprep.subr.bf16.mxu1 %v1890_v51 }
 0x27f   :  { %1647 = vmatpush3.bf16.msra.mxu1 %v1890_v51 }
 0x280   :  { %1649 = vmatprep.subr.bf16.mxu1 %v1894_v61 }
 0x283   :  { %1651 = vmatpush3.bf16.msra.mxu1 %v1894_v61 }
 0x284   :  { %1653 = vmatprep.subr.bf16.mxu1 %v1908_v11 }
 0x286   :  { %1500 = vmatmul.mubr.f32.vlgmr.msra.gmra.mrb[0].mxu1 %v745_v45 }
 0x287   :  { %1655 = vmatpush3.bf16.msra.mxu1 %v1908_v11  ;;  %1518 = vmatprep.mubr.f32.mxu1 %v733_v42 }
 0x288   :  { %1657 = vmatprep.subr.bf16.mxu1 %v1910_v12 }
 0x28b   :  { %1659 = vmatpush3.bf16.msra.mxu1 %v1910_v12 }
 0x28c   :  { %1661 = vmatprep.subr.bf16.mxu1 %v1912_v10 }
 0x28f   :  { %1663 = vmatpush3.bf16.msra.mxu1 %v1912_v10 }
 0x290   :  { %1665 = vmatprep.subr.bf16.mxu1 %v1914_v13 }
 0x293   :  { %1667 = vmatpush3.bf16.msra.mxu1 %v1914_v13 }
 0x294   :  { %1669 = vmatprep.subr.bf16.mxu1 %v1876_v36 }
 0x296   :  { %1519 = vmatmul.mubr.f32.vlgmr.msra.gmra.mrb[0].mxu1 %v743_v41 }
 0x297   :  { %1671 = vmatpush3.bf16.msra.mxu1 %v1876_v36  ;;  %1537 = vmatprep.mubr.f32.mxu1 %v733_v42  ;;  %v1263_v36 = vld [vmem:[%s1968_s6] ss:$0 sm:$0xff] }
 0x298   :  { %1673 = vmatprep.subr.bf16.mxu1 %v1878_v38 }
 0x29b   :  { %1675 = vmatpush3.bf16.msra.mxu1 %v1878_v38 }
 0x29c   :  { %1677 = vmatprep.subr.bf16.mxu1 %v1890_v51 }
 0x29f   :  { %1679 = vmatpush3.bf16.msra.mxu1 %v1890_v51 }
 0x2a0   :  { %1681 = vmatprep.subr.bf16.mxu1 %v1894_v61 }
 0x2a3   :  { %1683 = vmatpush3.bf16.msra.mxu1 %v1894_v61 }
 0x2a6   :  { %1538 = vmatmul.mubr.f32.vlgmr.msra.gmra.mrb[0].mxu1 %v743_v41 }
 0x341   :  { %v1444_v52 = vpop.f32.mrb[2].mxu0 }
 0x342   :  { %v739_v53 = vpop.f32.mrb[3].mxu0  ;;  %v750_v54 = vadd.f32 %v1444_v52, %v1263_v36 }
 0x343   :  { %v740_v55 = vadd.f32 %v1263_v36, %v739_v53 }
 0x379   :  { %v1539_v56 = vpop.f32.mrb[0].mxu1 }
 0x37a   :  { %v1687_v38 = vadd.f32 %v1539_v56, %v750_v54  ;;  %v1230_v57 = vpop.f32.mrb[1].mxu1 }
 0x37b   :  { %v1689_v58 = vadd.f32 %v1230_v57, %v740_v55 }
 0x37c   :  { %v1241_v51 = vadd.f32 %v1687_v38, %v1794_v1 }
 0x37d   :  { %v1240_v59 = vadd.f32 %v1689_v58, %v1789_v0 }
 0x37e   :  { %1243 = vst.msk [vmem:[#allocation2 + $0x8] sm:$0xff] %vm29_vm0, %v1241_v51 }
 0x37f   :  { %1242 = vst.msk [vmem:[#allocation2] sm:$0xff] %vm29_vm0, %v1240_v59 }
 0x380   :  { %1730 = shalt.err (!%p1727_p4)
}
 0x381   :  { %s1731_s11 = scalar_lea.hbm %s1969_s7, 256 }
 0x382   :  { %p1732_p5 = scmp.ne.s32.totalorder %s1969_s7, %s1731_s11  ;;  %p1735_p6 = scmp.lt.u32.totalorder %s1731_s11, %s1969_s7 }
 0x384   :  { %p1737_p7 = pnand %p1735_p6, %p1732_p5 }
 0x386   :  { %1740 = shalt.err (!%p1737_p7)
}
 0x387   :  { %s1744_s1 = smov 128   ;;  %s1745_s2 = smov 8  }
 0x388   :  { %1255 = dma.vmem_to_hbm [thread:$0]  %s1250_s8, 256, %s1969_s7, [#allocation3], %s1744_s1, %s1744_s1, %s1745_s2  }
 0x389   :  { %1741 = dma.done.wait [#allocation3], 256  }
 0x38a   :  { %1742 = vsyncadd [#allocation3], 4294967040 }
 0x38b   :  { %1259 = vsyncpa [#allocation3], 1 }

// kernel: transformer_pallas.10
= control target key start
LH: loop header
LB: loop body
LE: loop exit
PB: predicated region body
PF: predicated region fallthrough
CT: control target
= control target key end

     0   :  { %vm30_vm0 = vcmask 261120   ;;  %s812_s2 = inlined_call_operand.vmem [shape: f32[32,32], index: 2, kind: input, shape index: {}]   ;;  %s813_s0 = inlined_call_operand.vmem [shape: f32[16,32], index: 0, kind: input, shape index: {}]   ;;  %s814_s3 = inlined_call_operand.vmem [shape: f32[1,32], index: 3, kind: input, shape index: {}]   ;;  %s815_s1 = inlined_call_operand.vmem [shape: f32[16,32], index: 1, kind: input, shape index: {}]   ;;  %s816_s4 = inlined_call_operand.vmem [shape: f32[16,32], index: 4, kind: output, shape index: {}]  }
   0x1   :  { %v19_v0 = vld [vmem:[%s812_s2] sm:$0xff]  ;;  %v20_v1 = vld [vmem:[%s812_s2 + $0x8] sm:$0xff]  ;;  %v21_v2 = vld [vmem:[%s812_s2 + $0x10] sm:$0xff] }
   0x2   :  { %v38_v3 = vand.u32 4294901760, %v19_v0  ;;  %v41_v4 = vand.u32 4294901760, %v20_v1  ;;  %v22_v5 = vld [vmem:[%s812_s2 + $0x18] sm:$0xff]  ;;  %v44_v6 = vand.u32 4294901760, %v21_v2  ;;  %v17_v7 = vld [vmem:[%s813_s0] sm:$0xff]  ;;  %v18_v8 = vld [vmem:[%s813_s0 + $0x8] sm:$0xff] }
   0x3   :  { %v47_v9 = vand.u32 4294901760, %v22_v5  ;;  %v32_v10 = vsel %vm30_vm0, %v17_v7, 0  ;;  %v35_v11 = vsel %vm30_vm0, %v18_v8, 0  ;;  %v575_v46 = vld [vmem:[%s814_s3] ss:$0 sm:$0xff]  ;;  %v566_v52 = vld [vmem:[%s815_s1 + $0x8] sm:$0xff] }
   0x4   :  { %v678_v12 = vpack.c.bf16 %v41_v4, %v38_v3  ;;  %v783_v13 = vand.u32 4294901760, %v32_v10  ;;  %v785_v14 = vand.u32 4294901760, %v35_v11  ;;  %v128_v15 = vsub.f32 %v19_v0, %v38_v3  ;;  %v565_v55 = vld [vmem:[%s815_s1] sm:$0xff] }
   0x5   :  { %v682_v16 = vpack.c.bf16 %v47_v9, %v44_v6  ;;  %v135_v17 = vsub.f32 %v20_v1, %v41_v4  ;;  %v142_v18 = vsub.f32 %v21_v2, %v44_v6  ;;  %v149_v19 = vsub.f32 %v22_v5, %v47_v9 }
   0x6   :  { %679 = vmatprep.subr.bf16.mxu1 %v678_v12  ;;  %703 = vmatprep.subr.bf16.mxu0 %v678_v12  ;;  %v107_v20 = vsub.f32 %v32_v10, %v783_v13  ;;  %v117_v21 = vsub.f32 %v35_v11, %v785_v14  ;;  %v129_v22 = vand.u32 4294901760, %v128_v15 }
   0x7   :  { %681 = vmatpush3.bf16.msra.mxu1 %v678_v12  ;;  %705 = vmatpush3.bf16.msra.mxu0 %v678_v12  ;;  %v136_v23 = vand.u32 4294901760, %v135_v17  ;;  %v143_v24 = vand.u32 4294901760, %v142_v18  ;;  %v150_v25 = vand.u32 4294901760, %v149_v19  ;;  %v694_v44 = vpack.c.bf16 %v135_v17, %v128_v15 }
   0x8   :  { %683 = vmatprep.subr.bf16.mxu1 %v682_v16  ;;  %707 = vmatprep.subr.bf16.mxu0 %v682_v16  ;;  %v108_v26 = vand.u32 4294901760, %v107_v20  ;;  %v118_v27 = vand.u32 4294901760, %v117_v21  ;;  %v130_v28 = vsub.f32 %v128_v15, %v129_v22  ;;  %v698_v45 = vpack.c.bf16 %v149_v19, %v142_v18 }
   0x9   :  { %v137_v29 = vsub.f32 %v135_v17, %v136_v23  ;;  %v710_v30 = vpack.c.bf16 %v136_v23, %v129_v22  ;;  %v144_v31 = vsub.f32 %v142_v18, %v143_v24  ;;  %v151_v32 = vsub.f32 %v149_v19, %v150_v25 }
   0xa   :  { %v109_v33 = vsub.f32 %v107_v20, %v108_v26  ;;  %653 = vmatprep.mubr.f32.mxu0 %v108_v26  ;;  %v119_v34 = vsub.f32 %v117_v21, %v118_v27  ;;  %v131_v35 = vand.u32 4294901760, %v130_v28  ;;  %v714_v43 = vpack.c.bf16 %v150_v25, %v143_v24 }
   0xb   :  { %685 = vmatpush3.bf16.msra.mxu1 %v682_v16  ;;  %709 = vmatpush3.bf16.msra.mxu0 %v682_v16  ;;  %v138_v36 = vand.u32 4294901760, %v137_v29  ;;  %v145_v37 = vand.u32 4294901760, %v144_v31  ;;  %v152_v38 = vand.u32 4294901760, %v151_v32 }
   0xc   :  { %v110_v39 = vand.u32 4294901760, %v109_v33  ;;  %v120_v40 = vand.u32 4294901760, %v119_v34  ;;  %711 = vmatprep.subr.bf16.mxu0 %v710_v30 }
   0xd   :  { %v686_v41 = vpack.c.bf16 %v138_v36, %v131_v35  ;;  %v690_v42 = vpack.c.bf16 %v152_v38, %v145_v37 }
   0xe   :  { %620 = vmatprep.mubr.f32.mxu1 %v110_v39  ;;  %654 = vmatmul.mubr.f32.vlgmr.msra.gmra.mrb[0].mxu0 %v118_v27 }
   0xf   :  { %621 = vmatmul.mubr.f32.vlgmr.msra.gmra.mrb[0].mxu1 %v120_v40  ;;  %687 = vmatprep.subr.bf16.mxu1 %v686_v41 }
  0x10   :  { %689 = vmatpush3.bf16.msra.mxu1 %v686_v41  ;;  %713 = vmatpush3.bf16.msra.mxu0 %v710_v30 }
  0x11   :  { %691 = vmatprep.subr.bf16.mxu1 %v690_v42  ;;  %715 = vmatprep.subr.bf16.mxu0 %v714_v43 }
  0x12   :  { %631 = vmatprep.mubr.f32.mxu1 %v783_v13  ;;  %664 = vmatprep.mubr.f32.mxu0 %v783_v13 }
  0x14   :  { %693 = vmatpush3.bf16.msra.mxu1 %v690_v42  ;;  %717 = vmatpush3.bf16.msra.mxu0 %v714_v43 }
  0x15   :  { %695 = vmatprep.subr.bf16.mxu1 %v694_v44  ;;  %719 = vmatprep.subr.bf16.mxu0 %v678_v12 }
  0x17   :  { %632 = vmatmul.mubr.f32.vlgmr.msra.gmra.mrb[0].mxu1 %v785_v14  ;;  %665 = vmatmul.mubr.f32.vlgmr.msra.gmra.mrb[0].mxu0 %v785_v14 }
  0x18   :  { %697 = vmatpush3.bf16.msra.mxu1 %v694_v44  ;;  %721 = vmatpush3.bf16.msra.mxu0 %v678_v12 }
  0x19   :  { %699 = vmatprep.subr.bf16.mxu1 %v698_v45  ;;  %723 = vmatprep.subr.bf16.mxu0 %v682_v16 }
  0x1a   :  { %642 = vmatprep.mubr.f32.mxu1 %v107_v20  ;;  %675 = vmatprep.mubr.f32.mxu0 %v783_v13 }
  0x1c   :  { %701 = vmatpush3.bf16.msra.mxu1 %v698_v45  ;;  %725 = vmatpush3.bf16.msra.mxu0 %v682_v16 }
  0x1f   :  { %643 = vmatmul.mubr.f32.vlgmr.msra.gmra.mrb[0].mxu1 %v117_v21  ;;  %676 = vmatmul.mubr.f32.vlgmr.msra.gmra.mrb[0].mxu0 %v785_v14 }
  0xf2   :  { %v644_v47 = vpop.f32.mrb[0].mxu1  ;;  %v677_v48 = vpop.f32.mrb[0].mxu0 }
  0xf3   :  { %v726_v49 = vadd.f32 %v644_v47, %v575_v46  ;;  %v299_v50 = vpop.f32.mrb[1].mxu1  ;;  %v555_v51 = vpop.f32.mrb[1].mxu0 }
  0xf4   :  { %v728_v53 = vadd.f32 %v575_v46, %v299_v50 }
  0xf5   :  { %v727_v54 = vadd.f32 %v726_v49, %v677_v48 }
  0xf6   :  { %v729_v56 = vadd.f32 %v728_v53, %v555_v51 }
  0xf7   :  { %v568_v57 = vadd.f32 %v727_v54, %v566_v52 }
  0xf8   :  { %v567_v58 = vadd.f32 %v729_v56, %v565_v55 }
  0xf9   :  { %570 = vst.msk [vmem:[%s816_s4 + $0x8] sm:$0xff] %vm30_vm0, %v568_v57 }
  0xfa   :  { %569 = vst.msk [vmem:[%s816_s4] sm:$0xff] %vm30_vm0, %v567_v58 }

// kernel: transformer_pallas.11
= control target key start
LH: loop header
LB: loop body
LE: loop exit
PB: predicated region body
PF: predicated region fallthrough
CT: control target
= control target key end

     0   :  { %vm28_vm0 = vcmask 261120   ;;  %vm652_vm1 = vcmask 523264   ;;  %s1913_s0 = inlined_call_operand.vmem [shape: f32[16,32], index: 0, kind: input, shape index: {}]   ;;  %s1914_s3 = inlined_call_operand.vmem [shape: f32[32,64], index: 3, kind: input, shape index: {}]   ;;  %s1915_s1 = inlined_call_operand.vmem [shape: f32[1,32], index: 1, kind: input, shape index: {}]   ;;  %s1916_s2 = inlined_call_operand.vmem [shape: f32[1,32], index: 2, kind: input, shape index: {}]   ;;  %s1917_s5 = inlined_call_operand.vmem [shape: f32[64,32], index: 5, kind: input, shape index: {}]   ;;  %s1918_s4 = inlined_call_operand.vmem [shape: f32[1,64], index: 4, kind: input, shape index: {}]   ;;  %s1919_s6 = inlined_call_operand.vmem [shape: f32[1,32], index: 6, kind: input, shape index: {}]   ;;  %s1920_s7 = inlined_call_operand.vmem [shape: f32[16,32], index: 7, kind: output, shape index: {}]  }
   0x1   :  { %v1746_v0 = vld [vmem:[%s1913_s0] sm:$0xff]  ;;  %v1751_v1 = vld [vmem:[%s1913_s0 + $0x8] sm:$0xff]  ;;  %v76_v16 = vld [vmem:[%s1914_s3 + $0x10] sm:$0xff] }
   0x2   :  { %v29_v2 = vsel %vm28_vm0, %v1746_v0, 0.0  ;;  %v32_v3 = vsel %vm28_vm0, %v1751_v1, 0.0  ;;  %v74_v14 = vld [vmem:[%s1914_s3] sm:$0xff]  ;;  %v75_v15 = vld [vmem:[%s1914_s3 + $0x8] sm:$0xff]  ;;  %v77_v19 = vld [vmem:[%s1914_s3 + $0x18] sm:$0xff]  ;;  %v98_v20 = vand.u32 4294901760, %v76_v16 }
   0x3   :  { %30 = vadd.xlane.f32.xlu0 %v29_v2  ;;  %v92_v17 = vand.u32 4294901760, %v74_v14  ;;  %v95_v18 = vand.u32 4294901760, %v75_v15  ;;  %v101_v21 = vand.u32 4294901760, %v77_v19  ;;  %v1247_v53 = vld [vmem:[%s1915_s1] ss:$0 sm:$0xff] }
   0x4   :  { %v196_v30 = vsub.f32 %v76_v16, %v98_v20  ;;  %v1248_v55 = vld [vmem:[%s1916_s2] ss:$0 sm:$0xff] }
   0x5   :  { %v1773_v22 = vpack.c.bf16 %v95_v18, %v92_v17  ;;  %v1775_v23 = vpack.c.bf16 %v101_v21, %v98_v20  ;;  %v182_v24 = vsub.f32 %v74_v14, %v92_v17  ;;  %v189_v25 = vsub.f32 %v75_v15, %v95_v18  ;;  %v639_v18 = vld [vmem:[%s1917_s5 + $0x10] sm:$0xff] }
   0x6   :  { %v203_v31 = vsub.f32 %v77_v19, %v101_v21  ;;  %v197_v34 = vand.u32 4294901760, %v196_v30  ;;  %v640_v19 = vld [vmem:[%s1917_s5 + $0x18] sm:$0xff] }
   0x7   :  { %33 = vadd.xlane.f32.xlu0 %v32_v3  ;;  %1528 = vmatprep.subr.bf16.mxu0 %v1773_v22  ;;  %v183_v26 = vand.u32 4294901760, %v182_v24  ;;  %v190_v27 = vand.u32 4294901760, %v189_v25  ;;  %v1543_v42 = vpack.c.bf16 %v189_v25, %v182_v24 }
   0x8   :  { %1530 = vmatpush3.bf16.msra.mxu0 %v1773_v22  ;;  %v204_v35 = vand.u32 4294901760, %v203_v31  ;;  %v198_v37 = vsub.f32 %v196_v30, %v197_v34  ;;  %v1547_v43 = vpack.c.bf16 %v203_v31, %v196_v30 }
   0x9   :  { %1532 = vmatprep.subr.bf16.mxu0 %v1775_v23  ;;  %v184_v28 = vsub.f32 %v182_v24, %v183_v26  ;;  %v191_v29 = vsub.f32 %v189_v25, %v190_v27  ;;  %v1559_v44 = vpack.c.bf16 %v190_v27, %v183_v26 }
   0xa   :  { %v205_v38 = vsub.f32 %v203_v31, %v204_v35  ;;  %v199_v39 = vand.u32 4294901760, %v198_v37  ;;  %v1563_v45 = vpack.c.bf16 %v204_v35, %v197_v34 }
   0xb   :  { %v185_v32 = vand.u32 4294901760, %v184_v28  ;;  %v192_v33 = vand.u32 4294901760, %v191_v29  ;;  %v641_v28 = vld [vmem:[%s1917_s5 + $0x20] sm:$0xff]  ;;  %v642_v29 = vld [vmem:[%s1917_s5 + $0x28] sm:$0xff] }
   0xc   :  { %1534 = vmatpush3.bf16.msra.mxu0 %v1775_v23  ;;  %v206_v40 = vand.u32 4294901760, %v205_v38  ;;  %v672_v34 = vand.u32 4294901760, %v641_v28  ;;  %v675_v35 = vand.u32 4294901760, %v642_v29 }
   0xd   :  { %v1535_v36 = vpack.c.bf16 %v192_v33, %v185_v32 }
   0xe   :  { %v1539_v41 = vpack.c.bf16 %v206_v40, %v199_v39  ;;  %v643_v40 = vld [vmem:[%s1917_s5 + $0x30] sm:$0xff] }
   0xf   :  { %1536 = vmatprep.subr.bf16.mxu0 %v1535_v36 }
  0x90   :  { %v31_v4 = vpop.xlane.xlu0 %30 }
  0x91   :  { %v36_v5 = vmul.f32 0.03125, %v31_v4 }
  0x93   :  { %v38_v6 = vsub.f32 %v1746_v0, %v36_v5 }
  0x94   :  { %v34_v7 = vpop.xlane.xlu0 %33 }
  0x95   :  { %v37_v8 = vmul.f32 0.03125, %v34_v7  ;;  %v40_v9 = vmul.f32 %v38_v6, %v38_v6 }
  0x97   :  { %v39_v10 = vsub.f32 %v1751_v1, %v37_v8  ;;  %v42_v11 = vsel %vm28_vm0, %v40_v9, 0.0 }
  0x98   :  { %43 = vadd.xlane.f32.xlu1 %v42_v11 }
  0x99   :  { %v41_v12 = vmul.f32 %v39_v10, %v39_v10 }
  0x9b   :  { %v45_v13 = vsel %vm28_vm0, %v41_v12, 0.0 }
  0x9c   :  { %46 = vadd.xlane.f32.xlu1 %v45_v13  ;;  %v638_v13 = vld [vmem:[%s1917_s5 + $0x8] sm:$0xff] }
  0x9d   :  { %v663_v15 = vand.u32 4294901760, %v638_v13 }
  0x9f   :  { %v1805_v17 = vsub.f32 %v638_v13, %v663_v15 }
  0xa1   :  { %v762_v21 = vand.u32 4294901760, %v1805_v17 }
  0xa3   :  { %v763_v25 = vsub.f32 %v1805_v17, %v762_v21 }
  0xa5   :  { %v764_v31 = vand.u32 4294901760, %v763_v25 }
 0x125   :  { %v44_v46 = vpop.xlane.xlu1 %43 }
 0x126   :  { %v48_v47 = vmul.f32 0.03125, %v44_v46  ;;  %v678_v46 = vand.u32 4294901760, %v643_v40 }
 0x128   :  { %v50_v48 = vadd.f32 1e-05, %v48_v47 }
 0x129   :  { %v47_v49 = vpop.xlane.xlu1 %46 }
 0x12a   :  { %1695 = vrsqrt.f32 %v50_v48  ;;  %v49_v50 = vmul.f32 0.03125, %v47_v49 }
 0x12c   :  { %v51_v51 = vadd.f32 1e-05, %v49_v50 }
 0x12e   :  { %1697 = vrsqrt.f32 %v51_v51  ;;  %v1847_v51 = vpack.c.bf16 %v675_v35, %v672_v34 }
 0x134   :  { %v1696_v52 = vpop.eup %1695 }
 0x135   :  { %v54_v54 = vmul.f32 %v1696_v52, %v38_v6  ;;  %v796_v52 = vsub.f32 %v643_v40, %v678_v46 }
 0x137   :  { %v63_v56 = vmul.f32 %v1247_v53, %v54_v54 }
 0x138   :  { %v1698_v57 = vpop.eup %1697 }
 0x139   :  { %v55_v58 = vmul.f32 %v1698_v57, %v39_v10  ;;  %v72_v59 = vadd.f32 %v1248_v55, %v63_v56  ;;  %v637_v10 = vld [vmem:[%s1917_s5] sm:$0xff]  ;;  %v797_v57 = vand.u32 4294901760, %v796_v52 }
 0x13a   :  { %v660_v14 = vand.u32 4294901760, %v637_v10 }
 0x13b   :  { %v64_v60 = vmul.f32 %v1247_v53, %v55_v58  ;;  %v86_v61 = vsel %vm28_vm0, %v72_v59, 0 }
 0x13c   :  { %v160_v62 = vand.u32 4294901760, %v86_v61  ;;  %v1803_v16 = vsub.f32 %v637_v10, %v660_v14 }
 0x13d   :  { %v73_v63 = vadd.f32 %v1248_v55, %v64_v60 }
 0x13e   :  { %v161_v2 = vsub.f32 %v86_v61, %v160_v62  ;;  %v755_v20 = vand.u32 4294901760, %v1803_v16 }
 0x13f   :  { %v89_v3 = vsel %vm28_vm0, %v73_v63, 0 }
 0x140   :  { %v162_v4 = vand.u32 4294901760, %v161_v2  ;;  %v170_v5 = vand.u32 4294901760, %v89_v3  ;;  %v756_v24 = vsub.f32 %v1803_v16, %v755_v20 }
 0x142   :  { %v163_v7 = vsub.f32 %v161_v2, %v162_v4  ;;  %v171_v6 = vsub.f32 %v89_v3, %v170_v5  ;;  %v757_v30 = vand.u32 4294901760, %v756_v24 }
 0x144   :  { %v164_v8 = vand.u32 4294901760, %v163_v7  ;;  %v172_v9 = vand.u32 4294901760, %v171_v6  ;;  %v1591_v37 = vpack.c.bf16 %v764_v31, %v757_v30  ;;  %v1607_v7 = vpack.c.bf16 %v1805_v17, %v1803_v16 }
 0x146   :  { %1355 = vmatprep.mubr.f32.mxu0 %v164_v8  ;;  %v173_v11 = vsub.f32 %v171_v6, %v172_v9  ;;  %1592 = vmatprep.subr.bf16.mxu1 %v1591_v37 }
 0x147   :  { %1594 = vmatpush3.bf16.msra.mxu1 %v1591_v37 }
 0x148   :  { %v174_v12 = vand.u32 4294901760, %v173_v11  ;;  %v1865_v11 = vpack.c.bf16 %v762_v21, %v755_v20 }
 0x14a   :  { %1356 = vmatmul.mubr.f32.vlgmr.msra.gmra.mrb[0].mxu0 %v174_v12 }
 0x14b   :  { %1538 = vmatpush3.bf16.msra.mxu0 %v1535_v36  ;;  %1366 = vmatprep.mubr.f32.mxu0 %v160_v62  ;;  %v1833_v36 = vpack.c.bf16 %v663_v15, %v660_v14  ;;  %v1249_v14 = vld [vmem:[%s1918_s4] ss:$0 sm:$0xff] }
 0x14c   :  { %1540 = vmatprep.subr.bf16.mxu0 %v1539_v41 }
 0x14f   :  { %1542 = vmatpush3.bf16.msra.mxu0 %v1539_v41  ;;  %v644_v41 = vld [vmem:[%s1917_s5 + $0x38] sm:$0xff] }
 0x150   :  { %1544 = vmatprep.subr.bf16.mxu0 %v1543_v42  ;;  %v681_v47 = vand.u32 4294901760, %v644_v41 }
 0x152   :  { %1367 = vmatmul.mubr.f32.vlgmr.msra.gmra.mrb[0].mxu0 %v170_v5  ;;  %v803_v53 = vsub.f32 %v644_v41, %v681_v47  ;;  %v1851_v61 = vpack.c.bf16 %v681_v47, %v678_v46 }
 0x153   :  { %1546 = vmatpush3.bf16.msra.mxu0 %v1543_v42  ;;  %1377 = vmatprep.mubr.f32.mxu0 %v161_v2 }
 0x154   :  { %1548 = vmatprep.subr.bf16.mxu0 %v1547_v43  ;;  %v804_v58 = vand.u32 4294901760, %v803_v53 }
 0x156   :  { %v805_v63 = vsub.f32 %v803_v53, %v804_v58  ;;  %v1871_v13 = vpack.c.bf16 %v804_v58, %v797_v57 }
 0x157   :  { %1550 = vmatpush3.bf16.msra.mxu0 %v1547_v43  ;;  %v782_v43 = vsub.f32 %v641_v28, %v672_v34 }
 0x158   :  { %1552 = vmatprep.subr.bf16.mxu0 %v1773_v22 }
 0x159   :  { %v783_v49 = vand.u32 4294901760, %v782_v43 }
 0x15a   :  { %1378 = vmatmul.mubr.f32.vlgmr.msra.gmra.mrb[0].mxu0 %v171_v6 }
 0x15b   :  { %1554 = vmatpush3.bf16.msra.mxu0 %v1773_v22  ;;  %1388 = vmatprep.mubr.f32.mxu0 %v162_v4  ;;  %v784_v55 = vsub.f32 %v782_v43, %v783_v49  ;;  %v806_v4 = vand.u32 4294901760, %v805_v63 }
 0x15c   :  { %1556 = vmatprep.subr.bf16.mxu0 %v1775_v23 }
 0x15d   :  { %v785_v59 = vand.u32 4294901760, %v784_v55 }
 0x15f   :  { %1558 = vmatpush3.bf16.msra.mxu0 %v1775_v23 }
 0x160   :  { %1560 = vmatprep.subr.bf16.mxu0 %v1559_v44 }
 0x162   :  { %1389 = vmatmul.mubr.f32.vlgmr.msra.gmra.mrb[0].mxu0 %v172_v9  ;;  %v1619_v9 = vpack.c.bf16 %v803_v53, %v796_v52 }
 0x163   :  { %1562 = vmatpush3.bf16.msra.mxu0 %v1559_v44  ;;  %1399 = vmatprep.mubr.f32.mxu0 %v160_v62  ;;  %v789_v44 = vsub.f32 %v642_v29, %v675_v35 }
 0x164   :  { %1564 = vmatprep.subr.bf16.mxu0 %v1563_v45 }
 0x165   :  { %v790_v50 = vand.u32 4294901760, %v789_v44  ;;  %v1615_v8 = vpack.c.bf16 %v789_v44, %v782_v43 }
 0x167   :  { %1566 = vmatpush3.bf16.msra.mxu0 %v1563_v45  ;;  %v791_v56 = vsub.f32 %v789_v44, %v790_v50  ;;  %v1869_v10 = vpack.c.bf16 %v790_v50, %v783_v49 }
 0x168   :  { %1568 = vmatprep.subr.bf16.mxu0 %v1773_v22 }
 0x169   :  { %v792_v60 = vand.u32 4294901760, %v791_v56 }
 0x16a   :  { %1400 = vmatmul.mubr.f32.vlgmr.msra.gmra.mrb[0].mxu0 %v170_v5 }
 0x16b   :  { %1570 = vmatpush3.bf16.msra.mxu0 %v1773_v22  ;;  %1410 = vmatprep.mubr.f32.mxu0 %v160_v62  ;;  %v666_v22 = vand.u32 4294901760, %v639_v18  ;;  %v798_v62 = vsub.f32 %v796_v52, %v797_v57  ;;  %v1599_v2 = vpack.c.bf16 %v792_v60, %v785_v59 }
 0x16c   :  { %1572 = vmatprep.subr.bf16.mxu0 %v1775_v23 }
 0x16d   :  { %v1821_v26 = vsub.f32 %v639_v18, %v666_v22  ;;  %v799_v3 = vand.u32 4294901760, %v798_v62 }
 0x16f   :  { %1574 = vmatpush3.bf16.msra.mxu0 %v1775_v23  ;;  %v669_v23 = vand.u32 4294901760, %v640_v19  ;;  %v769_v32 = vand.u32 4294901760, %v1821_v26 }
 0x170   :  { %1576 = vmatprep.subr.bf16.mxu0 %v1833_v36 }
 0x171   :  { %v1823_v27 = vsub.f32 %v640_v19, %v669_v23  ;;  %v1835_v38 = vpack.c.bf16 %v669_v23, %v666_v22  ;;  %v770_v39 = vsub.f32 %v1821_v26, %v769_v32 }
 0x172   :  { %1411 = vmatmul.mubr.f32.vlgmr.msra.gmra.mrb[0].mxu0 %v170_v5  ;;  %v1603_v5 = vpack.c.bf16 %v806_v4, %v799_v3 }
 0x173   :  { %v776_v33 = vand.u32 4294901760, %v1823_v27  ;;  %v771_v45 = vand.u32 4294901760, %v770_v39  ;;  %1578 = vmatpush3.bf16.msra.mxu0 %v1833_v36  ;;  %v1611_v6 = vpack.c.bf16 %v1823_v27, %v1821_v26 }
 0x174   :  { %1580 = vmatprep.subr.bf16.mxu0 %v1835_v38 }
 0x175   :  { %v777_v42 = vsub.f32 %v1823_v27, %v776_v33  ;;  %v1867_v12 = vpack.c.bf16 %v776_v33, %v769_v32 }
 0x177   :  { %v778_v48 = vand.u32 4294901760, %v777_v42  ;;  %1582 = vmatpush3.bf16.msra.mxu0 %v1835_v38 }
 0x178   :  { %1584 = vmatprep.subr.bf16.mxu0 %v1847_v51 }
 0x179   :  { %v1595_v54 = vpack.c.bf16 %v778_v48, %v771_v45 }
 0x17b   :  { %1596 = vmatprep.subr.bf16.mxu1 %v1595_v54  ;;  %1586 = vmatpush3.bf16.msra.mxu0 %v1847_v51 }
 0x17c   :  { %1598 = vmatpush3.bf16.msra.mxu1 %v1595_v54  ;;  %1588 = vmatprep.subr.bf16.mxu0 %v1851_v61 }
 0x17d   :  { %1600 = vmatprep.subr.bf16.mxu1 %v1599_v2 }
 0x17f   :  { %1590 = vmatpush3.bf16.msra.mxu0 %v1851_v61 }
 0x180   :  { %1602 = vmatpush3.bf16.msra.mxu1 %v1599_v2 }
 0x181   :  { %1604 = vmatprep.subr.bf16.mxu1 %v1603_v5 }
 0x184   :  { %1606 = vmatpush3.bf16.msra.mxu1 %v1603_v5 }
 0x185   :  { %1608 = vmatprep.subr.bf16.mxu1 %v1607_v7 }
 0x245   :  { %v1412_v15 = vpop.f32.mrb[0].mxu0 }
 0x246   :  { %v1671_v18 = vadd.f32 %v1412_v15, %v1249_v14  ;;  %v609_v19 = vpop.f32.mrb[1].mxu0 }
 0x247   :  { %v1672_v22 = vadd.f32 %v1249_v14, %v609_v19 }
 0x248   :  { %v622_v23 = vmul.f32 0.044715, %v1671_v18  ;;  %v620_v31 = vmul.f32 0.5, %v1671_v18 }
 0x249   :  { %v621_v16 = vmul.f32 0.044715, %v1672_v22  ;;  %v619_v33 = vmul.f32 0.5, %v1672_v22 }
 0x24a   :  { %v624_v24 = vmul.f32 %v1671_v18, %v622_v23 }
 0x24b   :  { %v623_v17 = vmul.f32 %v1672_v22, %v621_v16 }
 0x24c   :  { %v626_v20 = vmul.f32 %v1671_v18, %v624_v24 }
 0x24d   :  { %v625_v21 = vmul.f32 %v1672_v22, %v623_v17 }
 0x24e   :  { %v628_v25 = vadd.f32 %v1671_v18, %v626_v20 }
 0x24f   :  { %v627_v26 = vadd.f32 %v1672_v22, %v625_v21 }
 0x250   :  { %v630_v27 = vmul.f32 0.7978846, %v628_v25 }
 0x251   :  { %v629_v28 = vmul.f32 0.7978846, %v627_v26 }
 0x252   :  { %1699 = vtanh.f32 %v630_v27 }
 0x253   :  { %1701 = vtanh.f32 %v629_v28 }
 0x25c   :  { %v1700_v29 = vpop.eup %1699 }
 0x25d   :  { %v1702_v30 = vpop.eup %1701  ;;  %v634_v32 = vadd.f32 1.0, %v1700_v29 }
 0x25e   :  { %v633_v34 = vadd.f32 1.0, %v1702_v30 }
 0x25f   :  { %v636_v35 = vmul.f32 %v634_v32, %v620_v31 }
 0x260   :  { %v635_v37 = vmul.f32 %v633_v34, %v619_v33 }
 0x261   :  { %v657_v39 = vsel %vm652_vm1, %v636_v35, 0 }
 0x262   :  { %v654_v40 = vsel %vm652_vm1, %v635_v37, 0  ;;  %v742_v41 = vand.u32 4294901760, %v657_v39 }
 0x263   :  { %v732_v42 = vand.u32 4294901760, %v654_v40 }
 0x264   :  { %v743_v43 = vsub.f32 %v657_v39, %v742_v41 }
 0x265   :  { %1448 = vmatprep.mubr.f32.mxu1 %v732_v42  ;;  %v733_v44 = vsub.f32 %v654_v40, %v732_v42 }
 0x266   :  { %1449 = vmatmul.mubr.f32.vlgmr.msra.gmra.mrb[0].mxu1 %v742_v41  ;;  %v744_v45 = vand.u32 4294901760, %v743_v43 }
 0x267   :  { %1610 = vmatpush3.bf16.msra.mxu1 %v1607_v7  ;;  %1467 = vmatprep.mubr.f32.mxu1 %v733_v44  ;;  %v734_v46 = vand.u32 4294901760, %v733_v44 }
 0x268   :  { %1612 = vmatprep.subr.bf16.mxu1 %v1611_v6  ;;  %v745_v47 = vsub.f32 %v743_v43, %v744_v45 }
 0x269   :  { %v735_v48 = vsub.f32 %v733_v44, %v734_v46 }
 0x26a   :  { %v746_v50 = vand.u32 4294901760, %v745_v47 }
 0x26b   :  { %1614 = vmatpush3.bf16.msra.mxu1 %v1611_v6  ;;  %v736_v49 = vand.u32 4294901760, %v735_v48 }
 0x26c   :  { %1616 = vmatprep.subr.bf16.mxu1 %v1615_v8 }
 0x26d   :  { %1429 = vmatprep.mubr.f32.mxu0 %v736_v49 }
 0x26e   :  { %1430 = vmatmul.mubr.f32.vlgmr.msra.gmra.mrb[2].mxu0 %v746_v50 }
 0x26f   :  { %1618 = vmatpush3.bf16.msra.mxu1 %v1615_v8 }
 0x270   :  { %1620 = vmatprep.subr.bf16.mxu1 %v1619_v9 }
 0x273   :  { %1622 = vmatpush3.bf16.msra.mxu1 %v1619_v9 }
 0x274   :  { %1624 = vmatprep.subr.bf16.mxu1 %v1833_v36 }
 0x276   :  { %1468 = vmatmul.mubr.f32.vlgmr.msra.gmra.mrb[0].mxu1 %v743_v43 }
 0x277   :  { %1626 = vmatpush3.bf16.msra.mxu1 %v1833_v36  ;;  %1486 = vmatprep.mubr.f32.mxu1 %v734_v46 }
 0x278   :  { %1628 = vmatprep.subr.bf16.mxu1 %v1835_v38 }
 0x27b   :  { %1630 = vmatpush3.bf16.msra.mxu1 %v1835_v38 }
 0x27c   :  { %1632 = vmatprep.subr.bf16.mxu1 %v1847_v51 }
 0x27f   :  { %1634 = vmatpush3.bf16.msra.mxu1 %v1847_v51 }
 0x280   :  { %1636 = vmatprep.subr.bf16.mxu1 %v1851_v61 }
 0x283   :  { %1638 = vmatpush3.bf16.msra.mxu1 %v1851_v61 }
 0x284   :  { %1640 = vmatprep.subr.bf16.mxu1 %v1865_v11 }
 0x286   :  { %1487 = vmatmul.mubr.f32.vlgmr.msra.gmra.mrb[0].mxu1 %v744_v45 }
 0x287   :  { %1642 = vmatpush3.bf16.msra.mxu1 %v1865_v11  ;;  %1505 = vmatprep.mubr.f32.mxu1 %v732_v42 }
 0x288   :  { %1644 = vmatprep.subr.bf16.mxu1 %v1867_v12 }
 0x28b   :  { %1646 = vmatpush3.bf16.msra.mxu1 %v1867_v12 }
 0x28c   :  { %1648 = vmatprep.subr.bf16.mxu1 %v1869_v10 }
 0x28f   :  { %1650 = vmatpush3.bf16.msra.mxu1 %v1869_v10 }
 0x290   :  { %1652 = vmatprep.subr.bf16.mxu1 %v1871_v13 }
 0x293   :  { %1654 = vmatpush3.bf16.msra.mxu1 %v1871_v13 }
 0x294   :  { %1656 = vmatprep.subr.bf16.mxu1 %v1833_v36 }
 0x296   :  { %1506 = vmatmul.mubr.f32.vlgmr.msra.gmra.mrb[0].mxu1 %v742_v41 }
 0x297   :  { %1658 = vmatpush3.bf16.msra.mxu1 %v1833_v36  ;;  %1524 = vmatprep.mubr.f32.mxu1 %v732_v42  ;;  %v1250_v36 = vld [vmem:[%s1919_s6] ss:$0 sm:$0xff] }
 0x298   :  { %1660 = vmatprep.subr.bf16.mxu1 %v1835_v38 }
 0x29b   :  { %1662 = vmatpush3.bf16.msra.mxu1 %v1835_v38 }
 0x29c   :  { %1664 = vmatprep.subr.bf16.mxu1 %v1847_v51 }
 0x29f   :  { %1666 = vmatpush3.bf16.msra.mxu1 %v1847_v51 }
 0x2a0   :  { %1668 = vmatprep.subr.bf16.mxu1 %v1851_v61 }
 0x2a3   :  { %1670 = vmatpush3.bf16.msra.mxu1 %v1851_v61 }
 0x2a6   :  { %1525 = vmatmul.mubr.f32.vlgmr.msra.gmra.mrb[0].mxu1 %v742_v41 }
 0x341   :  { %v1431_v52 = vpop.f32.mrb[2].mxu0 }
 0x342   :  { %v738_v53 = vpop.f32.mrb[3].mxu0  ;;  %v749_v54 = vadd.f32 %v1431_v52, %v1250_v36 }
 0x343   :  { %v739_v55 = vadd.f32 %v1250_v36, %v738_v53 }
 0x379   :  { %v1526_v56 = vpop.f32.mrb[0].mxu1 }
 0x37a   :  { %v1674_v57 = vadd.f32 %v1526_v56, %v749_v54  ;;  %v1229_v38 = vpop.f32.mrb[1].mxu1 }
 0x37b   :  { %v1676_v58 = vadd.f32 %v1229_v38, %v739_v55 }
 0x37c   :  { %v1240_v59 = vadd.f32 %v1674_v57, %v1751_v1 }
 0x37d   :  { %v1239_v51 = vadd.f32 %v1676_v58, %v1746_v0 }
 0x37e   :  { %1242 = vst.msk [vmem:[%s1920_s7 + $0x8] sm:$0xff] %vm28_vm0, %v1240_v59 }
 0x37f   :  { %1241 = vst.msk [vmem:[%s1920_s7] sm:$0xff] %vm28_vm0, %v1239_v51 }

// kernel: transformer_pallas.9
= control target key start
LH: loop header
LB: loop body
LE: loop exit
PB: predicated region body
PF: predicated region fallthrough
CT: control target
= control target key end

     0   :  { %s8634_s12 = smov 0   ;;  %s8636_s13 = smov 0   ;;  %s9345_s0 = inlined_call_operand.vmem [shape: f32[2,8,8,4], index: 0, kind: input, shape index: {}]   ;;  %s9346_s1 = inlined_call_operand.vmem [shape: f32[2,8,8,4], index: 1, kind: input, shape index: {}]   ;;  %s9347_s2 = inlined_call_operand.vmem [shape: f32[2,8,8,4], index: 2, kind: input, shape index: {}]   ;;  %s9348_s3 = inlined_call_operand.vmem [shape: f32[2,8,8,4], index: 3, kind: output, shape index: {}]  }
   0x1   :  { %s8638_s14 = smov 0  }
   0x2 LB: > { %s25_s15 = sadd.s32 1, %s8606_s13  ;;  %p7683_p0 = scmp.ge.s32.totalorder %s8610_s14, 1  ;;  %s8610_s14 = sphi %s8638_s14, %s13_s14   ;;  %s8606_s13 = sphi %s8636_s13, %s9350_s13   ;;  %s8602_s12 = sphi %s8634_s12, %s9349_s12  }
   0x3   : > { %p27_p1 = scmp.ge.s32.totalorder %s25_s15, 2  ;;  %p176_p2 = scmp.lt.s32.totalorder %s8610_s14, 3 }
   0x5   : > { %s9352_s15 = smov (%p27_p1, %s25_s15), 0  ;;  %p177_p3 = pnand %p7683_p0, %p176_p2 }
   0x6   : > { %p216_p4 = scmp.lt.s32.totalorder (!%p177_p3), %s8602_s12, 1  ;;  %v8612_v0 = vmov (!%p177_p3), 0.0   ;;  %vm8613_vm0 = vmmov (!%p177_p3), 0   ;;  %vm266_vm1 = vcmask (!%p177_p3), 31744   ;;  %vm3883_vm2 = vcmask (!%p177_p3), 64512  }
   0x7   : > { %180 = sbr.rel (%p177_p3) target bundleno = 842 (0x34a), region = 32  ;;  %7890 = vmatprep.subr.mxu0 (!%p177_p3), %v8612_v0  ;;  %7920 = vmatprep.subr.mxu1 (!%p177_p3), %v8612_v0 }
   0x8   : > { %7892 = vmatprep.mubr.msk.f32.mxu0 (!%p177_p3), %vm8613_vm0, %v8612_v0  ;;  %7922 = vmatprep.mubr.msk.f32.mxu1 (!%p177_p3), %vm8613_vm0, %v8612_v0 }
   0xe   : > { %s9354_s12 = smov (!%p216_p4, %s8602_s12), 1 }
   0xf   : > { %s8658_s16 = sshll.u32 %s9354_s12, 6 }
  0x10   : > { %s8664_s19 = scalar_lea.vmem %s9346_s1, %s8658_s16  ;;  %s8670_s22 = scalar_lea.vmem %s9345_s0, %s8658_s16 }
  0x11   : > { %v250_v1 = vld [vmem:[%s8664_s19] sm:$0xff]  ;;  %v251_v2 = vld [vmem:[%s8664_s19 + $0x8] sm:$0xff]  ;;  %v244_v29 = vld [vmem:[%s8670_s22 + $0x10] sm:$0xff]  ;;  %s8990_s25 = scalar_lea.vmem %s9347_s2, %s8658_s16  ;;  %s9318_s28 = scalar_lea.vmem %s9348_s3, %s8658_s16 }
  0x12   : > { %v242_v3 = vld [vmem:[%s8670_s22] sm:$0xff]  ;;  %v271_v4 = vsel %vm266_vm1, %v250_v1, 0  ;;  %v723_v5 = vsel %vm266_vm1, %v251_v2, 0  ;;  %v243_v7 = vld [vmem:[%s8670_s22 + $0x8] sm:$0xff]  ;;  %v252_v30 = vld [vmem:[%s8664_s19 + $0x10] sm:$0xff]  ;;  %v1172_v33 = vsel %vm266_vm1, %v244_v29, 0 }
  0x13   : > { %v268_v6 = vsel %vm266_vm1, %v242_v3, 0  ;;  %v8679_v8 = vand.u32 4294901760, %v271_v4  ;;  %v8681_v9 = vand.u32 4294901760, %v723_v5  ;;  %v720_v11 = vsel %vm266_vm1, %v243_v7, 0  ;;  %v245_v31 = vld [vmem:[%s8670_s22 + $0x18] sm:$0xff]  ;;  %v246_v57 = vld [vmem:[%s8670_s22 + $0x20] sm:$0xff] }
  0x14   : > { %v8683_v10 = vand.u32 4294901760, %v268_v6  ;;  %v8686_v12 = vand.u32 4294901760, %v720_v11  ;;  %v253_v32 = vld [vmem:[%s8664_s19 + $0x18] sm:$0xff]  ;;  %v1175_v34 = vsel %vm266_vm1, %v252_v30, 0  ;;  %v1624_v35 = vsel %vm266_vm1, %v245_v31, 0  ;;  %v254_v58 = vld [vmem:[%s8664_s19 + $0x20] sm:$0xff] }
  0x15   : > { %7891 = vmatpush3.xpose.msra.mxu0 %v8679_v8  ;;  %v351_v13 = vsub.f32 %v271_v4, %v8679_v8  ;;  %7921 = vmatpush3.xpose.msra.mxu1 %v8681_v9  ;;  %v803_v14 = vsub.f32 %v723_v5, %v8681_v9  ;;  %v1627_v36 = vsel %vm266_vm1, %v253_v32, 0  ;;  %v8726_v37 = vand.u32 4294901760, %v1172_v33  ;;  %v247_v59 = vld [vmem:[%s8670_s22 + $0x28] sm:$0xff] }
  0x16   : > { %v340_v15 = vsub.f32 %v268_v6, %v8683_v10  ;;  %7895 = vmatprep.subr.mxu0 %v8612_v0  ;;  %v792_v16 = vsub.f32 %v720_v11, %v8686_v12  ;;  %7925 = vmatprep.subr.mxu1 %v8612_v0  ;;  %v8728_v38 = vand.u32 4294901760, %v1175_v34  ;;  %v8730_v39 = vand.u32 4294901760, %v1624_v35  ;;  %v255_v60 = vld [vmem:[%s8664_s19 + $0x28] sm:$0xff] }
  0x17   : > { %v352_v18 = vand.u32 4294901760, %v351_v13  ;;  %v804_v19 = vand.u32 4294901760, %v803_v14  ;;  %v8734_v40 = vand.u32 4294901760, %v1627_v36  ;;  %v8741_v41 = vsub.f32 %v1172_v33, %v8726_v37 }
  0x18   : > { %v341_v17 = vand.u32 4294901760, %v340_v15  ;;  %v793_v20 = vand.u32 4294901760, %v792_v16  ;;  %v8744_v42 = vsub.f32 %v1175_v34, %v8728_v38  ;;  %v8747_v43 = vsub.f32 %v1624_v35, %v8730_v39 }
  0x19   : > { %v353_v22 = vsub.f32 %v351_v13, %v352_v18  ;;  %v805_v23 = vsub.f32 %v803_v14, %v804_v19  ;;  %v8750_v44 = vsub.f32 %v1627_v36, %v8734_v40  ;;  %v1245_v45 = vand.u32 4294901760, %v8741_v41 }
  0x1a   : > { %v342_v21 = vsub.f32 %v340_v15, %v341_v17  ;;  %v794_v24 = vsub.f32 %v792_v16, %v793_v20  ;;  %v1256_v46 = vand.u32 4294901760, %v8744_v42  ;;  %v1697_v47 = vand.u32 4294901760, %v8747_v43 }
  0x1b   : > { %v354_v26 = vand.u32 4294901760, %v353_v22  ;;  %v806_v27 = vand.u32 4294901760, %v805_v23  ;;  %v1708_v48 = vand.u32 4294901760, %v8750_v44  ;;  %v1246_v49 = vsub.f32 %v8741_v41, %v1245_v45  ;;  %v248_v22 = vld [vmem:[%s8670_s22 + $0x30] sm:$0xff] }
  0x1c   : > { %v343_v25 = vand.u32 4294901760, %v342_v21  ;;  %v795_v28 = vand.u32 4294901760, %v794_v24  ;;  %v1257_v50 = vsub.f32 %v8744_v42, %v1256_v46  ;;  %v1698_v51 = vsub.f32 %v8747_v43, %v1697_v47  ;;  %v256_v23 = vld [vmem:[%s8664_s19 + $0x30] sm:$0xff]  ;;  %v249_v24 = vld [vmem:[%s8670_s22 + $0x38] sm:$0xff] }
  0x1d   : > { %v1709_v52 = vsub.f32 %v8750_v44, %v1708_v48  ;;  %v1247_v53 = vand.u32 4294901760, %v1246_v49  ;;  %v2076_v61 = vsel %vm266_vm1, %v246_v57, 0  ;;  %v2079_v62 = vsel %vm266_vm1, %v254_v58, 0  ;;  %v259_v58 = vld [vmem:[%s8990_s25 + $0x8] sm:$0xff] }
  0x1e   : > { %7893 = vmatmul.mubr.f32.vlgmr.msra.gmra.mrb[0].mxu0 %v343_v25  ;;  %7923 = vmatmul.mubr.f32.vlgmr.msra.gmra.mrb[0].mxu1 %v795_v28  ;;  %v1258_v54 = vand.u32 4294901760, %v1257_v50  ;;  %v1699_v55 = vand.u32 4294901760, %v1698_v51  ;;  %v2528_v63 = vsel %vm266_vm1, %v247_v59, 0  ;;  %v2531_v1 = vsel %vm266_vm1, %v255_v60, 0  ;;  %v257_v25 = vld [vmem:[%s8664_s19 + $0x38] sm:$0xff] }
  0x1f   : > { %7896 = vmatpush3.xpose.msra.mxu0 %v354_v26  ;;  %7926 = vmatpush3.xpose.msra.mxu1 %v806_v27  ;;  %v1710_v56 = vand.u32 4294901760, %v1709_v52  ;;  %v8814_v2 = vand.u32 4294901760, %v2076_v61  ;;  %v8816_v3 = vand.u32 4294901760, %v2079_v62  ;;  %v8818_v4 = vand.u32 4294901760, %v2528_v63 }
  0x20   : > { %7897 = vmatprep.mubr.msk.f32.mxu0 %vm8613_vm0, %v8612_v0  ;;  %7900 = vmatprep.subr.mxu0 %v8612_v0  ;;  %v8822_v5 = vand.u32 4294901760, %v2531_v1  ;;  %v2980_v26 = vsel %vm266_vm1, %v248_v22, 0  ;;  %v2983_v27 = vsel %vm266_vm1, %v256_v23, 0  ;;  %v3432_v28 = vsel %vm266_vm1, %v249_v24, 0 }
  0x21   : > { %7927 = vmatprep.mubr.msk.f32.mxu1 %vm8613_vm0, %v8612_v0  ;;  %7930 = vmatprep.subr.mxu1 %v8612_v0  ;;  %v8829_v6 = vsub.f32 %v2076_v61, %v8814_v2  ;;  %v8832_v7 = vsub.f32 %v2079_v62, %v8816_v3  ;;  %v3435_v29 = vsel %vm266_vm1, %v257_v25, 0  ;;  %v8902_v30 = vand.u32 4294901760, %v2980_v26 }
  0x22   : > { %v8904_v31 = vand.u32 4294901760, %v2983_v27  ;;  %v8906_v32 = vand.u32 4294901760, %v3432_v28  ;;  %v8910_v33 = vand.u32 4294901760, %v3435_v29  ;;  %v8998_v59 = vand.u32 4294901760, %v259_v58 }
  0x23   : > { %v3052_v34 = vsub.f32 %v2980_v26, %v8902_v30 }
  0x24   : > { %v3063_v35 = vsub.f32 %v2983_v27, %v8904_v31  ;;  %v3504_v36 = vsub.f32 %v3432_v28, %v8906_v32  ;;  %v4486_v25 = vsub.f32 %v259_v58, %v8998_v59 }
  0x26   : > { %7898 = vmatmul.mubr.f32.vlgmr.msra.gmra.mrb[0].mxu0 %v8683_v10  ;;  %7928 = vmatmul.mubr.f32.vlgmr.msra.gmra.mrb[0].mxu1 %v8686_v12 }
  0x27   : > { %7901 = vmatpush3.xpose.msra.mxu0 %v351_v13  ;;  %7931 = vmatpush3.xpose.msra.mxu1 %v803_v14 }
  0x28   : > { %7902 = vmatprep.mubr.msk.f32.mxu0 %vm8613_vm0, %v8612_v0  ;;  %7905 = vmatprep.subr.mxu0 %v8612_v0 }
  0x29   : > { %7932 = vmatprep.mubr.msk.f32.mxu1 %vm8613_vm0, %v8612_v0  ;;  %7935 = vmatprep.subr.mxu1 %v8612_v0 }
  0x2e   : > { %7903 = vmatmul.mubr.f32.vlgmr.msra.gmra.mrb[0].mxu0 %v340_v15  ;;  %7933 = vmatmul.mubr.f32.vlgmr.msra.gmra.mrb[0].mxu1 %v792_v16 }
  0x2f   : > { %7906 = vmatpush3.xpose.msra.mxu0 %v8679_v8  ;;  %7936 = vmatpush3.xpose.msra.mxu1 %v8681_v9 }
  0x30   : > { %7907 = vmatprep.mubr.msk.f32.mxu0 %vm8613_vm0, %v8612_v0  ;;  %7910 = vmatprep.subr.mxu0 %v8612_v0 }
  0x31   : > { %7937 = vmatprep.mubr.msk.f32.mxu1 %vm8613_vm0, %v8612_v0  ;;  %7940 = vmatprep.subr.mxu1 %v8612_v0 }
  0x36   : > { %7908 = vmatmul.mubr.f32.vlgmr.msra.gmra.mrb[0].mxu0 %v341_v17  ;;  %7938 = vmatmul.mubr.f32.vlgmr.msra.gmra.mrb[0].mxu1 %v793_v20 }
  0x37   : > { %7911 = vmatpush3.xpose.msra.mxu0 %v352_v18  ;;  %7941 = vmatpush3.xpose.msra.mxu1 %v804_v19 }
  0x38   : > { %7912 = vmatprep.mubr.msk.f32.mxu0 %vm8613_vm0, %v8612_v0  ;;  %7915 = vmatprep.subr.mxu0 %v8612_v0 }
  0x39   : > { %7942 = vmatprep.mubr.msk.f32.mxu1 %vm8613_vm0, %v8612_v0  ;;  %7945 = vmatprep.subr.mxu1 %v8612_v0 }
  0x3e   : > { %7913 = vmatmul.mubr.f32.vlgmr.msra.gmra.mrb[0].mxu0 %v8683_v10  ;;  %7943 = vmatmul.mubr.f32.vlgmr.msra.gmra.mrb[0].mxu1 %v8686_v12 }
  0x3f   : > { %7916 = vmatpush3.xpose.msra.mxu0 %v8679_v8  ;;  %7946 = vmatpush3.xpose.msra.mxu1 %v8681_v9  ;;  %v8835_v8 = vsub.f32 %v2528_v63, %v8818_v4  ;;  %v8838_v9 = vsub.f32 %v2531_v1, %v8822_v5 }
  0x40   : > { %7917 = vmatprep.mubr.msk.f32.mxu0 %vm8613_vm0, %v8612_v0  ;;  %7947 = vmatprep.mubr.msk.f32.mxu1 %vm8613_vm0, %v8612_v0 }
  0x41   : > { %7950 = vmatprep.subr.mxu0 %v8612_v0  ;;  %7980 = vmatprep.subr.mxu1 %v8612_v0  ;;  %v2601_v11 = vand.u32 4294901760, %v8835_v8  ;;  %v2612_v13 = vand.u32 4294901760, %v8838_v9 }
  0x43   : > { %v2602_v15 = vsub.f32 %v8835_v8, %v2601_v11  ;;  %v2613_v17 = vsub.f32 %v8838_v9, %v2612_v13 }
  0x45   : > { %v2603_v19 = vand.u32 4294901760, %v2602_v15  ;;  %v2614_v21 = vand.u32 4294901760, %v2613_v17 }
  0x46   : > { %7918 = vmatmul.mubr.f32.vlgmr.msra.gmra.mrb[0].mxu0 %v8683_v10  ;;  %7948 = vmatmul.mubr.f32.vlgmr.msra.gmra.mrb[0].mxu1 %v8686_v12  ;;  %v2149_v10 = vand.u32 4294901760, %v8829_v6  ;;  %v2160_v12 = vand.u32 4294901760, %v8832_v7 }
  0x47   : > { %7951 = vmatpush3.xpose.msra.mxu0 %v8728_v38  ;;  %7981 = vmatpush3.xpose.msra.mxu1 %v8734_v40 }
  0x48   : > { %7952 = vmatprep.mubr.msk.f32.mxu0 %vm8613_vm0, %v8612_v0  ;;  %7955 = vmatprep.subr.mxu0 %v8612_v0  ;;  %v2150_v14 = vsub.f32 %v8829_v6, %v2149_v10  ;;  %v2161_v16 = vsub.f32 %v8832_v7, %v2160_v12 }
  0x49   : > { %7982 = vmatprep.mubr.msk.f32.mxu1 %vm8613_vm0, %v8612_v0  ;;  %7985 = vmatprep.subr.mxu1 %v8612_v0 }
  0x4a   : > { %7953 = vmatmul.mubr.f32.vlgmr.msra.gmra.mrb[2].mxu0 %v1247_v53  ;;  %7983 = vmatmul.mubr.f32.vlgmr.msra.gmra.mrb[2].mxu1 %v1699_v55  ;;  %v2151_v18 = vand.u32 4294901760, %v2150_v14  ;;  %v2162_v20 = vand.u32 4294901760, %v2161_v16 }
  0x4b   : > { %7956 = vmatpush3.xpose.msra.mxu0 %v1258_v54  ;;  %7986 = vmatpush3.xpose.msra.mxu1 %v1710_v56  ;;  %v258_v56 = vld [vmem:[%s8990_s25] sm:$0xff] }
  0x4c   : > { %7957 = vmatprep.mubr.msk.f32.mxu0 %vm8613_vm0, %v8612_v0  ;;  %7960 = vmatprep.subr.mxu0 %v8612_v0  ;;  %v8993_v57 = vand.u32 4294901760, %v258_v56 }
  0x4d   : > { %7987 = vmatprep.mubr.msk.f32.mxu1 %vm8613_vm0, %v8612_v0  ;;  %7990 = vmatprep.subr.mxu1 %v8612_v0 }
  0x52   : > { %7958 = vmatmul.mubr.f32.vlgmr.msra.gmra.mrb[2].mxu0 %v8726_v37  ;;  %7988 = vmatmul.mubr.f32.vlgmr.msra.gmra.mrb[2].mxu1 %v8730_v39 }
  0x53   : > { %7961 = vmatpush3.xpose.msra.mxu0 %v8744_v42  ;;  %7991 = vmatpush3.xpose.msra.mxu1 %v8750_v44 }
  0x54   : > { %7962 = vmatprep.mubr.msk.f32.mxu0 %vm8613_vm0, %v8612_v0  ;;  %7965 = vmatprep.subr.mxu0 %v8612_v0 }
  0x55   : > { %7992 = vmatprep.mubr.msk.f32.mxu1 %vm8613_vm0, %v8612_v0  ;;  %7995 = vmatprep.subr.mxu1 %v8612_v0 }
  0x5a   : > { %7963 = vmatmul.mubr.f32.vlgmr.msra.gmra.mrb[2].mxu0 %v8741_v41  ;;  %7993 = vmatmul.mubr.f32.vlgmr.msra.gmra.mrb[2].mxu1 %v8747_v43 }
  0x5b   : > { %7966 = vmatpush3.xpose.msra.mxu0 %v8728_v38  ;;  %7996 = vmatpush3.xpose.msra.mxu1 %v8734_v40 }
  0x5c   : > { %7967 = vmatprep.mubr.msk.f32.mxu0 %vm8613_vm0, %v8612_v0  ;;  %7970 = vmatprep.subr.mxu0 %v8612_v0 }
  0x5d   : > { %7997 = vmatprep.mubr.msk.f32.mxu1 %vm8613_vm0, %v8612_v0  ;;  %8000 = vmatprep.subr.mxu1 %v8612_v0 }
  0x62   : > { %7968 = vmatmul.mubr.f32.vlgmr.msra.gmra.mrb[2].mxu0 %v1245_v45  ;;  %7998 = vmatmul.mubr.f32.vlgmr.msra.gmra.mrb[2].mxu1 %v1697_v47 }
  0x63   : > { %7971 = vmatpush3.xpose.msra.mxu0 %v1256_v46  ;;  %8001 = vmatpush3.xpose.msra.mxu1 %v1708_v48 }
  0x64   : > { %7972 = vmatprep.mubr.msk.f32.mxu0 %vm8613_vm0, %v8612_v0  ;;  %7975 = vmatprep.subr.mxu0 %v8612_v0 }
  0x65   : > { %8002 = vmatprep.mubr.msk.f32.mxu1 %vm8613_vm0, %v8612_v0  ;;  %8005 = vmatprep.subr.mxu1 %v8612_v0 }
  0x6a   : > { %7973 = vmatmul.mubr.f32.vlgmr.msra.gmra.mrb[2].mxu0 %v8726_v37  ;;  %8003 = vmatmul.mubr.f32.vlgmr.msra.gmra.mrb[2].mxu1 %v8730_v39 }
  0x6b   : > { %7976 = vmatpush3.xpose.msra.mxu0 %v8728_v38  ;;  %8006 = vmatpush3.xpose.msra.mxu1 %v8734_v40  ;;  %v3053_v38 = vand.u32 4294901760, %v3052_v34  ;;  %v3064_v40 = vand.u32 4294901760, %v3063_v35 }
  0x6c   : > { %7977 = vmatprep.mubr.msk.f32.mxu0 %vm8613_vm0, %v8612_v0  ;;  %8007 = vmatprep.mubr.msk.f32.mxu1 %vm8613_vm0, %v8612_v0 }
  0x6d   : > { %8010 = vmatprep.subr.mxu0 %v8612_v0  ;;  %8040 = vmatprep.subr.mxu1 %v8612_v0  ;;  %v3054_v42 = vsub.f32 %v3052_v34, %v3053_v38  ;;  %v3065_v44 = vsub.f32 %v3063_v35, %v3064_v40 }
  0x6f   : > { %v3055_v46 = vand.u32 4294901760, %v3054_v42  ;;  %v3066_v48 = vand.u32 4294901760, %v3065_v44 }
  0x72   : > { %7978 = vmatmul.mubr.f32.vlgmr.msra.gmra.mrb[2].mxu0 %v8726_v37  ;;  %8008 = vmatmul.mubr.f32.vlgmr.msra.gmra.mrb[2].mxu1 %v8730_v39  ;;  %v3515_v37 = vsub.f32 %v3435_v29, %v8910_v33  ;;  %v3505_v39 = vand.u32 4294901760, %v3504_v36 }
  0x73   : > { %8011 = vmatpush3.xpose.msra.mxu0 %v8816_v3  ;;  %8041 = vmatpush3.xpose.msra.mxu1 %v8822_v5 }
  0x74   : > { %8012 = vmatprep.mubr.msk.f32.mxu0 %vm8613_vm0, %v8612_v0  ;;  %8042 = vmatprep.mubr.msk.f32.mxu1 %vm8613_vm0, %v8612_v0  ;;  %v3516_v41 = vand.u32 4294901760, %v3515_v37  ;;  %v3506_v43 = vsub.f32 %v3504_v36, %v3505_v39 }
  0x75   : > { %8015 = vmatprep.subr.mxu0 %v8612_v0  ;;  %8045 = vmatprep.subr.mxu1 %v8612_v0 }
  0x76   : > { %8013 = vmatmul.mubr.f32.vlgmr.msra.gmra.mrb[4].mxu0 %v2151_v18  ;;  %8043 = vmatmul.mubr.f32.vlgmr.msra.gmra.mrb[4].mxu1 %v2603_v19  ;;  %v3517_v45 = vsub.f32 %v3515_v37, %v3516_v41  ;;  %v3507_v47 = vand.u32 4294901760, %v3506_v43 }
  0x77   : > { %8016 = vmatpush3.xpose.msra.mxu0 %v2162_v20  ;;  %8046 = vmatpush3.xpose.msra.mxu1 %v2614_v21  ;;  %v4037_v21 = vsub.f32 %v258_v56, %v8993_v57 }
  0x78   : > { %8017 = vmatprep.mubr.msk.f32.mxu0 %vm8613_vm0, %v8612_v0  ;;  %8047 = vmatprep.mubr.msk.f32.mxu1 %vm8613_vm0, %v8612_v0  ;;  %v3518_v49 = vand.u32 4294901760, %v3517_v45 }
  0x79   : > { %8020 = vmatprep.subr.mxu0 %v8612_v0  ;;  %8050 = vmatprep.subr.mxu1 %v8612_v0  ;;  %v4038_v26 = vand.u32 4294901760, %v4037_v21 }
  0x7e   : > { %8018 = vmatmul.mubr.f32.vlgmr.msra.gmra.mrb[4].mxu0 %v8814_v2  ;;  %8048 = vmatmul.mubr.f32.vlgmr.msra.gmra.mrb[4].mxu1 %v8818_v4 }
  0x7f   : > { %8021 = vmatpush3.xpose.msra.mxu0 %v8832_v7  ;;  %8051 = vmatpush3.xpose.msra.mxu1 %v8838_v9 }
  0x80   : > { %8022 = vmatprep.mubr.msk.f32.mxu0 %vm8613_vm0, %v8612_v0  ;;  %8052 = vmatprep.mubr.msk.f32.mxu1 %vm8613_vm0, %v8612_v0 }
  0x81   : > { %8025 = vmatprep.subr.mxu0 %v8612_v0  ;;  %8055 = vmatprep.subr.mxu1 %v8612_v0 }
  0x86   : > { %8023 = vmatmul.mubr.f32.vlgmr.msra.gmra.mrb[4].mxu0 %v8829_v6  ;;  %8053 = vmatmul.mubr.f32.vlgmr.msra.gmra.mrb[4].mxu1 %v8835_v8 }
  0x87   : > { %8026 = vmatpush3.xpose.msra.mxu0 %v8816_v3  ;;  %8056 = vmatpush3.xpose.msra.mxu1 %v8822_v5 }
  0x88   : > { %8027 = vmatprep.mubr.msk.f32.mxu0 %vm8613_vm0, %v8612_v0  ;;  %8057 = vmatprep.mubr.msk.f32.mxu1 %vm8613_vm0, %v8612_v0 }
  0x89   : > { %8030 = vmatprep.subr.mxu0 %v8612_v0  ;;  %8060 = vmatprep.subr.mxu1 %v8612_v0 }
  0x8e   : > { %8028 = vmatmul.mubr.f32.vlgmr.msra.gmra.mrb[4].mxu0 %v2149_v10  ;;  %8058 = vmatmul.mubr.f32.vlgmr.msra.gmra.mrb[4].mxu1 %v2601_v11 }
  0x8f   : > { %8031 = vmatpush3.xpose.msra.mxu0 %v2160_v12  ;;  %8061 = vmatpush3.xpose.msra.mxu1 %v2612_v13 }
  0x90   : > { %8032 = vmatprep.mubr.msk.f32.mxu0 %vm8613_vm0, %v8612_v0  ;;  %8062 = vmatprep.mubr.msk.f32.mxu1 %vm8613_vm0, %v8612_v0 }
  0x91   : > { %8035 = vmatprep.subr.mxu0 %v8612_v0  ;;  %8065 = vmatprep.subr.mxu1 %v8612_v0 }
  0x96   : > { %8033 = vmatmul.mubr.f32.vlgmr.msra.gmra.mrb[4].mxu0 %v8814_v2  ;;  %8063 = vmatmul.mubr.f32.vlgmr.msra.gmra.mrb[4].mxu1 %v8818_v4 }
  0x97   : > { %8036 = vmatpush3.xpose.msra.mxu0 %v8816_v3  ;;  %8066 = vmatpush3.xpose.msra.mxu1 %v8822_v5 }
  0x98   : > { %8037 = vmatprep.mubr.msk.f32.mxu0 %vm8613_vm0, %v8612_v0  ;;  %8067 = vmatprep.mubr.msk.f32.mxu1 %vm8613_vm0, %v8612_v0 }
  0x99   : > { %8070 = vmatprep.subr.mxu0 %v8612_v0  ;;  %8100 = vmatprep.subr.mxu1 %v8612_v0 }
  0x9e   : > { %8038 = vmatmul.mubr.f32.vlgmr.msra.gmra.mrb[4].mxu0 %v8814_v2  ;;  %8068 = vmatmul.mubr.f32.vlgmr.msra.gmra.mrb[4].mxu1 %v8818_v4 }
  0x9f   : > { %8071 = vmatpush3.xpose.msra.mxu0 %v8904_v31  ;;  %8101 = vmatpush3.xpose.msra.mxu1 %v8910_v33 }
  0xa0   : > { %8072 = vmatprep.mubr.msk.f32.mxu0 %vm8613_vm0, %v8612_v0  ;;  %8102 = vmatprep.mubr.msk.f32.mxu1 %vm8613_vm0, %v8612_v0 }
  0xa1   : > { %8075 = vmatprep.subr.mxu0 %v8612_v0  ;;  %8105 = vmatprep.subr.mxu1 %v8612_v0 }
  0xa2   : > { %8073 = vmatmul.mubr.f32.vlgmr.msra.gmra.mrb[6].mxu0 %v3055_v46  ;;  %8103 = vmatmul.mubr.f32.vlgmr.msra.gmra.mrb[6].mxu1 %v3507_v47 }
  0xa3   : > { %8076 = vmatpush3.xpose.msra.mxu0 %v3066_v48  ;;  %8106 = vmatpush3.xpose.msra.mxu1 %v3518_v49 }
  0xa4   : > { %8077 = vmatprep.mubr.msk.f32.mxu0 %vm8613_vm0, %v8612_v0  ;;  %8107 = vmatprep.mubr.msk.f32.mxu1 %vm8613_vm0, %v8612_v0 }
  0xa5   : > { %8080 = vmatprep.subr.mxu0 %v8612_v0  ;;  %8110 = vmatprep.subr.mxu1 %v8612_v0 }
  0xaa   : > { %8078 = vmatmul.mubr.f32.vlgmr.msra.gmra.mrb[6].mxu0 %v8902_v30  ;;  %8108 = vmatmul.mubr.f32.vlgmr.msra.gmra.mrb[6].mxu1 %v8906_v32 }
  0xab   : > { %8081 = vmatpush3.xpose.msra.mxu0 %v3063_v35  ;;  %8111 = vmatpush3.xpose.msra.mxu1 %v3515_v37 }
  0xac   : > { %8082 = vmatprep.mubr.msk.f32.mxu0 %vm8613_vm0, %v8612_v0  ;;  %8112 = vmatprep.mubr.msk.f32.mxu1 %vm8613_vm0, %v8612_v0 }
  0xad   : > { %8085 = vmatprep.subr.mxu0 %v8612_v0  ;;  %8115 = vmatprep.subr.mxu1 %v8612_v0 }
  0xb2   : > { %8083 = vmatmul.mubr.f32.vlgmr.msra.gmra.mrb[6].mxu0 %v3052_v34  ;;  %8113 = vmatmul.mubr.f32.vlgmr.msra.gmra.mrb[6].mxu1 %v3504_v36 }
  0xb3   : > { %8086 = vmatpush3.xpose.msra.mxu0 %v8904_v31  ;;  %8116 = vmatpush3.xpose.msra.mxu1 %v8910_v33 }
  0xb4   : > { %8087 = vmatprep.mubr.msk.f32.mxu0 %vm8613_vm0, %v8612_v0  ;;  %8117 = vmatprep.mubr.msk.f32.mxu1 %vm8613_vm0, %v8612_v0 }
  0xb5   : > { %8090 = vmatprep.subr.mxu0 %v8612_v0  ;;  %8120 = vmatprep.subr.mxu1 %v8612_v0 }
  0xba   : > { %8088 = vmatmul.mubr.f32.vlgmr.msra.gmra.mrb[6].mxu0 %v3053_v38  ;;  %8118 = vmatmul.mubr.f32.vlgmr.msra.gmra.mrb[6].mxu1 %v3505_v39 }
  0xbb   : > { %8091 = vmatpush3.xpose.msra.mxu0 %v3064_v40  ;;  %8121 = vmatpush3.xpose.msra.mxu1 %v3516_v41 }
  0xbc   : > { %8092 = vmatprep.mubr.msk.f32.mxu0 %vm8613_vm0, %v8612_v0  ;;  %8122 = vmatprep.mubr.msk.f32.mxu1 %vm8613_vm0, %v8612_v0 }
  0xbd   : > { %8095 = vmatprep.subr.mxu0 %v8612_v0  ;;  %8125 = vmatprep.subr.mxu1 %v8612_v0 }
  0xc2   : > { %8093 = vmatmul.mubr.f32.vlgmr.msra.gmra.mrb[6].mxu0 %v8902_v30  ;;  %8123 = vmatmul.mubr.f32.vlgmr.msra.gmra.mrb[6].mxu1 %v8906_v32 }
  0xc3   : > { %8096 = vmatpush3.xpose.msra.mxu0 %v8904_v31  ;;  %8126 = vmatpush3.xpose.msra.mxu1 %v8910_v33  ;;  %v4487_v33 = vand.u32 4294901760, %v4486_v25 }
  0xc4   : > { %8097 = vmatprep.mubr.msk.f32.mxu0 %vm8613_vm0, %v8612_v0  ;;  %8127 = vmatprep.mubr.msk.f32.mxu1 %vm8613_vm0, %v8612_v0 }
  0xc5   : > { %8130 = vmatprep.subr.mxu0 %v8612_v0  ;;  %8160 = vmatprep.subr.mxu1 %v8612_v0  ;;  %v4488_v39 = vsub.f32 %v4486_v25, %v4487_v33 }
  0xc7   : > { %v4489_v43 = vand.u32 4294901760, %v4488_v39 }
  0xca   : > { %8098 = vmatmul.mubr.f32.vlgmr.msra.gmra.mrb[6].mxu0 %v8902_v30  ;;  %8128 = vmatmul.mubr.f32.vlgmr.msra.gmra.mrb[6].mxu1 %v8906_v32  ;;  %v4039_v32 = vsub.f32 %v4037_v21, %v4038_v26 }
  0xcb   : > { %8132 = vmatprep.mubr.msk.f32.mxu0 %vm8613_vm0, %v8612_v0  ;;  %8162 = vmatprep.mubr.msk.f32.mxu1 %vm8613_vm0, %v8612_v0 }
  0xcc   : > { %8131 = vmatpush3.msra.mxu0 %v8993_v57  ;;  %8161 = vmatpush3.msra.mxu1 %v8998_v59  ;;  %v4040_v38 = vand.u32 4294901760, %v4039_v32 }
  0xcd   : > { %8135 = vmatprep.subr.mxu0 %v8612_v0  ;;  %8165 = vmatprep.subr.mxu1 %v8612_v0 }
 0x119   : > { %v715_v50 = vpop.f32.mrb[0].mxu0  ;;  %v1167_v51 = vpop.f32.mrb[0].mxu1 }
 0x11a   : > { %v7919_v52 = vpop.f32.mrb[1].mxu0  ;;  %v3884_v53 = vsel %vm3883_vm2, %v715_v50, -inf  ;;  %v7949_v54 = vpop.f32.mrb[1].mxu1  ;;  %v3887_v55 = vsel %vm3883_vm2, %v1167_v51, -inf }
 0x11b   : > { %3885 = vmax.xlane.f32.xlu0 %v3884_v53  ;;  %v261_v53 = vld [vmem:[%s8990_s25 + $0x18] sm:$0xff] }
 0x11c   : > { %v9071_v54 = vand.u32 4294901760, %v261_v53 }
 0x11f   : > { %3888 = vmax.xlane.f32.xlu0 %v3887_v55 }
 0x145   : > { %v9000_v60 = vpop.f32.mrb[2].mxu0  ;;  %v9002_v61 = vpop.f32.mrb[2].mxu1 }
 0x146   : > { %v7979_v62 = vpop.f32.mrb[3].mxu0  ;;  %v3890_v63 = vsel %vm3883_vm2, %v9000_v60, -inf  ;;  %v8009_v1 = vpop.f32.mrb[3].mxu1  ;;  %v3893_v2 = vsel %vm3883_vm2, %v9002_v61, -inf }
 0x147   : > { %3891 = vmax.xlane.f32.xlu1 %v3890_v63 }
 0x14b   : > { %3894 = vmax.xlane.f32.xlu1 %v3893_v2 }
 0x171   : > { %v9010_v3 = vpop.f32.mrb[4].mxu0  ;;  %v9012_v4 = vpop.f32.mrb[4].mxu1 }
 0x172   : > { %v8039_v5 = vpop.f32.mrb[5].mxu0  ;;  %v3896_v6 = vsel %vm3883_vm2, %v9010_v3, -inf  ;;  %v8069_v7 = vpop.f32.mrb[5].mxu1  ;;  %v3899_v8 = vsel %vm3883_vm2, %v9012_v4, -inf }
 0x173   : > { %3897 = vmax.xlane.f32.xlu0 %v3896_v6  ;;  %3900 = vmax.xlane.f32.xlu1 %v3899_v8 }
 0x19d   : > { %v9018_v9 = vpop.f32.mrb[6].mxu0  ;;  %v9020_v10 = vpop.f32.mrb[6].mxu1 }
 0x19e   : > { %v8099_v11 = vpop.f32.mrb[7].mxu0  ;;  %v3902_v12 = vsel %vm3883_vm2, %v9018_v9, -inf  ;;  %v8129_v13 = vpop.f32.mrb[7].mxu1  ;;  %v3905_v14 = vsel %vm3883_vm2, %v9020_v10, -inf }
 0x19f   : > { %3903 = vmax.xlane.f32.xlu0 %v3902_v12  ;;  %3906 = vmax.xlane.f32.xlu1 %v3905_v14 }
 0x1a8   : > { %v3886_v15 = vpop.xlane.xlu0 %3885 }
 0x1a9   : > { %v3908_v16 = vsub.f32 %v715_v50, %v3886_v15  ;;  %v260_v50 = vld [vmem:[%s8990_s25 + $0x10] sm:$0xff] }
 0x1aa   : > { %v9066_v52 = vand.u32 4294901760, %v260_v50 }
 0x1ab   : > { %v3916_v17 = vmul.f32 1.442695, %v3908_v16 }
 0x1ac   : > { %v3889_v18 = vpop.xlane.xlu0 %3888  ;;  %v9075_v55 = vsub.f32 %v260_v50, %v9066_v52 }
 0x1ad   : > { %8556 = vpow2.f32 %v3916_v17  ;;  %v3909_v19 = vsub.f32 %v1167_v51, %v3889_v18 }
 0x1ae   : > { %v4936_v63 = vand.u32 4294901760, %v9075_v55 }
 0x1af   : > { %v3918_v20 = vmul.f32 1.442695, %v3909_v19 }
 0x1b0   : > { %v4937_v11 = vsub.f32 %v9075_v55, %v4936_v63 }
 0x1b1   : > { %8558 = vpow2.f32 %v3918_v20 }
 0x1b2   : > { %v4938_v15 = vand.u32 4294901760, %v4937_v11 }
 0x1b7   : > { %v8557_v22 = vpop.eup %8556 }
 0x1b8   : > { %v3957_v23 = vsel %vm3883_vm2, %v8557_v22, 0  ;;  %v3932_v24 = vsel %vm3883_vm2, %v8557_v22, 0.0 }
 0x1b9   : > { %v9030_v27 = vand.u32 4294901760, %v3957_v23  ;;  %3933 = vadd.xlane.f32.xlu0 %v3932_v24 }
 0x1bb   : > { %v8559_v28 = vpop.eup %8558  ;;  %v4026_v29 = vsub.f32 %v3957_v23, %v9030_v27 }
 0x1bc   : > { %v4406_v30 = vsel %vm3883_vm2, %v8559_v28, 0  ;;  %v3935_v31 = vsel %vm3883_vm2, %v8559_v28, 0.0 }
 0x1bd   : > { %v9035_v34 = vand.u32 4294901760, %v4406_v30  ;;  %3936 = vadd.xlane.f32.xlu1 %v3935_v31  ;;  %v4027_v35 = vand.u32 4294901760, %v4026_v29 }
 0x1bf   : > { %v4028_v36 = vsub.f32 %v4026_v29, %v4027_v35  ;;  %v4475_v37 = vsub.f32 %v4406_v30, %v9035_v34 }
 0x1c1   : > { %v4029_v40 = vand.u32 4294901760, %v4028_v36  ;;  %v4476_v41 = vand.u32 4294901760, %v4475_v37 }
 0x1c3   : > { %8133 = vmatmul.mubr.f32.vlgmr.msra.gmra.mrb[8].mxu0 %v4029_v40  ;;  %v4477_v42 = vsub.f32 %v4475_v37, %v4476_v41 }
 0x1c4   : > { %8136 = vmatpush3.msra.mxu0 %v4040_v38  ;;  %8137 = vmatprep.mubr.msk.f32.mxu0 %vm8613_vm0, %v8612_v0 }
 0x1c5   : > { %v4478_v44 = vand.u32 4294901760, %v4477_v42  ;;  %8140 = vmatprep.subr.mxu0 %v8612_v0 }
 0x1c7   : > { %8163 = vmatmul.mubr.f32.vlgmr.msra.gmra.mrb[8].mxu1 %v4478_v44 }
 0x1c8   : > { %8166 = vmatpush3.msra.mxu1 %v4489_v43  ;;  %8167 = vmatprep.mubr.msk.f32.mxu1 %vm8613_vm0, %v8612_v0 }
 0x1c9   : > { %8170 = vmatprep.subr.mxu1 %v8612_v0 }
 0x1cb   : > { %8138 = vmatmul.mubr.f32.vlgmr.msra.gmra.mrb[8].mxu0 %v9030_v27 }
 0x1cc   : > { %8141 = vmatpush3.msra.mxu0 %v4037_v21  ;;  %8142 = vmatprep.mubr.msk.f32.mxu0 %vm8613_vm0, %v8612_v0 }
 0x1cd   : > { %8145 = vmatprep.subr.mxu0 %v8612_v0 }
 0x1cf   : > { %8168 = vmatmul.mubr.f32.vlgmr.msra.gmra.mrb[8].mxu1 %v9035_v34 }
 0x1d0   : > { %8171 = vmatpush3.msra.mxu1 %v4486_v25  ;;  %8172 = vmatprep.mubr.msk.f32.mxu1 %vm8613_vm0, %v8612_v0 }
 0x1d1   : > { %8175 = vmatprep.subr.mxu1 %v8612_v0 }
 0x1d3   : > { %8143 = vmatmul.mubr.f32.vlgmr.msra.gmra.mrb[8].mxu0 %v4026_v29 }
 0x1d4   : > { %v3892_v45 = vpop.xlane.xlu1 %3891  ;;  %8146 = vmatpush3.msra.mxu0 %v8993_v57  ;;  %8147 = vmatprep.mubr.msk.f32.mxu0 %vm8613_vm0, %v8612_v0 }
 0x1d5   : > { %v3910_v46 = vsub.f32 %v9000_v60, %v3892_v45  ;;  %8150 = vmatprep.subr.mxu0 %v8612_v0 }
 0x1d7   : > { %v3920_v47 = vmul.f32 1.442695, %v3910_v46  ;;  %8173 = vmatmul.mubr.f32.vlgmr.msra.gmra.mrb[8].mxu1 %v4475_v37 }
 0x1d8   : > { %8176 = vmatpush3.msra.mxu1 %v8998_v59  ;;  %v3895_v48 = vpop.xlane.xlu1 %3894  ;;  %8177 = vmatprep.mubr.msk.f32.mxu1 %vm8613_vm0, %v8612_v0 }
 0x1d9   : > { %8560 = vpow2.f32 %v3920_v47  ;;  %v3911_v49 = vsub.f32 %v9002_v61, %v3895_v48  ;;  %8180 = vmatprep.subr.mxu1 %v8612_v0  ;;  %v9084_v61 = vsub.f32 %v261_v53, %v9071_v54 }
 0x1db   : > { %v3922_v51 = vmul.f32 1.442695, %v3911_v49  ;;  %8148 = vmatmul.mubr.f32.vlgmr.msra.gmra.mrb[8].mxu0 %v4027_v35  ;;  %v5385_v6 = vand.u32 4294901760, %v9084_v61 }
 0x1dc   : > { %8151 = vmatpush3.msra.mxu0 %v4038_v26  ;;  %8152 = vmatprep.mubr.msk.f32.mxu0 %vm8613_vm0, %v8612_v0  ;;  %v262_v26 = vld [vmem:[%s8990_s25 + $0x20] sm:$0xff] }
 0x1dd   : > { %8562 = vpow2.f32 %v3922_v51  ;;  %8155 = vmatprep.subr.mxu0 %v8612_v0  ;;  %v5386_v13 = vsub.f32 %v9084_v61, %v5385_v6 }
 0x1df   : > { %8178 = vmatmul.mubr.f32.vlgmr.msra.gmra.mrb[8].mxu1 %v4476_v41  ;;  %v5387_v18 = vand.u32 4294901760, %v5386_v13 }
 0x1e0   : > { %8181 = vmatpush3.msra.mxu1 %v4487_v33  ;;  %8182 = vmatprep.mubr.msk.f32.mxu1 %vm8613_vm0, %v8612_v0 }
 0x1e1   : > { %8185 = vmatprep.subr.mxu1 %v8612_v0 }
 0x1e3   : > { %v8561_v56 = vpop.eup %8560  ;;  %8153 = vmatmul.mubr.f32.vlgmr.msra.gmra.mrb[8].mxu0 %v9030_v27 }
 0x1e4   : > { %v4855_v58 = vsel %vm3883_vm2, %v8561_v56, 0  ;;  %v3938_v60 = vsel %vm3883_vm2, %v8561_v56, 0.0  ;;  %8156 = vmatpush3.msra.mxu0 %v8993_v57  ;;  %8157 = vmatprep.mubr.msk.f32.mxu0 %vm8613_vm0, %v8612_v0 }
 0x1e5   : > { %v9086_v62 = vand.u32 4294901760, %v4855_v58  ;;  %3939 = vadd.xlane.f32.xlu0 %v3938_v60  ;;  %8190 = vmatprep.subr.mxu0 %v8612_v0  ;;  %v264_v60 = vld [vmem:[%s8990_s25 + $0x30] sm:$0xff] }
 0x1e7   : > { %v8563_v1 = vpop.eup %8562  ;;  %8183 = vmatmul.mubr.f32.vlgmr.msra.gmra.mrb[8].mxu1 %v9035_v34  ;;  %v4924_v2 = vsub.f32 %v4855_v58, %v9086_v62 }
 0x1e8   : > { %v5304_v57 = vsel %vm3883_vm2, %v8563_v1, 0  ;;  %8186 = vmatpush3.msra.mxu1 %v8998_v59  ;;  %v3941_v5 = vsel %vm3883_vm2, %v8563_v1, 0.0  ;;  %8187 = vmatprep.mubr.msk.f32.mxu1 %vm8613_vm0, %v8612_v0 }
 0x1e9   : > { %v9098_v7 = vand.u32 4294901760, %v5304_v57  ;;  %3942 = vadd.xlane.f32.xlu1 %v3941_v5  ;;  %8220 = vmatprep.subr.mxu1 %v8612_v0  ;;  %v4925_v8 = vand.u32 4294901760, %v4924_v2 }
 0x1eb   : > { %8158 = vmatmul.mubr.f32.vlgmr.msra.gmra.mrb[8].mxu0 %v9030_v27  ;;  %v4926_v59 = vsub.f32 %v4924_v2, %v4925_v8  ;;  %v5373_v12 = vsub.f32 %v5304_v57, %v9098_v7 }
 0x1ec   : > { %8191 = vmatpush3.msra.mxu0 %v9066_v52  ;;  %8192 = vmatprep.mubr.msk.f32.mxu0 %vm8613_vm0, %v8612_v0 }
 0x1ed   : > { %v4927_v14 = vand.u32 4294901760, %v4926_v59  ;;  %8195 = vmatprep.subr.mxu0 %v8612_v0  ;;  %v5374_v16 = vand.u32 4294901760, %v5373_v12 }
 0x1ef   : > { %8188 = vmatmul.mubr.f32.vlgmr.msra.gmra.mrb[8].mxu1 %v9035_v34  ;;  %8193 = vmatmul.mubr.f32.vlgmr.msra.gmra.mrb[10].mxu0 %v4927_v14  ;;  %v5375_v17 = vsub.f32 %v5373_v12, %v5374_v16 }
 0x1f0   : > { %8221 = vmatpush3.msra.mxu1 %v9071_v54  ;;  %8222 = vmatprep.mubr.msk.f32.mxu1 %vm8613_vm0, %v8612_v0 }
 0x1f1   : > { %8225 = vmatprep.subr.mxu1 %v8612_v0  ;;  %8196 = vmatpush3.msra.mxu0 %v4938_v15  ;;  %v5376_v19 = vand.u32 4294901760, %v5375_v17 }
 0x1f2   : > { %8197 = vmatprep.mubr.msk.f32.mxu0 %vm8613_vm0, %v8612_v0  ;;  %8200 = vmatprep.subr.mxu0 %v8612_v0 }
 0x1f3   : > { %8223 = vmatmul.mubr.f32.vlgmr.msra.gmra.mrb[10].mxu1 %v5376_v19 }
 0x1f4   : > { %8226 = vmatpush3.msra.mxu1 %v5387_v18  ;;  %8227 = vmatprep.mubr.msk.f32.mxu1 %vm8613_vm0, %v8612_v0 }
 0x1f5   : > { %8230 = vmatprep.subr.mxu1 %v8612_v0 }
 0x1f7   : > { %8198 = vmatmul.mubr.f32.vlgmr.msra.gmra.mrb[10].mxu0 %v9086_v62 }
 0x1f8   : > { %8201 = vmatpush3.msra.mxu0 %v9075_v55  ;;  %8202 = vmatprep.mubr.msk.f32.mxu0 %vm8613_vm0, %v8612_v0 }
 0x1f9   : > { %8205 = vmatprep.subr.mxu0 %v8612_v0 }
 0x1fb   : > { %8228 = vmatmul.mubr.f32.vlgmr.msra.gmra.mrb[10].mxu1 %v9098_v7 }
 0x1fc   : > { %8231 = vmatpush3.msra.mxu1 %v9084_v61  ;;  %8232 = vmatprep.mubr.msk.f32.mxu1 %vm8613_vm0, %v8612_v0 }
 0x1fd   : > { %8235 = vmatprep.subr.mxu1 %v8612_v0 }
 0x1ff   : > { %8203 = vmatmul.mubr.f32.vlgmr.msra.gmra.mrb[10].mxu0 %v4924_v2 }
 0x200   : > { %v3898_v20 = vpop.xlane.xlu0 %3897  ;;  %8206 = vmatpush3.msra.mxu0 %v9066_v52  ;;  %8207 = vmatprep.mubr.msk.f32.mxu0 %vm8613_vm0, %v8612_v0  ;;  %v3901_v21 = vpop.xlane.xlu1 %3900 }
 0x201   : > { %v3912_v22 = vsub.f32 %v9010_v3, %v3898_v20  ;;  %8210 = vmatprep.subr.mxu0 %v8612_v0  ;;  %v3913_v23 = vsub.f32 %v9012_v4, %v3901_v21  ;;  %v9148_v3 = vand.u32 4294901760, %v262_v26  ;;  %v263_v4 = vld [vmem:[%s8990_s25 + $0x28] sm:$0xff] }
 0x202   : > { %v9153_v27 = vand.u32 4294901760, %v263_v4 }
 0x203   : > { %v3924_v24 = vmul.f32 1.442695, %v3912_v22  ;;  %8233 = vmatmul.mubr.f32.vlgmr.msra.gmra.mrb[10].mxu1 %v5373_v12  ;;  %v3926_v25 = vmul.f32 1.442695, %v3913_v23  ;;  %v9157_v28 = vsub.f32 %v262_v26, %v9148_v3 }
 0x204   : > { %8236 = vmatpush3.msra.mxu1 %v9071_v54  ;;  %8237 = vmatprep.mubr.msk.f32.mxu1 %vm8613_vm0, %v8612_v0  ;;  %v9166_v33 = vsub.f32 %v263_v4, %v9153_v27 }
 0x205   : > { %8564 = vpow2.f32 %v3924_v24  ;;  %8240 = vmatprep.subr.mxu1 %v8612_v0  ;;  %v5834_v37 = vand.u32 4294901760, %v9157_v28 }
 0x206   : > { %8566 = vpow2.f32 %v3926_v25  ;;  %v6283_v41 = vand.u32 4294901760, %v9166_v33 }
 0x207   : > { %8208 = vmatmul.mubr.f32.vlgmr.msra.gmra.mrb[10].mxu0 %v4925_v8  ;;  %v5835_v43 = vsub.f32 %v9157_v28, %v5834_v37 }
 0x208   : > { %8211 = vmatpush3.msra.mxu0 %v4936_v63  ;;  %8212 = vmatprep.mubr.msk.f32.mxu0 %vm8613_vm0, %v8612_v0  ;;  %v6284_v46 = vsub.f32 %v9166_v33, %v6283_v41 }
 0x209   : > { %8215 = vmatprep.subr.mxu0 %v8612_v0  ;;  %v5836_v48 = vand.u32 4294901760, %v5835_v43 }
 0x20a   : > { %v6285_v50 = vand.u32 4294901760, %v6284_v46 }
 0x20b   : > { %8238 = vmatmul.mubr.f32.vlgmr.msra.gmra.mrb[10].mxu1 %v5374_v16 }
 0x20c   : > { %8241 = vmatpush3.msra.mxu1 %v5385_v6  ;;  %8242 = vmatprep.mubr.msk.f32.mxu1 %vm8613_vm0, %v8612_v0 }
 0x20d   : > { %8245 = vmatprep.subr.mxu1 %v8612_v0 }
 0x20f   : > { %v8565_v29 = vpop.eup %8564  ;;  %8213 = vmatmul.mubr.f32.vlgmr.msra.gmra.mrb[10].mxu0 %v9086_v62 }
 0x210   : > { %v8567_v30 = vpop.eup %8566  ;;  %v5753_v31 = vsel %vm3883_vm2, %v8565_v29, 0  ;;  %v3944_v32 = vsel %vm3883_vm2, %v8565_v29, 0.0  ;;  %8216 = vmatpush3.msra.mxu0 %v9066_v52  ;;  %8217 = vmatprep.mubr.msk.f32.mxu0 %vm8613_vm0, %v8612_v0 }
 0x211   : > { %v6202_v34 = vsel %vm3883_vm2, %v8567_v30, 0  ;;  %v9169_v35 = vand.u32 4294901760, %v5753_v31  ;;  %v3947_v36 = vsel %vm3883_vm2, %v8567_v30, 0.0  ;;  %3945 = vadd.xlane.f32.xlu0 %v3944_v32  ;;  %8250 = vmatprep.subr.mxu0 %v8612_v0 }
 0x212   : > { %v9174_v38 = vand.u32 4294901760, %v6202_v34  ;;  %3948 = vadd.xlane.f32.xlu1 %v3947_v36 }
 0x213   : > { %8243 = vmatmul.mubr.f32.vlgmr.msra.gmra.mrb[10].mxu1 %v9098_v7  ;;  %v5822_v39 = vsub.f32 %v5753_v31, %v9169_v35 }
 0x214   : > { %8246 = vmatpush3.msra.mxu1 %v9071_v54  ;;  %8247 = vmatprep.mubr.msk.f32.mxu1 %vm8613_vm0, %v8612_v0  ;;  %v6271_v40 = vsub.f32 %v6202_v34, %v9174_v38 }
 0x215   : > { %8280 = vmatprep.subr.mxu1 %v8612_v0  ;;  %v5823_v42 = vand.u32 4294901760, %v5822_v39 }
 0x216   : > { %v6272_v44 = vand.u32 4294901760, %v6271_v40 }
 0x217   : > { %8218 = vmatmul.mubr.f32.vlgmr.msra.gmra.mrb[10].mxu0 %v9086_v62  ;;  %v5824_v45 = vsub.f32 %v5822_v39, %v5823_v42 }
 0x218   : > { %8251 = vmatpush3.msra.mxu0 %v9148_v3  ;;  %8252 = vmatprep.mubr.msk.f32.mxu0 %vm8613_vm0, %v8612_v0  ;;  %v6273_v49 = vsub.f32 %v6271_v40, %v6272_v44 }
 0x219   : > { %v5825_v47 = vand.u32 4294901760, %v5824_v45  ;;  %8255 = vmatprep.subr.mxu0 %v8612_v0 }
 0x21a   : > { %v6274_v51 = vand.u32 4294901760, %v6273_v49 }
 0x21b   : > { %8248 = vmatmul.mubr.f32.vlgmr.msra.gmra.mrb[10].mxu1 %v9098_v7  ;;  %8253 = vmatmul.mubr.f32.vlgmr.msra.gmra.mrb[12].mxu0 %v5825_v47 }
 0x21c   : > { %8281 = vmatpush3.msra.mxu1 %v9153_v27  ;;  %8282 = vmatprep.mubr.msk.f32.mxu1 %vm8613_vm0, %v8612_v0 }
 0x21d   : > { %8285 = vmatprep.subr.mxu1 %v8612_v0  ;;  %8256 = vmatpush3.msra.mxu0 %v5836_v48 }
 0x21e   : > { %8257 = vmatprep.mubr.msk.f32.mxu0 %vm8613_vm0, %v8612_v0  ;;  %8260 = vmatprep.subr.mxu0 %v8612_v0 }
 0x21f   : > { %8283 = vmatmul.mubr.f32.vlgmr.msra.gmra.mrb[12].mxu1 %v6274_v51 }
 0x220   : > { %8286 = vmatpush3.msra.mxu1 %v6285_v50  ;;  %8287 = vmatprep.mubr.msk.f32.mxu1 %vm8613_vm0, %v8612_v0 }
 0x221   : > { %8290 = vmatprep.subr.mxu1 %v8612_v0 }
 0x223   : > { %8258 = vmatmul.mubr.f32.vlgmr.msra.gmra.mrb[12].mxu0 %v9169_v35 }
 0x224   : > { %8261 = vmatpush3.msra.mxu0 %v9157_v28  ;;  %8262 = vmatprep.mubr.msk.f32.mxu0 %vm8613_vm0, %v8612_v0 }
 0x225   : > { %8265 = vmatprep.subr.mxu0 %v8612_v0 }
 0x227   : > { %8288 = vmatmul.mubr.f32.vlgmr.msra.gmra.mrb[12].mxu1 %v9174_v38 }
 0x228   : > { %8291 = vmatpush3.msra.mxu1 %v9166_v33  ;;  %8292 = vmatprep.mubr.msk.f32.mxu1 %vm8613_vm0, %v8612_v0 }
 0x229   : > { %8295 = vmatprep.subr.mxu1 %v8612_v0 }
 0x22b   : > { %8263 = vmatmul.mubr.f32.vlgmr.msra.gmra.mrb[12].mxu0 %v5822_v39 }
 0x22c   : > { %v3904_v52 = vpop.xlane.xlu0 %3903  ;;  %8266 = vmatpush3.msra.mxu0 %v9148_v3  ;;  %8267 = vmatprep.mubr.msk.f32.mxu0 %vm8613_vm0, %v8612_v0  ;;  %v3907_v53 = vpop.xlane.xlu1 %3906 }
 0x22d   : > { %v3914_v54 = vsub.f32 %v9018_v9, %v3904_v52  ;;  %8270 = vmatprep.subr.mxu0 %v8612_v0  ;;  %v3915_v55 = vsub.f32 %v9020_v10, %v3907_v53  ;;  %v9226_v9 = vand.u32 4294901760, %v264_v60  ;;  %v265_v10 = vld [vmem:[%s8990_s25 + $0x38] sm:$0xff] }
 0x22e   : > { %v9231_v61 = vand.u32 4294901760, %v265_v10 }
 0x22f   : > { %v3928_v56 = vmul.f32 1.442695, %v3914_v54  ;;  %8293 = vmatmul.mubr.f32.vlgmr.msra.gmra.mrb[12].mxu1 %v6271_v40  ;;  %v3930_v58 = vmul.f32 1.442695, %v3915_v55  ;;  %v9235_v62 = vsub.f32 %v264_v60, %v9226_v9 }
 0x230   : > { %8296 = vmatpush3.msra.mxu1 %v9153_v27  ;;  %8297 = vmatprep.mubr.msk.f32.mxu1 %vm8613_vm0, %v8612_v0  ;;  %v9244_v5 = vsub.f32 %v265_v10, %v9231_v61 }
 0x231   : > { %8568 = vpow2.f32 %v3928_v56  ;;  %8300 = vmatprep.subr.mxu1 %v8612_v0  ;;  %v6732_v11 = vand.u32 4294901760, %v9235_v62 }
 0x232   : > { %8570 = vpow2.f32 %v3930_v58  ;;  %v7181_v14 = vand.u32 4294901760, %v9244_v5 }
 0x233   : > { %8268 = vmatmul.mubr.f32.vlgmr.msra.gmra.mrb[12].mxu0 %v5823_v42  ;;  %v6733_v16 = vsub.f32 %v9235_v62, %v6732_v11 }
 0x234   : > { %8271 = vmatpush3.msra.mxu0 %v5834_v37  ;;  %8272 = vmatprep.mubr.msk.f32.mxu0 %vm8613_vm0, %v8612_v0  ;;  %v7182_v19 = vsub.f32 %v9244_v5, %v7181_v14 }
 0x235   : > { %8275 = vmatprep.subr.mxu0 %v8612_v0  ;;  %v6734_v21 = vand.u32 4294901760, %v6733_v16 }
 0x236   : > { %v7183_v23 = vand.u32 4294901760, %v7182_v19 }
 0x237   : > { %8298 = vmatmul.mubr.f32.vlgmr.msra.gmra.mrb[12].mxu1 %v6272_v44 }
 0x238   : > { %8301 = vmatpush3.msra.mxu1 %v6283_v41  ;;  %8302 = vmatprep.mubr.msk.f32.mxu1 %vm8613_vm0, %v8612_v0 }
 0x239   : > { %8305 = vmatprep.subr.mxu1 %v8612_v0 }
 0x23b   : > { %v8569_v63 = vpop.eup %8568  ;;  %8273 = vmatmul.mubr.f32.vlgmr.msra.gmra.mrb[12].mxu0 %v9169_v35 }
 0x23c   : > { %v8571_v1 = vpop.eup %8570  ;;  %v6651_v2 = vsel %vm3883_vm2, %v8569_v63, 0  ;;  %v3950_v57 = vsel %vm3883_vm2, %v8569_v63, 0.0  ;;  %8276 = vmatpush3.msra.mxu0 %v9148_v3  ;;  %8277 = vmatprep.mubr.msk.f32.mxu0 %vm8613_vm0, %v8612_v0 }
 0x23d   : > { %v7100_v6 = vsel %vm3883_vm2, %v8571_v1, 0  ;;  %v9247_v7 = vand.u32 4294901760, %v6651_v2  ;;  %v3953_v8 = vsel %vm3883_vm2, %v8571_v1, 0.0  ;;  %3951 = vadd.xlane.f32.xlu0 %v3950_v57  ;;  %8310 = vmatprep.subr.mxu0 %v8612_v0 }
 0x23e   : > { %v9252_v59 = vand.u32 4294901760, %v7100_v6  ;;  %3954 = vadd.xlane.f32.xlu1 %v3953_v8 }
 0x23f   : > { %8303 = vmatmul.mubr.f32.vlgmr.msra.gmra.mrb[12].mxu1 %v9174_v38  ;;  %v6720_v12 = vsub.f32 %v6651_v2, %v9247_v7 }
 0x240   : > { %8306 = vmatpush3.msra.mxu1 %v9153_v27  ;;  %8307 = vmatprep.mubr.msk.f32.mxu1 %vm8613_vm0, %v8612_v0  ;;  %v7169_v13 = vsub.f32 %v7100_v6, %v9252_v59 }
 0x241   : > { %8340 = vmatprep.subr.mxu1 %v8612_v0  ;;  %v6721_v15 = vand.u32 4294901760, %v6720_v12 }
 0x242   : > { %v7170_v17 = vand.u32 4294901760, %v7169_v13 }
 0x243   : > { %8278 = vmatmul.mubr.f32.vlgmr.msra.gmra.mrb[12].mxu0 %v9169_v35  ;;  %v6722_v18 = vsub.f32 %v6720_v12, %v6721_v15 }
 0x244   : > { %8311 = vmatpush3.msra.mxu0 %v9226_v9  ;;  %8312 = vmatprep.mubr.msk.f32.mxu0 %vm8613_vm0, %v8612_v0  ;;  %v7171_v22 = vsub.f32 %v7169_v13, %v7170_v17 }
 0x245   : > { %v6723_v20 = vand.u32 4294901760, %v6722_v18  ;;  %8315 = vmatprep.subr.mxu0 %v8612_v0 }
 0x246   : > { %v7172_v24 = vand.u32 4294901760, %v7171_v22  ;;  %v3934_v25 = vpop.xlane.xlu0 %3933 }
 0x247   : > { %8308 = vmatmul.mubr.f32.vlgmr.msra.gmra.mrb[12].mxu1 %v9174_v38  ;;  %8313 = vmatmul.mubr.f32.vlgmr.msra.gmra.mrb[14].mxu0 %v6723_v20  ;;  %8572 = vrcp.f32 %v3934_v25 }
 0x248   : > { %8341 = vmatpush3.msra.mxu1 %v9231_v61  ;;  %8342 = vmatprep.mubr.msk.f32.mxu1 %vm8613_vm0, %v8612_v0 }
 0x249   : > { %8345 = vmatprep.subr.mxu1 %v8612_v0  ;;  %8316 = vmatpush3.msra.mxu0 %v6734_v21 }
 0x24a   : > { %8317 = vmatprep.mubr.msk.f32.mxu0 %vm8613_vm0, %v8612_v0  ;;  %8320 = vmatprep.subr.mxu0 %v8612_v0  ;;  %v3937_v26 = vpop.xlane.xlu1 %3936 }
 0x24b   : > { %8343 = vmatmul.mubr.f32.vlgmr.msra.gmra.mrb[14].mxu1 %v7172_v24  ;;  %8574 = vrcp.f32 %v3937_v26 }
 0x24c   : > { %8346 = vmatpush3.msra.mxu1 %v7183_v23  ;;  %8347 = vmatprep.mubr.msk.f32.mxu1 %vm8613_vm0, %v8612_v0 }
 0x24d   : > { %8350 = vmatprep.subr.mxu1 %v8612_v0 }
 0x24f   : > { %8318 = vmatmul.mubr.f32.vlgmr.msra.gmra.mrb[14].mxu0 %v9247_v7 }
 0x250   : > { %8321 = vmatpush3.msra.mxu0 %v9235_v62  ;;  %8322 = vmatprep.mubr.msk.f32.mxu0 %vm8613_vm0, %v8612_v0 }
 0x251   : > { %8325 = vmatprep.subr.mxu0 %v8612_v0  ;;  %v8573_v3 = vpop.eup %8572 }
 0x253   : > { %8348 = vmatmul.mubr.f32.vlgmr.msra.gmra.mrb[14].mxu1 %v9252_v59 }
 0x254   : > { %8351 = vmatpush3.msra.mxu1 %v9244_v5  ;;  %8352 = vmatprep.mubr.msk.f32.mxu1 %vm8613_vm0, %v8612_v0 }
 0x255   : > { %8355 = vmatprep.subr.mxu1 %v8612_v0  ;;  %v8575_v28 = vpop.eup %8574 }
 0x257   : > { %8323 = vmatmul.mubr.f32.vlgmr.msra.gmra.mrb[14].mxu0 %v6720_v12 }
 0x258   : > { %8326 = vmatpush3.msra.mxu0 %v9226_v9  ;;  %8327 = vmatprep.mubr.msk.f32.mxu0 %vm8613_vm0, %v8612_v0 }
 0x259   : > { %8330 = vmatprep.subr.mxu0 %v8612_v0 }
 0x25b   : > { %8353 = vmatmul.mubr.f32.vlgmr.msra.gmra.mrb[14].mxu1 %v7169_v13 }
 0x25c   : > { %8356 = vmatpush3.msra.mxu1 %v9231_v61  ;;  %8357 = vmatprep.mubr.msk.f32.mxu1 %vm8613_vm0, %v8612_v0 }
 0x25d   : > { %8360 = vmatprep.subr.mxu1 %v8612_v0 }
 0x25f   : > { %8328 = vmatmul.mubr.f32.vlgmr.msra.gmra.mrb[14].mxu0 %v6721_v15 }
 0x260   : > { %8331 = vmatpush3.msra.mxu0 %v6732_v11  ;;  %8332 = vmatprep.mubr.msk.f32.mxu0 %vm8613_vm0, %v8612_v0 }
 0x261   : > { %8335 = vmatprep.subr.mxu0 %v8612_v0 }
 0x263   : > { %8358 = vmatmul.mubr.f32.vlgmr.msra.gmra.mrb[14].mxu1 %v7170_v17 }
 0x264   : > { %8361 = vmatpush3.msra.mxu1 %v7181_v14  ;;  %8362 = vmatprep.mubr.msk.f32.mxu1 %vm8613_vm0, %v8612_v0 }
 0x265   : > { %8365 = vmatprep.subr.mxu1 %v8612_v0 }
 0x267   : > { %8333 = vmatmul.mubr.f32.vlgmr.msra.gmra.mrb[14].mxu0 %v9247_v7 }
 0x268   : > { %8336 = vmatpush3.msra.mxu0 %v9226_v9  ;;  %8337 = vmatprep.mubr.msk.f32.mxu0 %vm8613_vm0, %v8612_v0 }
 0x26b   : > { %8363 = vmatmul.mubr.f32.vlgmr.msra.gmra.mrb[14].mxu1 %v9252_v59 }
 0x26c   : > { %8366 = vmatpush3.msra.mxu1 %v9231_v61  ;;  %8367 = vmatprep.mubr.msk.f32.mxu1 %vm8613_vm0, %v8612_v0 }
 0x26f   : > { %8338 = vmatmul.mubr.f32.vlgmr.msra.gmra.mrb[14].mxu0 %v9247_v7 }
 0x272   : > { %v3940_v32 = vpop.xlane.xlu0 %3939 }
 0x273   : > { %8368 = vmatmul.mubr.f32.vlgmr.msra.gmra.mrb[14].mxu1 %v9252_v59  ;;  %8576 = vrcp.f32 %v3940_v32 }
 0x276   : > { %v3943_v33 = vpop.xlane.xlu1 %3942 }
 0x277   : > { %8578 = vrcp.f32 %v3943_v33 }
 0x27d   : > { %v8577_v34 = vpop.eup %8576 }
 0x281   : > { %v8579_v38 = vpop.eup %8578 }
 0x29e   : > { %v3946_v42 = vpop.xlane.xlu0 %3945 }
 0x29f   : > { %8580 = vrcp.f32 %v3946_v42  ;;  %v3949_v43 = vpop.xlane.xlu1 %3948 }
 0x2a0   : > { %8582 = vrcp.f32 %v3949_v43 }
 0x2a9   : > { %v8581_v44 = vpop.eup %8580 }
 0x2aa   : > { %v8583_v48 = vpop.eup %8582 }
 0x2be   : > { %v4401_v4 = vpop.f32.mrb[8].mxu0 }
 0x2bf   : > { %v7556_v27 = vmul.f32 %v8573_v3, %v4401_v4  ;;  %v8159_v0 = vpop.f32.mrb[9].mxu0 }
 0x2c1   : > { %7564 = vst.msk [vmem:[%s9318_s28] sm:$0xff] %vm266_vm1, %v7556_v27 }
 0x2c2   : > { %v4850_v29 = vpop.f32.mrb[8].mxu1 }
 0x2c3   : > { %v7557_v30 = vmul.f32 %v8575_v28, %v4850_v29  ;;  %v8189_v31 = vpop.f32.mrb[9].mxu1 }
 0x2c5   : > { %7565 = vst.msk [vmem:[%s9318_s28 + $0x8] sm:$0xff] %vm266_vm1, %v7557_v30 }
 0x2ca   : > { %v3952_v52 = vpop.xlane.xlu0 %3951 }
 0x2cb   : > { %8584 = vrcp.f32 %v3952_v52  ;;  %v3955_v53 = vpop.xlane.xlu1 %3954 }
 0x2cc   : > { %8586 = vrcp.f32 %v3955_v53 }
 0x2d5   : > { %v8585_v54 = vpop.eup %8584 }
 0x2d6   : > { %v8587_v60 = vpop.eup %8586 }
 0x2ea   : > { %v5299_v35 = vpop.f32.mrb[10].mxu0 }
 0x2eb   : > { %v7558_v36 = vmul.f32 %v8577_v34, %v5299_v35  ;;  %v8219_v37 = vpop.f32.mrb[11].mxu0 }
 0x2ed   : > { %7566 = vst.msk [vmem:[%s9318_s28 + $0x10] sm:$0xff] %vm266_vm1, %v7558_v36 }
 0x2ee   : > { %v5748_v39 = vpop.f32.mrb[10].mxu1 }
 0x2ef   : > { %v7559_v40 = vmul.f32 %v8579_v38, %v5748_v39  ;;  %v8249_v41 = vpop.f32.mrb[11].mxu1 }
 0x2f1   : > { %7567 = vst.msk [vmem:[%s9318_s28 + $0x18] sm:$0xff] %vm266_vm1, %v7559_v40 }
 0x316   : > { %v6197_v45 = vpop.f32.mrb[12].mxu0 }
 0x317   : > { %v7560_v46 = vmul.f32 %v8581_v44, %v6197_v45  ;;  %v8279_v47 = vpop.f32.mrb[13].mxu0 }
 0x319   : > { %7568 = vst.msk [vmem:[%s9318_s28 + $0x20] sm:$0xff] %vm266_vm1, %v7560_v46 }
 0x31a   : > { %v6646_v49 = vpop.f32.mrb[12].mxu1 }
 0x31b   : > { %v7561_v50 = vmul.f32 %v8583_v48, %v6646_v49  ;;  %v8309_v51 = vpop.f32.mrb[13].mxu1 }
 0x31d   : > { %7569 = vst.msk [vmem:[%s9318_s28 + $0x28] sm:$0xff] %vm266_vm1, %v7561_v50 }
 0x342   : > { %v7095_v55 = vpop.f32.mrb[14].mxu0 }
 0x343   : > { %v7562_v56 = vmul.f32 %v8585_v54, %v7095_v55  ;;  %v8339_v58 = vpop.f32.mrb[15].mxu0 }
 0x345   : > { %7570 = vst.msk [vmem:[%s9318_s28 + $0x30] sm:$0xff] %vm266_vm1, %v7562_v56 }
 0x346   : > { %v7544_v9 = vpop.f32.mrb[14].mxu1 }
 0x347   : > { %v7563_v10 = vmul.f32 %v8587_v60, %v7544_v9  ;;  %v8369_v61 = vpop.f32.mrb[15].mxu1 }
 0x349   : > { %7571 = vst.msk [vmem:[%s9318_s28 + $0x38] sm:$0xff] %vm266_vm1, %v7563_v10 }
 0x34a PF: > { %s13_s14 = sadd.s32 1, %s8610_s14   ;;  %s9349_s12 = smov %s8606_s13 }
 0x34b   : > { %p10_p5 = scmp.ge.s32.totalorder %s13_s14, 4   ;;  %s9350_s13 = smov %s9352_s15 }
 0x34d   :  { %12 = sbr.rel (!%p10_p5) target bundleno = 2 (0x2), region = 68 }

</bundles_post_ra>
